<compile_context>
chip_gen: v6e
topology: v6e:2x2x1
jax: 0.10.0
libtpu: 0.0.40
codegen_flags: <defaults>
</compile_context>

<pallas_src>
import functools

import jax
import jax.numpy as jnp
from jax import lax
from jax.experimental import pallas as pl
from jax.experimental.pallas import tpu as pltpu

EPS = 1e-5


def _pick_row_tile(H, W):
    """Largest divisor TR of H such that TR*W <= 512 im2col rows per MXU push."""
    best = 1
    for tr in range(1, H + 1):
        if H % tr == 0 and tr * W <= 512:
            best = tr
    return best


def _channel_att_kernel(xpad_ref, w_ref, cb_ref, bs_ref, bb_ref, out_ref,
                        *, H, W, C, TR):
    """One grid step = one batch element (NHWC).

    The conv is computed in TR-row blocks: for each of the 9 taps a
    (TR*W, C) x (C, C) bf16 MXU matmul (f32 accumulate); conv-BN+ReLU, the
    pre-folded bn_i-affine * channel-weight, the channel softmax and the
    residual add are fused on the whole (TR*W, C) slab in VMEM.
    """
    cb = cb_ref[0, :, :]   # (1, C) folded conv-BN bias (scale folded into weights)
    bs = bs_ref[0, :, :]   # (1, C) bn_i scale * (|gamma|/sum|gamma|)
    bb = bb_ref[0, :, :]   # (1, C) bn_i bias  * (|gamma|/sum|gamma|)

    def process_block(r0):
        acc = jnp.zeros((TR * W, C), jnp.float32)
        for dy in range(3):
            for dx in range(3):
                patch = xpad_ref[0, pl.ds(r0 + dy, TR), dx:dx + W, :]   # (TR, W, C)
                lhs = patch.reshape(TR * W, C).astype(jnp.bfloat16)
                acc = acc + jnp.dot(lhs, w_ref[dy * 3 + dx, :, :],
                                    preferred_element_type=jnp.float32)
        x111 = jnp.maximum(acc + cb, 0.0)           # conv + folded BN + ReLU
        z = x111 * bs + bb                          # bn_i affine, channel-weighted
        m = jnp.max(z, axis=-1, keepdims=True)
        e = jnp.exp(z - m)
        soft = e * pl.reciprocal(jnp.sum(e, axis=-1, keepdims=True), approx=True)
        # Residual comes from the interior of the (single) padded input stream.
        res = xpad_ref[0, pl.ds(r0 + 1, TR), 1:1 + W, :].reshape(TR * W, C)
        out = soft * x111 + res
        out_ref[0, pl.ds(r0, TR), :, :] = out.reshape(TR, W, C)

    n_rb = H // TR
    if n_rb == 1:
        process_block(0)
    else:
        def body(rb, carry):
            process_block(pl.multiple_of(rb * TR, TR))
            return carry
        lax.fori_loop(0, n_rb, body, 0)


def _select_bn_params(params, B):
    """Per-sample BN params: bn1..bn4 when B == 4 (torch.chunk path), else bn1."""
    if B == 4:
        gam = jnp.stack([params[f"bn{i}_gamma"] for i in range(1, 5)])
        bet = jnp.stack([params[f"bn{i}_beta"] for i in range(1, 5)])
        mean = jnp.stack([params[f"bn{i}_mean"] for i in range(1, 5)])
        var = jnp.stack([params[f"bn{i}_var"] for i in range(1, 5)])
    else:
        gam = jnp.tile(params["bn1_gamma"][None], (B, 1))
        bet = jnp.tile(params["bn1_beta"][None], (B, 1))
        mean = jnp.tile(params["bn1_mean"][None], (B, 1))
        var = jnp.tile(params["bn1_var"][None], (B, 1))
    return gam, bet, mean, var


def channel_att_pallas(x_nchw, params):
    x = jnp.transpose(x_nchw, (0, 2, 3, 1)).astype(jnp.float32)   # NCHW -> NHWC
    B, H, W, C = x.shape

    # Fold the conv11 BatchNorm (eval mode): scale goes into the conv weights,
    # the bias stays as a per-channel add.
    cs = params["bn_c_gamma"] / jnp.sqrt(params["bn_c_var"] + EPS)
    cb = params["bn_c_beta"] - params["bn_c_mean"] * cs
    # (Cout, Cin, 3, 3) * cs[Cout] -> (9 taps, Cin, Cout), bf16 for the MXU.
    w = params["conv_w"] * cs[:, None, None, None]
    w = jnp.transpose(w, (2, 3, 1, 0)).reshape(9, C, C).astype(jnp.bfloat16)

    gam, bet, mean, var = _select_bn_params(params, B)            # each (B, C)
    bs = gam / jnp.sqrt(var + EPS)
    bb = bet - mean * bs
    wbn = jnp.abs(gam) / jnp.sum(jnp.abs(gam), axis=1, keepdims=True)
    bs2 = (bs * wbn).reshape(B, 1, C)                             # pre-folded
    bb2 = (bb * wbn).reshape(B, 1, C)

    xpad = jnp.pad(x, ((0, 0), (1, 1), (1, 1), (0, 0)))           # padding=1
    TR = _pick_row_tile(H, W)

    kernel = functools.partial(_channel_att_kernel, H=H, W=W, C=C, TR=TR)
    out = pl.pallas_call(
        kernel,
        out_shape=jax.ShapeDtypeStruct((B, H, W, C), jnp.float32),
        grid_spec=pltpu.PrefetchScalarGridSpec(
            num_scalar_prefetch=0,
            grid=(B,),
            in_specs=[
                pl.BlockSpec((1, H + 2, W + 2, C), lambda b: (b, 0, 0, 0)),  # padded x (conv + residual)
                pl.BlockSpec((9, C, C), lambda b: (0, 0, 0)),                # bf16 conv taps (BN-scaled)
                pl.BlockSpec((1, 1, C), lambda b: (0, 0, 0)),                # conv-BN bias
                pl.BlockSpec((1, 1, C), lambda b: (b, 0, 0)),                # bn_i scale * weight_bn
                pl.BlockSpec((1, 1, C), lambda b: (b, 0, 0)),                # bn_i bias  * weight_bn
            ],
            out_specs=pl.BlockSpec((1, H, W, C), lambda b: (b, 0, 0, 0)),
        ),
        compiler_params=pltpu.CompilerParams(
            dimension_semantics=("parallel",),
            vmem_limit_bytes=48 * 1024 * 1024,
        ),
    )(xpad, w, cb.reshape(1, 1, C), bs2, bb2)
    return jnp.transpose(out, (0, 3, 1, 2))                       # NHWC -> NCHW


def channel_att_reference(x_nchw, params):
    """Pure-JAX reference (NCHW, f32) for numerical verification."""
    B = x_nchw.shape[0]
    conv = lax.conv_general_dilated(
        x_nchw, params["conv_w"], window_strides=(1, 1), padding="SAME",
        dimension_numbers=("NCHW", "OIHW", "NCHW"),
        precision=lax.Precision.HIGHEST)
    cs = params["bn_c_gamma"] / jnp.sqrt(params["bn_c_var"] + EPS)
    cb = params["bn_c_beta"] - params["bn_c_mean"] * cs
    x111 = jnp.maximum(conv * cs[None, :, None, None] + cb[None, :, None, None], 0.0)

    gam, bet, mean, var = _select_bn_params(params, B)
    bs = gam / jnp.sqrt(var + EPS)
    bb = bet - mean * bs
    wbn = jnp.abs(gam) / jnp.sum(jnp.abs(gam), axis=1, keepdims=True)

    x1 = x111 * bs[:, :, None, None] + bb[:, :, None, None]
    cat = x1 * wbn[:, :, None, None]
    soft = jax.nn.softmax(cat, axis=1)
    return soft * x111 + x_nchw


def init_params(key, C):
    keys = jax.random.split(key, 5 + 4 * 4)
    params = {
        "conv_w": jax.random.normal(keys[0], (C, C, 3, 3), jnp.float32)
                  * (1.0 / jnp.sqrt(9.0 * C)),
        "bn_c_gamma": 1.0 + 0.1 * jax.random.normal(keys[1], (C,), jnp.float32),
        "bn_c_beta": 0.1 * jax.random.normal(keys[2], (C,), jnp.float32),
        "bn_c_mean": 0.1 * jax.random.normal(keys[3], (C,), jnp.float32),
        "bn_c_var": jax.random.uniform(keys[4], (C,), jnp.float32, minval=0.5, maxval=1.5),
    }
    for i in range(1, 5):
        k = keys[5 + (i - 1) * 4: 5 + i * 4]
        params[f"bn{i}_gamma"] = 1.0 + 0.1 * jax.random.normal(k[0], (C,), jnp.float32)
        params[f"bn{i}_beta"] = 0.1 * jax.random.normal(k[1], (C,), jnp.float32)
        params[f"bn{i}_mean"] = 0.1 * jax.random.normal(k[2], (C,), jnp.float32)
        params[f"bn{i}_var"] = jax.random.uniform(k[3], (C,), jnp.float32, minval=0.5, maxval=1.5)
    return params


if __name__ == "__main__":
    # conv11 hardcodes 256 channels, so channels must be 256; keep batch and
    # spatial extent small. B=2 exercises the non-chunked (else) branch.
    B, C, H, W = 2, 256, 8, 8
    key = jax.random.PRNGKey(0)
    kx, kp = jax.random.split(key)
    x = jax.random.normal(kx, (B, C, H, W), jnp.float32)
    params = init_params(kp, C)

    out = jax.block_until_ready(channel_att_pallas(x, params))
    ref = jax.block_until_ready(channel_att_reference(x, params))
    assert out.shape == (B, C, H, W)
    max_err = float(jnp.max(jnp.abs(out - ref)))
    if max_err > 1e-2:
        raise AssertionError(f"mismatch vs reference: max abs err {max_err}")
    print("KERNEL_OK")
</pallas_src>

<mosaic_0001>
module attributes {stable_mosaic.version = 11 : i64} {
  func.func @_channel_att_kernel(%arg0: i32, %arg1: memref<1x10x10x256xf32, #tpu.memory_space<vmem>>, %arg2: memref<9x256x256xbf16, #tpu.memory_space<vmem>>, %arg3: memref<1x1x256xf32, #tpu.memory_space<vmem>>, %arg4: memref<1x1x256xf32, #tpu.memory_space<vmem>>, %arg5: memref<1x1x256xf32, #tpu.memory_space<vmem>>, %arg6: memref<1x8x8x256xf32, #tpu.memory_space<vmem>>) attributes {dimension_semantics = [#tpu.dimension_semantics<parallel>], iteration_bounds = array<i64: 2>, scalar_prefetch = 0 : i64, scratch_operands = 0 : i64, tpu.core_type = #tpu.core_type<tc>, window_params = [{transform_indices = @transform_0, window_bounds = array<i64: 1, 10, 10, 256>}, {pipeline_mode = #tpu.pipeline_mode<synchronous>, transform_indices = @transform_1, window_bounds = array<i64: 9, 256, 256>}, {pipeline_mode = #tpu.pipeline_mode<synchronous>, transform_indices = @transform_2, window_bounds = array<i64: 1, 1, 256>}, {transform_indices = @transform_3, window_bounds = array<i64: 1, 1, 256>}, {transform_indices = @transform_4, window_bounds = array<i64: 1, 1, 256>}, {transform_indices = @transform_5, window_bounds = array<i64: 1, 8, 8, 256>}]} {
    %c0 = arith.constant 0 : index
    %c0_0 = arith.constant 0 : index
    %c0_1 = arith.constant 0 : index
    %0 = vector.load %arg3[%c0, %c0_0, %c0_1] : memref<1x1x256xf32, #tpu.memory_space<vmem>>, vector<1x1x256xf32>
    %1 = vector.shape_cast %0 : vector<1x1x256xf32> to vector<1x256xf32>
    %c0_2 = arith.constant 0 : index
    %c0_3 = arith.constant 0 : index
    %c0_4 = arith.constant 0 : index
    %2 = vector.load %arg4[%c0_2, %c0_3, %c0_4] : memref<1x1x256xf32, #tpu.memory_space<vmem>>, vector<1x1x256xf32>
    %3 = vector.shape_cast %2 : vector<1x1x256xf32> to vector<1x256xf32>
    %c0_5 = arith.constant 0 : index
    %c0_6 = arith.constant 0 : index
    %c0_7 = arith.constant 0 : index
    %4 = vector.load %arg5[%c0_5, %c0_6, %c0_7] : memref<1x1x256xf32, #tpu.memory_space<vmem>>, vector<1x1x256xf32>
    %5 = vector.shape_cast %4 : vector<1x1x256xf32> to vector<1x256xf32>
    %cst = arith.constant 0.000000e+00 : f32
    %6 = vector.broadcast %cst : f32 to vector<64x256xf32>
    %c0_8 = arith.constant 0 : index
    %c0_9 = arith.constant 0 : index
    %c0_10 = arith.constant 0 : index
    %c0_11 = arith.constant 0 : index
    %7 = vector.load %arg1[%c0_8, %c0_9, %c0_10, %c0_11] : memref<1x10x10x256xf32, #tpu.memory_space<vmem>>, vector<1x8x8x256xf32>
    %8 = vector.shape_cast %7 : vector<1x8x8x256xf32> to vector<8x8x256xf32>
    %9 = vector.shape_cast %8 : vector<8x8x256xf32> to vector<64x256xf32>
    %10 = arith.truncf %9 : vector<64x256xf32> to vector<64x256xbf16>
    %c0_12 = arith.constant 0 : index
    %c0_13 = arith.constant 0 : index
    %c0_14 = arith.constant 0 : index
    %11 = vector.load %arg2[%c0_12, %c0_13, %c0_14] : memref<9x256x256xbf16, #tpu.memory_space<vmem>>, vector<1x256x256xbf16>
    %12 = vector.shape_cast %11 : vector<1x256x256xbf16> to vector<256x256xbf16>
    %cst_15 = arith.constant dense<0.000000e+00> : vector<64x256xf32>
    %13 = tpu.matmul %10, %12, %cst_15 {dimension_numbers = #tpu.dot_dimension_numbers<[1], [0], [0], [1], [0, 0, 1, 1], [], []>} : vector<64x256xbf16>, vector<256x256xbf16>, vector<64x256xf32> -> vector<64x256xf32>
    %14 = arith.addf %6, %13 : vector<64x256xf32>
    %c0_16 = arith.constant 0 : index
    %c0_17 = arith.constant 0 : index
    %c1 = arith.constant 1 : index
    %c0_18 = arith.constant 0 : index
    %15 = vector.load %arg1[%c0_16, %c0_17, %c1, %c0_18] : memref<1x10x10x256xf32, #tpu.memory_space<vmem>>, vector<1x8x8x256xf32>
    %16 = vector.shape_cast %15 : vector<1x8x8x256xf32> to vector<8x8x256xf32>
    %17 = vector.shape_cast %16 : vector<8x8x256xf32> to vector<64x256xf32>
    %18 = arith.truncf %17 : vector<64x256xf32> to vector<64x256xbf16>
    %c1_19 = arith.constant 1 : index
    %c0_20 = arith.constant 0 : index
    %c0_21 = arith.constant 0 : index
    %19 = vector.load %arg2[%c1_19, %c0_20, %c0_21] : memref<9x256x256xbf16, #tpu.memory_space<vmem>>, vector<1x256x256xbf16>
    %20 = vector.shape_cast %19 : vector<1x256x256xbf16> to vector<256x256xbf16>
    %cst_22 = arith.constant dense<0.000000e+00> : vector<64x256xf32>
    %21 = tpu.matmul %18, %20, %cst_22 {dimension_numbers = #tpu.dot_dimension_numbers<[1], [0], [0], [1], [0, 0, 1, 1], [], []>} : vector<64x256xbf16>, vector<256x256xbf16>, vector<64x256xf32> -> vector<64x256xf32>
    %22 = arith.addf %14, %21 : vector<64x256xf32>
    %c0_23 = arith.constant 0 : index
    %c0_24 = arith.constant 0 : index
    %c2 = arith.constant 2 : index
    %c0_25 = arith.constant 0 : index
    %23 = vector.load %arg1[%c0_23, %c0_24, %c2, %c0_25] : memref<1x10x10x256xf32, #tpu.memory_space<vmem>>, vector<1x8x8x256xf32>
    %24 = vector.shape_cast %23 : vector<1x8x8x256xf32> to vector<8x8x256xf32>
    %25 = vector.shape_cast %24 : vector<8x8x256xf32> to vector<64x256xf32>
    %26 = arith.truncf %25 : vector<64x256xf32> to vector<64x256xbf16>
    %c2_26 = arith.constant 2 : index
    %c0_27 = arith.constant 0 : index
    %c0_28 = arith.constant 0 : index
    %27 = vector.load %arg2[%c2_26, %c0_27, %c0_28] : memref<9x256x256xbf16, #tpu.memory_space<vmem>>, vector<1x256x256xbf16>
    %28 = vector.shape_cast %27 : vector<1x256x256xbf16> to vector<256x256xbf16>
    %cst_29 = arith.constant dense<0.000000e+00> : vector<64x256xf32>
    %29 = tpu.matmul %26, %28, %cst_29 {dimension_numbers = #tpu.dot_dimension_numbers<[1], [0], [0], [1], [0, 0, 1, 1], [], []>} : vector<64x256xbf16>, vector<256x256xbf16>, vector<64x256xf32> -> vector<64x256xf32>
    %30 = arith.addf %22, %29 : vector<64x256xf32>
    %c0_30 = arith.constant 0 : index
    %c1_31 = arith.constant 1 : index
    %c0_32 = arith.constant 0 : index
    %c0_33 = arith.constant 0 : index
    %31 = vector.load %arg1[%c0_30, %c1_31, %c0_32, %c0_33] : memref<1x10x10x256xf32, #tpu.memory_space<vmem>>, vector<1x8x8x256xf32>
    %32 = vector.shape_cast %31 : vector<1x8x8x256xf32> to vector<8x8x256xf32>
    %33 = vector.shape_cast %32 : vector<8x8x256xf32> to vector<64x256xf32>
    %34 = arith.truncf %33 : vector<64x256xf32> to vector<64x256xbf16>
    %c3 = arith.constant 3 : index
    %c0_34 = arith.constant 0 : index
    %c0_35 = arith.constant 0 : index
    %35 = vector.load %arg2[%c3, %c0_34, %c0_35] : memref<9x256x256xbf16, #tpu.memory_space<vmem>>, vector<1x256x256xbf16>
    %36 = vector.shape_cast %35 : vector<1x256x256xbf16> to vector<256x256xbf16>
    %cst_36 = arith.constant dense<0.000000e+00> : vector<64x256xf32>
    %37 = tpu.matmul %34, %36, %cst_36 {dimension_numbers = #tpu.dot_dimension_numbers<[1], [0], [0], [1], [0, 0, 1, 1], [], []>} : vector<64x256xbf16>, vector<256x256xbf16>, vector<64x256xf32> -> vector<64x256xf32>
    %38 = arith.addf %30, %37 : vector<64x256xf32>
    %c0_37 = arith.constant 0 : index
    %c1_38 = arith.constant 1 : index
    %c1_39 = arith.constant 1 : index
    %c0_40 = arith.constant 0 : index
    %39 = vector.load %arg1[%c0_37, %c1_38, %c1_39, %c0_40] : memref<1x10x10x256xf32, #tpu.memory_space<vmem>>, vector<1x8x8x256xf32>
    %40 = vector.shape_cast %39 : vector<1x8x8x256xf32> to vector<8x8x256xf32>
    %41 = vector.shape_cast %40 : vector<8x8x256xf32> to vector<64x256xf32>
    %42 = arith.truncf %41 : vector<64x256xf32> to vector<64x256xbf16>
    %c4 = arith.constant 4 : index
    %c0_41 = arith.constant 0 : index
    %c0_42 = arith.constant 0 : index
    %43 = vector.load %arg2[%c4, %c0_41, %c0_42] : memref<9x256x256xbf16, #tpu.memory_space<vmem>>, vector<1x256x256xbf16>
    %44 = vector.shape_cast %43 : vector<1x256x256xbf16> to vector<256x256xbf16>
    %cst_43 = arith.constant dense<0.000000e+00> : vector<64x256xf32>
    %45 = tpu.matmul %42, %44, %cst_43 {dimension_numbers = #tpu.dot_dimension_numbers<[1], [0], [0], [1], [0, 0, 1, 1], [], []>} : vector<64x256xbf16>, vector<256x256xbf16>, vector<64x256xf32> -> vector<64x256xf32>
    %46 = arith.addf %38, %45 : vector<64x256xf32>
    %c0_44 = arith.constant 0 : index
    %c1_45 = arith.constant 1 : index
    %c2_46 = arith.constant 2 : index
    %c0_47 = arith.constant 0 : index
    %47 = vector.load %arg1[%c0_44, %c1_45, %c2_46, %c0_47] : memref<1x10x10x256xf32, #tpu.memory_space<vmem>>, vector<1x8x8x256xf32>
    %48 = vector.shape_cast %47 : vector<1x8x8x256xf32> to vector<8x8x256xf32>
    %49 = vector.shape_cast %48 : vector<8x8x256xf32> to vector<64x256xf32>
    %50 = arith.truncf %49 : vector<64x256xf32> to vector<64x256xbf16>
    %c5 = arith.constant 5 : index
    %c0_48 = arith.constant 0 : index
    %c0_49 = arith.constant 0 : index
    %51 = vector.load %arg2[%c5, %c0_48, %c0_49] : memref<9x256x256xbf16, #tpu.memory_space<vmem>>, vector<1x256x256xbf16>
    %52 = vector.shape_cast %51 : vector<1x256x256xbf16> to vector<256x256xbf16>
    %cst_50 = arith.constant dense<0.000000e+00> : vector<64x256xf32>
    %53 = tpu.matmul %50, %52, %cst_50 {dimension_numbers = #tpu.dot_dimension_numbers<[1], [0], [0], [1], [0, 0, 1, 1], [], []>} : vector<64x256xbf16>, vector<256x256xbf16>, vector<64x256xf32> -> vector<64x256xf32>
    %54 = arith.addf %46, %53 : vector<64x256xf32>
    %c0_51 = arith.constant 0 : index
    %c2_52 = arith.constant 2 : index
    %c0_53 = arith.constant 0 : index
    %c0_54 = arith.constant 0 : index
    %55 = vector.load %arg1[%c0_51, %c2_52, %c0_53, %c0_54] : memref<1x10x10x256xf32, #tpu.memory_space<vmem>>, vector<1x8x8x256xf32>
    %56 = vector.shape_cast %55 : vector<1x8x8x256xf32> to vector<8x8x256xf32>
    %57 = vector.shape_cast %56 : vector<8x8x256xf32> to vector<64x256xf32>
    %58 = arith.truncf %57 : vector<64x256xf32> to vector<64x256xbf16>
    %c6 = arith.constant 6 : index
    %c0_55 = arith.constant 0 : index
    %c0_56 = arith.constant 0 : index
    %59 = vector.load %arg2[%c6, %c0_55, %c0_56] : memref<9x256x256xbf16, #tpu.memory_space<vmem>>, vector<1x256x256xbf16>
    %60 = vector.shape_cast %59 : vector<1x256x256xbf16> to vector<256x256xbf16>
    %cst_57 = arith.constant dense<0.000000e+00> : vector<64x256xf32>
    %61 = tpu.matmul %58, %60, %cst_57 {dimension_numbers = #tpu.dot_dimension_numbers<[1], [0], [0], [1], [0, 0, 1, 1], [], []>} : vector<64x256xbf16>, vector<256x256xbf16>, vector<64x256xf32> -> vector<64x256xf32>
    %62 = arith.addf %54, %61 : vector<64x256xf32>
    %c0_58 = arith.constant 0 : index
    %c2_59 = arith.constant 2 : index
    %c1_60 = arith.constant 1 : index
    %c0_61 = arith.constant 0 : index
    %63 = vector.load %arg1[%c0_58, %c2_59, %c1_60, %c0_61] : memref<1x10x10x256xf32, #tpu.memory_space<vmem>>, vector<1x8x8x256xf32>
    %64 = vector.shape_cast %63 : vector<1x8x8x256xf32> to vector<8x8x256xf32>
    %65 = vector.shape_cast %64 : vector<8x8x256xf32> to vector<64x256xf32>
    %66 = arith.truncf %65 : vector<64x256xf32> to vector<64x256xbf16>
    %c7 = arith.constant 7 : index
    %c0_62 = arith.constant 0 : index
    %c0_63 = arith.constant 0 : index
    %67 = vector.load %arg2[%c7, %c0_62, %c0_63] : memref<9x256x256xbf16, #tpu.memory_space<vmem>>, vector<1x256x256xbf16>
    %68 = vector.shape_cast %67 : vector<1x256x256xbf16> to vector<256x256xbf16>
    %cst_64 = arith.constant dense<0.000000e+00> : vector<64x256xf32>
    %69 = tpu.matmul %66, %68, %cst_64 {dimension_numbers = #tpu.dot_dimension_numbers<[1], [0], [0], [1], [0, 0, 1, 1], [], []>} : vector<64x256xbf16>, vector<256x256xbf16>, vector<64x256xf32> -> vector<64x256xf32>
    %70 = arith.addf %62, %69 : vector<64x256xf32>
    %c0_65 = arith.constant 0 : index
    %c2_66 = arith.constant 2 : index
    %c2_67 = arith.constant 2 : index
    %c0_68 = arith.constant 0 : index
    %71 = vector.load %arg1[%c0_65, %c2_66, %c2_67, %c0_68] : memref<1x10x10x256xf32, #tpu.memory_space<vmem>>, vector<1x8x8x256xf32>
    %72 = vector.shape_cast %71 : vector<1x8x8x256xf32> to vector<8x8x256xf32>
    %73 = vector.shape_cast %72 : vector<8x8x256xf32> to vector<64x256xf32>
    %74 = arith.truncf %73 : vector<64x256xf32> to vector<64x256xbf16>
    %c8 = arith.constant 8 : index
    %c0_69 = arith.constant 0 : index
    %c0_70 = arith.constant 0 : index
    %75 = vector.load %arg2[%c8, %c0_69, %c0_70] : memref<9x256x256xbf16, #tpu.memory_space<vmem>>, vector<1x256x256xbf16>
    %76 = vector.shape_cast %75 : vector<1x256x256xbf16> to vector<256x256xbf16>
    %cst_71 = arith.constant dense<0.000000e+00> : vector<64x256xf32>
    %77 = tpu.matmul %74, %76, %cst_71 {dimension_numbers = #tpu.dot_dimension_numbers<[1], [0], [0], [1], [0, 0, 1, 1], [], []>} : vector<64x256xbf16>, vector<256x256xbf16>, vector<64x256xf32> -> vector<64x256xf32>
    %78 = arith.addf %70, %77 : vector<64x256xf32>
    %79 = vector.broadcast %1 : vector<1x256xf32> to vector<64x256xf32>
    %80 = arith.addf %78, %79 : vector<64x256xf32>
    %cst_72 = arith.constant 0.000000e+00 : f32
    %81 = vector.broadcast %cst_72 : f32 to vector<64x256xf32>
    %82 = arith.maximumf %80, %81 : vector<64x256xf32>
    %83 = vector.broadcast %3 : vector<1x256xf32> to vector<64x256xf32>
    %84 = arith.mulf %82, %83 : vector<64x256xf32>
    %85 = vector.broadcast %5 : vector<1x256xf32> to vector<64x256xf32>
    %86 = arith.addf %84, %85 : vector<64x256xf32>
    %cst_73 = arith.constant dense<0xFF800000> : vector<64xf32>
    %87 = vector.multi_reduction <maximumf>, %86, %cst_73 [1] : vector<64x256xf32> to vector<64xf32>
    %88 = vector.shape_cast %87 : vector<64xf32> to vector<64x1xf32>
    %89 = vector.broadcast %88 : vector<64x1xf32> to vector<64x256xf32>
    %90 = arith.subf %86, %89 : vector<64x256xf32>
    %91 = math.exp %90 : vector<64x256xf32>
    %cst_74 = arith.constant dense<0.000000e+00> : vector<64xf32>
    %92 = vector.multi_reduction <add>, %91, %cst_74 [1] : vector<64x256xf32> to vector<64xf32>
    %93 = vector.shape_cast %92 : vector<64xf32> to vector<64x1xf32>
    %94 = tpu.reciprocal %93 {approx = true} : vector<64x1xf32> -> vector<64x1xf32>
    %95 = vector.broadcast %94 : vector<64x1xf32> to vector<64x256xf32>
    %96 = arith.mulf %91, %95 : vector<64x256xf32>
    %c0_75 = arith.constant 0 : index
    %c1_76 = arith.constant 1 : index
    %c1_77 = arith.constant 1 : index
    %c0_78 = arith.constant 0 : index
    %97 = vector.load %arg1[%c0_75, %c1_76, %c1_77, %c0_78] : memref<1x10x10x256xf32, #tpu.memory_space<vmem>>, vector<1x8x8x256xf32>
    %98 = vector.shape_cast %97 : vector<1x8x8x256xf32> to vector<8x8x256xf32>
    %99 = vector.shape_cast %98 : vector<8x8x256xf32> to vector<64x256xf32>
    %100 = arith.mulf %96, %82 : vector<64x256xf32>
    %101 = arith.addf %100, %99 : vector<64x256xf32>
    %102 = vector.shape_cast %101 : vector<64x256xf32> to vector<8x8x256xf32>
    %c0_79 = arith.constant 0 : index
    %c0_80 = arith.constant 0 : index
    %c0_81 = arith.constant 0 : index
    %c0_82 = arith.constant 0 : index
    %103 = vector.load %arg6[%c0_79, %c0_80, %c0_81, %c0_82] : memref<1x8x8x256xf32, #tpu.memory_space<vmem>>, vector<1x8x8x256xf32>
    %104 = vector.shape_cast %103 : vector<1x8x8x256xf32> to vector<8x8x256xf32>
    %105 = vector.shape_cast %102 : vector<8x8x256xf32> to vector<1x8x8x256xf32>
    tpu.vector_store %arg6[%c0_79, %c0_80, %c0_81, %c0_82], %105 {strides = array<i32>} : memref<1x8x8x256xf32, #tpu.memory_space<vmem>>, vector<1x8x8x256xf32>,
    return
  }
  func.func @transform_0(%arg0: i32) -> (i32, i32, i32, i32) {
    %c0_i32 = arith.constant 0 : i32
    %c0_i32_0 = arith.constant 0 : i32
    %c0_i32_1 = arith.constant 0 : i32
    %c0_i32_2 = arith.constant 0 : i32
    return %arg0, %c0_i32, %c0_i32_0, %c0_i32_1 : i32, i32, i32, i32
  }
  func.func @transform_1(%arg0: i32) -> (i32, i32, i32) {
    %c0_i32 = arith.constant 0 : i32
    %c0_i32_0 = arith.constant 0 : i32
    %c0_i32_1 = arith.constant 0 : i32
    %c0_i32_2 = arith.constant 0 : i32
    return %c0_i32, %c0_i32_0, %c0_i32_1 : i32, i32, i32
  }
  func.func @transform_2(%arg0: i32) -> (i32, i32, i32) {
    %c0_i32 = arith.constant 0 : i32
    %c0_i32_0 = arith.constant 0 : i32
    %c0_i32_1 = arith.constant 0 : i32
    %c0_i32_2 = arith.constant 0 : i32
    return %c0_i32, %c0_i32_0, %c0_i32_1 : i32, i32, i32
  }
  func.func @transform_3(%arg0: i32) -> (i32, i32, i32) {
    %c0_i32 = arith.constant 0 : i32
    %c0_i32_0 = arith.constant 0 : i32
    %c0_i32_1 = arith.constant 0 : i32
    return %arg0, %c0_i32, %c0_i32_0 : i32, i32, i32
  }
  func.func @transform_4(%arg0: i32) -> (i32, i32, i32) {
    %c0_i32 = arith.constant 0 : i32
    %c0_i32_0 = arith.constant 0 : i32
    %c0_i32_1 = arith.constant 0 : i32
    return %arg0, %c0_i32, %c0_i32_0 : i32, i32, i32
  }
  func.func @transform_5(%arg0: i32) -> (i32, i32, i32, i32) {
    %c0_i32 = arith.constant 0 : i32
    %c0_i32_0 = arith.constant 0 : i32
    %c0_i32_1 = arith.constant 0 : i32
    %c0_i32_2 = arith.constant 0 : i32
    return %arg0, %c0_i32, %c0_i32_0, %c0_i32_1 : i32, i32, i32, i32
  }
}

</mosaic_0001>

<bundles_post_ra>
// kernel: tpu_custom_call.1
= control target key start
LH: loop header
LB: loop body
LE: loop exit
PB: predicated region body
PF: predicated region fallthrough
CT: control target
= control target key end

     0   :  { %s6648_s0 = inlined_call_operand.vmem [shape: f32[2,10,10,256], index: 0, kind: input, shape index: {}]   ;;  %s6649_s1 = inlined_call_operand.hbm [shape: bf16[9,256,256], index: 1, kind: input, shape index: {}]   ;;  %s6650_s2 = inlined_call_operand.hbm [shape: f32[1,1,256], index: 2, kind: input, shape index: {}]   ;;  %s6651_s3 = inlined_call_operand.hbm [shape: f32[2,1,256], index: 3, kind: input, shape index: {}]   ;;  %s6652_s4 = inlined_call_operand.hbm [shape: f32[2,1,256], index: 4, kind: input, shape index: {}]   ;;  %s6653_s5 = inlined_call_operand.hbm [shape: f32[2,8,8,256], index: 5, kind: output, shape index: {}]  }
   0x1   :  { %6678 = sst [smem:[#allocation52_spill]] %s6649_s1 }
   0x2   :  { %10 = vsyncpa [#allocation3], 0 }
   0x3   :  { %11 = vsyncpa [#allocation6], 0 }
   0x4   :  { %12 = vsyncpa [#allocation4], 0 }
   0x5   :  { %14 = vsyncpa [#allocation4 + $0x1], 0  ;;  %s5408_s18 = smov 0   ;;  %s5410_s19 = smov 0  }
   0x6   :  { %s5412_s20 = smov 0   ;;  %s5414_s21 = smov 0  }
   0x7 LB: > { %s5429_s22 = sadd.s32 4294967295, %s5367_s21   ;;  %s4124_s23 = sadd.s32 4294967294, %s5367_s21   ;;  %s5367_s21 = sphi %s5414_s21, %s6778_s21   ;;  %s5363_s20 = sphi %s5412_s20, %s6777_s20   ;;  %s5359_s19 = sphi %s5410_s19, %s6776_s19   ;;  %s5355_s18 = sphi %s5408_s18, %s6775_s18  }
   0x8   : > { %p108_p0 = scmp.ne.s32.totalorder %s5359_s19, %s5355_s18  ;;  %p6655_p1 = scmp.eq.s32.totalorder %s5429_s22, 0 }
   0x9   : > { %p158_p2 = scmp.eq.s32.totalorder %s5429_s22, 1  ;;  %p164_p3 = scmp.eq.s32.totalorder %s4124_s23, 1 }
   0xa   : > { %p5438_p4 = por %p6655_p1, %p108_p0  ;;  %p4125_p5 = scmp.ge.s32.totalorder %s5367_s21, 1 }
   0xb   : > { %p5443_p6 = por %p164_p3, %p108_p0  ;;  %p171_p7 = scmp.lt.s32.totalorder %s5367_s21, 3 }
   0xc   : > { %s6679_s24 = scalar_select %p5438_p4, 1, 0 }
   0xd   : > { %s6680_s25 = scalar_select %p5443_p6, 1, 0 }
   0xe   : > { %p5448_p8 = pnand %p4125_p5, %p171_p7  ;;  %s5369_s27 = smov [#allocation2]  }
   0xf   : > { %s183_s28 = sshll.u32 %s5369_s27, 4  ;;  %s5462_s30 = sadd.s32 1, %s5367_s21   ;;  %s184_s28 = int_to_ptr.vmem [resolvable:$true] %s183_s28 }
  0x10   : > { %s6681_s26 = scalar_select %p5448_p8, 1, 0 }
  0x11   : > { %p4645_p9 = pneg %p5448_p8  ;;  %s95_s6 = sadd.s32 1, %s5363_s20 }
  0x12   : > { %s92_s7 = ssub.s32 %s5367_s21, %s5462_s30  ;;  %s5198_s8 = scalar_lea.vmem %s184_s28, 36864 }
  0x13   : > { %p5457_p11 = pnand %p4645_p9, %p6655_p1  ;;  %p5199_p13 = scmp.ne.s32.totalorder %s184_s28, %s5198_s8 }
  0x14   : > { %p5206_p5 = scmp.lt.s32.totalorder %s184_s28, %s184_s28  ;;  %p5207_p7 = scmp.lt.s32.totalorder %s5198_s8, %s5198_s8 }
  0x15   : > { %p6656_p12 = pneg %p5457_p11 }
  0x16   : > { %p5208_p9 = por %p5207_p7, %p5206_p5 }
  0x17   : > { %p5201_p0 = pnand %p5199_p13, %p6656_p12 }
  0x19   : > { %p5202_p3 = pneg %p5201_p0 }
  0x1b   : > { %p5209_p10 = pnand %p5208_p9, %p5202_p3 }
  0x1d   : > { %5212 = shalt.err (!%p5209_p10)
}
  0x1e   : > { %s5370_s9 = smov 128   ;;  %s5371_s10 = smov 8  }
  0x1f   : > { %s6683_s1 = sld [smem:[#allocation52_spill]]  ;;  %p93_p13 = scmp.eq.s32.totalorder %s92_s7, 0 }
  0x20   : > { %p102_p10 = scmp.ne.s32.totalorder %s5363_s20, %s5359_s19  ;;  %p103_p0 = scmp.eq.s32.totalorder %s5367_s21, 0 }
  0x21   : > { %p4665_p3 = scmp.lt.s32.totalorder %s5367_s21, 2  ;;  %s216_s15 = sand.u32 1, %s5367_s21  }
  0x22   : > { %s5482_s13 = scalar_select %p93_p13, %s5363_s20, %s95_s6  }
  0x23   : > { %p104_p5 = por %p103_p0, %p102_p10  ;;  %p5486_p7 = por %p158_p2, %p102_p10 }
  0x24   : > { %s218_s16 = sand.u32 1, %s5363_s20   ;;  %s6654_s23 = sshll.u32 %s5367_s21, 5 }
  0x25   : > { %4648 = dma.hbm_to_vmem [thread:$0]  (!%p5457_p11), %s6683_s1, 36864, %s184_s28, [#allocation3], %s5370_s9, %s5370_s9, %s5371_s10  }
  0x26   : > { %s6684_s14 = scalar_select %p5486_p7, 1, 0 }
  0x27   : > { %s5492_s17 = sshll.u32 %s218_s16, 1  ;;  %s5500_s7 = scalar_lea.hbm %s6651_s3, %s6654_s23 }
  0x28   : > { %s220_s6 = scalar_lea.vmem [#allocation7], %s5492_s17  ;;  %p5505_p2 = pnand %p4665_p3, %p104_p5 }
  0x29   : > { %s228_s8 = sshll.u32 %s220_s6, 4  ;;  %s5372_s10 = smov [#allocation5]   ;;  %s5503_s8 = int_to_ptr.vmem [resolvable:$true] %s228_s8 }
  0x2a   : > { %s197_s11 = sshll.u32 %s5372_s10, 4  ;;  %s5509_s12 = scalar_lea.sflag [#allocation3], %s216_s15  ;;  %s198_s11 = int_to_ptr.vmem [resolvable:$true] %s197_s11 }
  0x2b   : > { %s5213_s16 = scalar_lea.hbm %s5500_s7, 32  ;;  %p5215_p13 = pneg %p5505_p2 }
  0x2c   : > { %p5214_p9 = scmp.ne.s32.totalorder %s5500_s7, %s5213_s16  ;;  %s5218_s6 = scalar_lea.hbm %s6651_s3, 64 }
  0x2d   : > { %p5219_p3 = scmp.lt.s32.totalorder %s5500_s7, %s6651_s3  ;;  %p5220_p5 = scmp.lt.s32.totalorder %s5218_s6, %s5213_s16 }
  0x2e   : > { %p5216_p10 = pnand %p5215_p13, %p5214_p9 }
  0x2f   : > { %p5221_p1 = por %p5220_p5, %p5219_p3 }
  0x30   : > { %p5217_p0 = pneg %p5216_p10 }
  0x32   : > { %p5222_p12 = pnand %p5221_p1, %p5217_p0 }
  0x34   : > { %5225 = shalt.err (!%p5222_p12)
}
  0x35   : > { %s5226_s15 = scalar_lea.vmem %s5503_s8, 32  ;;  %s5373_s10 = smov [#allocation7]  }
  0x36   : > { %p5227_p6 = scmp.ne.s32.totalorder %s5503_s8, %s5226_s15  ;;  %s5231_s27 = sshll.u32 %s5373_s10, 4  ;;  %s5232_s27 = int_to_ptr.vmem [resolvable:$false] %s5231_s27 }
  0x37   : > { %s5233_s28 = scalar_lea.vmem %s5232_s27, 64  ;;  %p5234_p7 = scmp.lt.s32.totalorder %s5503_s8, %s5232_s27 }
  0x38   : > { %p5229_p9 = pnand %p5227_p6, %p5215_p13  ;;  %p5235_p4 = scmp.lt.s32.totalorder %s5233_s28, %s5226_s15 }
  0x3a   : > { %p5230_p10 = pneg %p5229_p9  ;;  %p5236_p8 = por %p5235_p4, %p5234_p7 }
  0x3c   : > { %p5237_p3 = pnand %p5236_p8, %p5230_p10 }
  0x3e   : > { %5240 = shalt.err (!%p5237_p3)
}
  0x3f   : > { %4655 = dma.hbm_to_vmem [thread:$0]  (!%p5505_p2), %s5500_s7, 32, %s5503_s8, %s5509_s12  }
  0x40   : > { %s6686_s1 = sshll.u32 %s5367_s21, 5  ;;  %s5252_s10 = scalar_lea.vmem %s198_s11, 32 }
  0x41   : > { %s5541_s6 = scalar_lea.hbm %s6652_s4, %s6686_s1  ;;  %p5253_p1 = scmp.ne.s32.totalorder %s198_s11, %s5252_s10 }
  0x42   : > { %p6687_p4 = pneg %p5457_p11  ;;  %p5260_p12 = scmp.lt.s32.totalorder %s198_s11, %s198_s11 }
  0x43   : > { %p5261_p7 = scmp.lt.s32.totalorder %s5252_s10, %s5252_s10 }
  0x44   : > { %p5255_p6 = pnand %p5253_p1, %p6687_p4 }
  0x45   : > { %p5262_p0 = por %p5261_p7, %p5260_p12 }
  0x46   : > { %p5256_p8 = pneg %p5255_p6 }
  0x48   : > { %p5263_p5 = pnand %p5262_p0, %p5256_p8 }
  0x4a   : > { %5266 = shalt.err (!%p5263_p5)
}
  0x4b   : > { %4651 = dma.hbm_to_vmem [thread:$0]  (!%p5457_p11), %s6650_s2, 32, %s198_s11, [#allocation6]  }
  0x4c   : > { %s239_s15 = scalar_lea.vmem [#allocation8], %s5492_s17  ;;  %s5267_s28 = scalar_lea.hbm %s5541_s6, 32 }
  0x4d   : > { %s247_s27 = sshll.u32 %s239_s15, 4  ;;  %p5268_p9 = scmp.ne.s32.totalorder %s5541_s6, %s5267_s28  ;;  %s248_s27 = int_to_ptr.vmem [resolvable:$true] %s247_s27 }
  0x4e   : > { %s5272_s23 = scalar_lea.hbm %s6652_s4, 64  ;;  %p5273_p1 = scmp.lt.s32.totalorder %s5541_s6, %s6652_s4 }
  0x4f   : > { %p5270_p10 = pnand %p5268_p9, %p5215_p13  ;;  %p5274_p4 = scmp.lt.s32.totalorder %s5272_s23, %s5267_s28 }
  0x51   : > { %p5271_p3 = pneg %p5270_p10  ;;  %p5275_p6 = por %p5274_p4, %p5273_p1 }
  0x53   : > { %p5276_p11 = pnand %p5275_p6, %p5271_p3 }
  0x55   : > { %5279 = shalt.err (!%p5276_p11)
}
  0x56   : > { %s5280_s17 = scalar_lea.vmem %s248_s27, 32  ;;  %s5374_s11 = smov [#allocation8]  }
  0x57   : > { %p5281_p8 = scmp.ne.s32.totalorder %s248_s27, %s5280_s17  ;;  %s5285_s7 = sshll.u32 %s5374_s11, 4  ;;  %s5286_s7 = int_to_ptr.vmem [resolvable:$false] %s5285_s7 }
  0x58   : > { %s5287_s8 = scalar_lea.vmem %s5286_s7, 64  ;;  %p5288_p0 = scmp.lt.s32.totalorder %s248_s27, %s5286_s7 }
  0x59   : > { %p5283_p12 = pnand %p5281_p8, %p5215_p13  ;;  %p5289_p5 = scmp.lt.s32.totalorder %s5287_s8, %s5280_s17 }
  0x5b   : > { %p5284_p7 = pneg %p5283_p12  ;;  %p5290_p9 = por %p5289_p5, %p5288_p0 }
  0x5d   : > { %p5291_p10 = pnand %p5290_p9, %p5284_p7 }
  0x5f   : > { %5294 = shalt.err (!%p5291_p10)
}
  0x60   : > { %4658 = dma.hbm_to_vmem [thread:$0]  (!%p5505_p2), %s5541_s6, 32, %s248_s27, %s5509_s12  }
  0x61   : > { %p6688_p3 = scmp.ne.s32.totalorder %s6681_s26, 0 }
  0x63   : > { %256 = sbr.rel (%p6688_p3) target bundleno = 1000 (0x3e8), region = 40 }
  0x68   : > { %p6689_p13 = scmp.eq.s32.totalorder %s5429_s22, 0 }
  0x6a   : > { %5338 = dma.done.wait (%p6689_p13), [#allocation3], 36864   ;;  %p6690_p1 = pmov %p6689_p13 }
  0x6c   : > { %5340 = vsyncadd (%p6690_p1), [#allocation3], 4294930432  ;;  %p6691_p4 = pmov %p6690_p1 }
  0x6d   : > { %p6692_p6 = pmov %p6690_p1 }
  0x6e   : > { %5342 = dma.done.wait (%p6691_p4), [#allocation6], 32  }
  0x6f   : > { %5344 = vsyncadd (%p6692_p6), [#allocation6], 4294967264  ;;  %s266_s9 = sand.u32 1, %s5429_s22   ;;  %s5583_s12 = sand.u32 1, %s5359_s19  }
  0x70   : > { %s4138_s26 = sshll.u32 %s5583_s12, 1  ;;  %s267_s6 = scalar_lea.sflag [#allocation3], %s266_s9 }
  0x71   : > { %s5588_s15 = scalar_lea.vmem [#allocation7], %s4138_s26  ;;  %p6693_p2 = scmp.ne.s32.totalorder %s6679_s24, 0 }
  0x73   : > { %5346 = dma.done.wait (%p6693_p2), %s267_s6, 64  }
  0x74   : > { %5348 = vsyncadd (%p6693_p2), %s267_s6, 4294967232  ;;  %v4707_v0 = vld [vmem:[#allocation2 + $0x174] ss:$8 sps:$4 sm:$0xff]   ;;  %v4711_v2 = vld [vmem:[#allocation2 + $0x170] ss:$8 sps:$4 sm:$0xff]   ;;  %p316_p11 = scmp.lt.s32.totalorder %s5429_s22, 1 }
  0x75   : > { %v4709_v1 = vld [vmem:[#allocation2 + $0x74] ss:$8 sps:$4 sm:$0xff]   ;;  %710 = vmatprep.subr.bf16.mxu0 %v4707_v0  ;;  %v4712_v3 = vld [vmem:[#allocation2 + $0x70] ss:$8 sps:$4 sm:$0xff]   ;;  %v4713_v4 = vld [vmem:[#allocation2 + $0x164] ss:$8 sps:$4 sm:$0xff]  }
  0x76   : > { %943 = vmatprep.subr.bf16.mxu1 %v4709_v1  ;;  %711 = vmatpush1.bf16.msra.mxu0 %v4711_v2  ;;  %v4715_v5 = vld [vmem:[#allocation2 + $0x64] ss:$8 sps:$4 sm:$0xff]   ;;  %v4717_v6 = vld [vmem:[#allocation2 + $0x160] ss:$8 sps:$4 sm:$0xff]   ;;  %v4719_v8 = vld [vmem:[#allocation2 + $0x154] ss:$8 sps:$4 sm:$0xff]  }
  0x77   : > { %944 = vmatpush1.bf16.msra.mxu1 %v4712_v3  ;;  %712 = vmatprep.subr.bf16.mxu0 %v4713_v4  ;;  %v4718_v7 = vld [vmem:[#allocation2 + $0x60] ss:$8 sps:$4 sm:$0xff]   ;;  %v4721_v9 = vld [vmem:[#allocation2 + $0x54] ss:$8 sps:$4 sm:$0xff]   ;;  %v4723_v10 = vld [vmem:[#allocation2 + $0x150] ss:$8 sps:$4 sm:$0xff]  }
  0x78   : > { %945 = vmatprep.subr.bf16.mxu1 %v4715_v5  ;;  %v4724_v11 = vld [vmem:[#allocation2 + $0x50] ss:$8 sps:$4 sm:$0xff]   ;;  %v4725_v12 = vld [vmem:[#allocation2 + $0x144] ss:$8 sps:$4 sm:$0xff]   ;;  %v4729_v14 = vld [vmem:[#allocation2 + $0x140] ss:$8 sps:$4 sm:$0xff]  }
  0x79   : > { %v4727_v13 = vld [vmem:[#allocation2 + $0x44] ss:$8 sps:$4 sm:$0xff]   ;;  %v4730_v15 = vld [vmem:[#allocation2 + $0x40] ss:$8 sps:$4 sm:$0xff]   ;;  %v4731_v16 = vld [vmem:[#allocation2 + $0x134] ss:$8 sps:$4 sm:$0xff]  }
  0x7a   : > { %713 = vmatpush1.bf16.msra.mxu0 %v4717_v6  ;;  %v4733_v17 = vld [vmem:[#allocation2 + $0x34] ss:$8 sps:$4 sm:$0xff]   ;;  %v4735_v18 = vld [vmem:[#allocation2 + $0x130] ss:$8 sps:$4 sm:$0xff]   ;;  %v4737_v20 = vld [vmem:[#allocation2 + $0x124] ss:$8 sps:$4 sm:$0xff]  }
  0x7b   : > { %946 = vmatpush1.bf16.msra.mxu1 %v4718_v7  ;;  %714 = vmatprep.subr.bf16.mxu0 %v4719_v8  ;;  %v4736_v19 = vld [vmem:[#allocation2 + $0x30] ss:$8 sps:$4 sm:$0xff]   ;;  %v4739_v21 = vld [vmem:[#allocation2 + $0x24] ss:$8 sps:$4 sm:$0xff]   ;;  %v4741_v22 = vld [vmem:[#allocation2 + $0x120] ss:$8 sps:$4 sm:$0xff]  }
  0x7c   : > { %947 = vmatprep.subr.bf16.mxu1 %v4721_v9  ;;  %v4742_v23 = vld [vmem:[#allocation2 + $0x20] ss:$8 sps:$4 sm:$0xff]   ;;  %v4743_v24 = vld [vmem:[#allocation2 + $0x114] ss:$8 sps:$4 sm:$0xff]   ;;  %v4747_v26 = vld [vmem:[#allocation2 + $0x110] ss:$8 sps:$4 sm:$0xff]  }
  0x7d   : > { %v4745_v25 = vld [vmem:[#allocation2 + $0x14] ss:$8 sps:$4 sm:$0xff]   ;;  %v4748_v27 = vld [vmem:[#allocation2 + $0x10] ss:$8 sps:$4 sm:$0xff]   ;;  %v4749_v28 = vld [vmem:[#allocation2 + $0x104] ss:$8 sps:$4 sm:$0xff]  }
  0x7e   : > { %715 = vmatpush1.bf16.msra.mxu0 %v4723_v10  ;;  %v4751_v29 = vld [vmem:[#allocation2 + $0x4] ss:$8 sps:$4 sm:$0xff]   ;;  %v4753_v30 = vld [vmem:[#allocation2 + $0x100] ss:$8 sps:$4 sm:$0xff]   ;;  %v4755_v32 = vld [vmem:[#allocation2 + $0x1f4] ss:$8 sps:$4 sm:$0xff]  }
  0x7f   : > { %948 = vmatpush1.bf16.msra.mxu1 %v4724_v11  ;;  %716 = vmatprep.subr.bf16.mxu0 %v4725_v12  ;;  %v4754_v31 = vld [vmem:[#allocation2] ss:$8 sps:$4 sm:$0xff]   ;;  %v4757_v33 = vld [vmem:[#allocation2 + $0xf4] ss:$8 sps:$4 sm:$0xff]   ;;  %v4759_v34 = vld [vmem:[#allocation2 + $0x1f0] ss:$8 sps:$4 sm:$0xff]  }
  0x80   : > { %949 = vmatprep.subr.bf16.mxu1 %v4727_v13  ;;  %v4760_v35 = vld [vmem:[#allocation2 + $0xf0] ss:$8 sps:$4 sm:$0xff]   ;;  %s317_s24 = scalar_select %p316_p11, %s5429_s22, 1  ;;  %v4761_v36 = vld [vmem:[#allocation2 + $0x1e4] ss:$8 sps:$4 sm:$0xff]   ;;  %vm444_vm0 = vcmask 1046528  }
  0x81   : > { %v4763_v37 = vld [vmem:[#allocation2 + $0xe4] ss:$8 sps:$4 sm:$0xff]   ;;  %v4765_v38 = vld [vmem:[#allocation2 + $0x1e0] ss:$8 sps:$4 sm:$0xff]   ;;  %v4767_v40 = vld [vmem:[#allocation2 + $0x1d4] ss:$8 sps:$4 sm:$0xff]  }
  0x82   : > { %717 = vmatpush1.bf16.msra.mxu0 %v4729_v14  ;;  %s4630_s27 = smul.u32 320, %s317_s24  ;;  %v4766_v39 = vld [vmem:[#allocation2 + $0xe0] ss:$8 sps:$4 sm:$0xff]   ;;  %v4769_v41 = vld [vmem:[#allocation2 + $0xd4] ss:$8 sps:$4 sm:$0xff]   ;;  %vm1080_vm1 = vcmask 1045504  }
  0x83   : > { %950 = vmatpush1.bf16.msra.mxu1 %v4730_v15  ;;  %718 = vmatprep.subr.bf16.mxu0 %v4731_v16  ;;  %v4771_v42 = vld [vmem:[#allocation2 + $0x1d0] ss:$8 sps:$4 sm:$0xff]   ;;  %v4773_v44 = vld [vmem:[#allocation2 + $0x1c4] ss:$8 sps:$4 sm:$0xff]   ;;  %v4777_v46 = vld [vmem:[#allocation2 + $0x1c0] ss:$8 sps:$4 sm:$0xff]  }
  0x84   : > { %951 = vmatprep.subr.bf16.mxu1 %v4733_v17  ;;  %v4772_v43 = vld [vmem:[#allocation2 + $0xd0] ss:$8 sps:$4 sm:$0xff]   ;;  %s5599_s29 = scalar_lea.vmem %s6648_s0, %s4630_s27  ;;  %v4775_v45 = vld [vmem:[#allocation2 + $0xc4] ss:$8 sps:$4 sm:$0xff]   ;;  %v4778_v47 = vld [vmem:[#allocation2 + $0xc0] ss:$8 sps:$4 sm:$0xff]  }
  0x85   : > { %v381_v48 = vld [vmem:[%s5599_s29 + $0x8] sm:$0xfe]  ;;  %v383_v49 = vld [vmem:[%s5599_s29 + $0x18] sm:$0x1]  ;;  %v4779_v58 = vld [vmem:[#allocation2 + $0x1b4] ss:$8 sps:$4 sm:$0xff]  }
  0x86   : > { %719 = vmatpush1.bf16.msra.mxu0 %v4735_v18  ;;  %v385_v50 = vld [vmem:[%s5599_s29 + $0x28] sm:$0xfe]  ;;  %v387_v51 = vld [vmem:[%s5599_s29 + $0x38] sm:$0x1]  ;;  %v448_v52 = vrot.slane %v381_v48, 1  ;;  %v449_v53 = vrot.slane %v383_v49, 1 }
  0x87   : > { %952 = vmatpush1.bf16.msra.mxu1 %v4736_v19  ;;  %720 = vmatprep.subr.bf16.mxu0 %v4737_v20  ;;  %v454_v54 = vrot.slane %v385_v50, 1  ;;  %v455_v55 = vrot.slane %v387_v51, 1  ;;  %v325_v56 = vld [vmem:[%s5599_s29 + $0x8] sm:$0xff]  ;;  %v4781_v59 = vld [vmem:[#allocation2 + $0xb4] ss:$8 sps:$4 sm:$0xff]   ;;  %s279_s23 = scalar_lea.vmem [#allocation8], %s4138_s26 }
  0x88   : > { %953 = vmatprep.subr.bf16.mxu1 %v4739_v21  ;;  %v5607_v57 = vld [vmem:[%s5599_s29 + $0x28] sm:$0xff]  ;;  %v450_v61 = vsel %vm444_vm0, %v448_v52, %v449_v53  ;;  %v4783_v63 = vld [vmem:[#allocation2 + $0x1b0] ss:$8 sps:$4 sm:$0xff]   ;;  %v4791_v6 = vld [vmem:[#allocation2 + $0x194] ss:$8 sps:$4 sm:$0xff]   ;;  %s4140_s16 = sshll.u32 %s5583_s12, 7 }
  0x89   : > { %v341_v60 = vpack.c.bf16 %v5607_v57, %v325_v56  ;;  %v456_v62 = vsel %vm444_vm0, %v454_v54, %v455_v55  ;;  %v4784_v1 = vld [vmem:[#allocation2 + $0xb0] ss:$8 sps:$4 sm:$0xff]   ;;  %v4785_v2 = vld [vmem:[#allocation2 + $0x1a4] ss:$8 sps:$4 sm:$0xff]   ;;  %v4789_v4 = vld [vmem:[#allocation2 + $0x1a0] ss:$8 sps:$4 sm:$0xff]  }
  0x8a   : > { %721 = vmatpush1.bf16.msra.mxu0 %v4741_v22  ;;  %v510_v0 = vpack.c.bf16 %v456_v62, %v450_v61  ;;  %v4787_v3 = vld [vmem:[#allocation2 + $0xa4] ss:$8 sps:$4 sm:$0xff]   ;;  %v4790_v5 = vld [vmem:[#allocation2 + $0xa0] ss:$8 sps:$4 sm:$0xff]   ;;  %v4793_v7 = vld [vmem:[#allocation2 + $0x94] ss:$8 sps:$4 sm:$0xff]  }
  0x8b   : > { %954 = vmatpush1.bf16.msra.mxu1 %v4742_v23  ;;  %722 = vmatprep.subr.bf16.mxu0 %v4743_v24  ;;  %v380_v8 = vld [vmem:[%s5599_s29] sm:$0xfe]  ;;  %v382_v9 = vld [vmem:[%s5599_s29 + $0x10] sm:$0x1]  ;;  %v5628_v49 = vld [vmem:[%s5599_s29 + $0x48] sm:$0xff]  ;;  %s6530_s10 = scalar_lea.vmem [#allocation9], %s4140_s16 }
  0x8c   : > { %955 = vmatprep.subr.bf16.mxu1 %v4745_v25  ;;  %975 = vmatprep.mubr.bf16.mxu1 %v341_v60  ;;  %v384_v10 = vld [vmem:[%s5599_s29 + $0x20] sm:$0xfe]  ;;  %v386_v11 = vld [vmem:[%s5599_s29 + $0x30] sm:$0x1]  ;;  %v445_v14 = vrot.slane %v380_v8, 1  ;;  %v446_v15 = vrot.slane %v382_v9, 1 }
  0x8d   : > { %742 = vmatprep.mubr.bf16.mxu0 %v510_v0  ;;  %v4795_v12 = vld [vmem:[#allocation2 + $0x190] ss:$8 sps:$4 sm:$0xff]   ;;  %v451_v16 = vrot.slane %v384_v10, 1  ;;  %v452_v17 = vrot.slane %v386_v11, 1  ;;  %v4797_v18 = vld [vmem:[#allocation2 + $0x184] ss:$8 sps:$4 sm:$0xff]  }
  0x8e   : > { %723 = vmatpush1.bf16.msra.mxu0 %v4747_v26  ;;  %v4796_v13 = vld [vmem:[#allocation2 + $0x90] ss:$8 sps:$4 sm:$0xff]   ;;  %v4799_v19 = vld [vmem:[#allocation2 + $0x84] ss:$8 sps:$4 sm:$0xff]   ;;  %v4801_v20 = vld [vmem:[#allocation2 + $0x180] ss:$8 sps:$4 sm:$0xff]   ;;  %v447_v23 = vsel %vm444_vm0, %v445_v14, %v446_v15 }
  0x8f   : > { %956 = vmatpush1.bf16.msra.mxu1 %v4748_v27  ;;  %724 = vmatprep.subr.bf16.mxu0 %v4749_v28  ;;  %v4802_v21 = vld [vmem:[#allocation2 + $0x80] ss:$8 sps:$4 sm:$0xff]   ;;  %v453_v24 = vsel %vm444_vm0, %v451_v16, %v452_v17  ;;  %v4805_v26 = vld [vmem:[#allocation2 + $0x274] ss:$8 sps:$4 sm:$0xff]   ;;  %v390_v53 = vld [vmem:[%s5599_s29 + $0x50] sm:$0x1] }
  0x90   : > { %957 = vmatprep.subr.bf16.mxu1 %v4751_v29  ;;  %v324_v22 = vld [vmem:[%s5599_s29] sm:$0xff]  ;;  %v4808_v27 = vld [vmem:[#allocation2 + $0x374] ss:$8 sps:$4 sm:$0xff]   ;;  %v509_v28 = vpack.c.bf16 %v453_v24, %v447_v23  ;;  %v5631_v51 = vld [vmem:[%s5599_s29 + $0x68] sm:$0xff]  ;;  %v458_v61 = vrot.slane %v390_v53, 1  ;;  %s4597_s17 = sshll.u32 %s5429_s22, 11 }
  0x91   : > { %v5620_v25 = vld [vmem:[%s5599_s29 + $0x20] sm:$0xff]  ;;  %v343_v56 = vpack.c.bf16 %v5631_v51, %v5628_v49  ;;  %v4832_v8 = vld [vmem:[#allocation2 + $0x334] ss:$8 sps:$4 sm:$0xff]   ;;  %v4827_v11 = vld [vmem:[#allocation2 + $0x230] ss:$8 sps:$4 sm:$0xff]   ;;  %s4000_s11 = sshll.u32 %s6530_s10, 4  ;;  %s6599_s9 = scalar_lea.hbm %s6653_s5, %s4597_s17  ;;  %s6601_s11 = int_to_ptr.vmem [resolvable:$true] %s4000_s11 }
  0x92   : > { %725 = vmatpush1.bf16.msra.mxu0 %v4753_v30  ;;  %v340_v29 = vpack.c.bf16 %v5620_v25, %v324_v22  ;;  %v4803_v30 = vld [vmem:[#allocation2 + $0x270] ss:$8 sps:$4 sm:$0xff]   ;;  %v388_v52 = vld [vmem:[%s5599_s29 + $0x40] sm:$0xfe]  ;;  %v397_v15 = vld [vmem:[%s5599_s29 + $0x88] sm:$0xfe] }
  0x93   : > { %958 = vmatpush1.bf16.msra.mxu1 %v4754_v31  ;;  %726 = vmatprep.subr.bf16.mxu0 %v4755_v32  ;;  %v4806_v31 = vld [vmem:[#allocation2 + $0x370] ss:$8 sps:$4 sm:$0xff]   ;;  %v4811_v32 = vld [vmem:[#allocation2 + $0x264] ss:$8 sps:$4 sm:$0xff]   ;;  %v4821_v54 = vld [vmem:[#allocation2 + $0x240] ss:$8 sps:$4 sm:$0xff]  }
  0x94   : > { %959 = vmatprep.subr.bf16.mxu1 %v4757_v33  ;;  %v4814_v33 = vld [vmem:[#allocation2 + $0x364] ss:$8 sps:$4 sm:$0xff]   ;;  %v457_v60 = vrot.slane %v388_v52, 1  ;;  %v399_v16 = vld [vmem:[%s5599_s29 + $0x98] sm:$0x1]  ;;  %s3987_s22 = scalar_lea.sflag [#allocation4], %s5583_s12 }
  0x95   : > { %v4838_v14 = vld [vmem:[#allocation2 + $0x324] ss:$8 sps:$4 sm:$0xff]   ;;  %v473_v22 = vrot.slane %v399_v16, 1  ;;  %s5295_s26 = scalar_lea.vmem %s6601_s11, 2048  ;;  %p6772_p12 = scmp.ne.s32.totalorder %s6684_s14, 0 }
  0x96   : > { %727 = vmatpush2.bf16.msra.mxu0 %v4759_v34  ;;  %v4809_v34 = vld [vmem:[#allocation2 + $0x260] ss:$8 sps:$4 sm:$0xff]   ;;  %v4847_v52 = vld [vmem:[#allocation2 + $0x204] ss:$8 sps:$4 sm:$0xff]   ;;  %p5296_p8 = scmp.ne.s32.totalorder %s6601_s11, %s5295_s26  ;;  %s5375_s6 = smov [#allocation9]  }
  0x97   : > { %960 = vmatpush2.bf16.msra.mxu1 %v4760_v35  ;;  %728 = vmatprep.subr.bf16.mxu0 %v4761_v36  ;;  %v4812_v35 = vld [vmem:[#allocation2 + $0x360] ss:$8 sps:$4 sm:$0xff]   ;;  %v4817_v36 = vld [vmem:[#allocation2 + $0x254] ss:$8 sps:$4 sm:$0xff]   ;;  %v4850_v53 = vld [vmem:[#allocation2 + $0x304] ss:$8 sps:$4 sm:$0xff]  }
  0x98   : > { %961 = vmatprep.subr.bf16.mxu1 %v4763_v37  ;;  %v4820_v37 = vld [vmem:[#allocation2 + $0x354] ss:$8 sps:$4 sm:$0xff]   ;;  %v401_v17 = vld [vmem:[%s5599_s29 + $0xa8] sm:$0xfe]  ;;  %p5297_p7 = pnand %p5296_p8, %p6772_p12 }
  0x99   : > { %v478_v23 = vrot.slane %v401_v17, 1  ;;  %v5656_v24 = vld [vmem:[%s5599_s29 + $0x88] sm:$0xff] }
  0x9a   : > { %729 = vmatpush2.bf16.msra.mxu0 %v4765_v38  ;;  %v4815_v38 = vld [vmem:[#allocation2 + $0x250] ss:$8 sps:$4 sm:$0xff]   ;;  %p5298_p0 = pneg %p5297_p7 }
  0x9b   : > { %962 = vmatpush2.bf16.msra.mxu1 %v4766_v39  ;;  %730 = vmatprep.subr.bf16.mxu0 %v4767_v40  ;;  %v4818_v39 = vld [vmem:[#allocation2 + $0x350] ss:$8 sps:$4 sm:$0xff]   ;;  %v4823_v40 = vld [vmem:[#allocation2 + $0x244] ss:$8 sps:$4 sm:$0xff]  }
  0x9c   : > { %963 = vmatprep.subr.bf16.mxu1 %v4769_v41  ;;  %v4826_v41 = vld [vmem:[#allocation2 + $0x344] ss:$8 sps:$4 sm:$0xff]  }
  0x9e   : > { %731 = vmatpush2.bf16.msra.mxu0 %v4771_v42  ;;  %v389_v42 = vld [vmem:[%s5599_s29 + $0x48] sm:$0xfe] }
  0x9f   : > { %964 = vmatpush2.bf16.msra.mxu1 %v4772_v43  ;;  %732 = vmatprep.subr.bf16.mxu0 %v4773_v44  ;;  %v391_v43 = vld [vmem:[%s5599_s29 + $0x58] sm:$0x1]  ;;  %v393_v44 = vld [vmem:[%s5599_s29 + $0x68] sm:$0xfe] }
  0xa0   : > { %965 = vmatprep.subr.bf16.mxu1 %v4775_v45  ;;  %v395_v45 = vld [vmem:[%s5599_s29 + $0x78] sm:$0x1]  ;;  %v466_v48 = vrot.slane %v393_v44, 1 }
  0xa1   : > { %v467_v50 = vrot.slane %v395_v45, 1 }
  0xa2   : > { %733 = vmatpush2.bf16.msra.mxu0 %v4777_v46  ;;  %v460_v46 = vrot.slane %v389_v42, 1  ;;  %v5673_v42 = vld [vmem:[%s5599_s29 + $0xa0] sm:$0xff] }
  0xa3   : > { %966 = vmatpush2.bf16.msra.mxu1 %v4778_v47  ;;  %734 = vmatprep.subr.bf16.mxu0 %v4779_v58  ;;  %v461_v47 = vrot.slane %v391_v43, 1  ;;  %v392_v58 = vld [vmem:[%s5599_s29 + $0x60] sm:$0xfe]  ;;  %v468_v62 = vsel %vm444_vm0, %v466_v48, %v467_v50  ;;  %v4842_v48 = vld [vmem:[#allocation2 + $0x310] ss:$8 sps:$4 sm:$0xff]  }
  0xa4   : > { %967 = vmatprep.subr.bf16.mxu1 %v4781_v59  ;;  %v394_v59 = vld [vmem:[%s5599_s29 + $0x70] sm:$0x1] }
  0xa5   : > { %v462_v55 = vsel %vm444_vm0, %v460_v46, %v461_v47  ;;  %v464_v0 = vrot.slane %v394_v59, 1  ;;  %v4839_v46 = vld [vmem:[#allocation2 + $0x210] ss:$8 sps:$4 sm:$0xff]   ;;  %v405_v59 = vld [vmem:[%s5599_s29 + $0xc8] sm:$0xfe] }
  0xa6   : > { %735 = vmatpush2.bf16.msra.mxu0 %v4783_v63  ;;  %v463_v63 = vrot.slane %v392_v58, 1  ;;  %v4856_v58 = vld [vmem:[#allocation2 + $0x3f4] ss:$8 sps:$4 sm:$0xff]  }
  0xa7   : > { %968 = vmatpush2.bf16.msra.mxu1 %v4784_v1  ;;  %736 = vmatprep.subr.bf16.mxu0 %v4785_v2  ;;  %v5642_v1 = vld [vmem:[%s5599_s29 + $0x40] sm:$0xff] }
  0xa8   : > { %969 = vmatprep.subr.bf16.mxu1 %v4787_v3  ;;  %v5645_v2 = vld [vmem:[%s5599_s29 + $0x60] sm:$0xff]  ;;  %v465_v9 = vsel %vm444_vm0, %v463_v63, %v464_v0  ;;  %v484_v63 = vrot.slane %v405_v59, 1  ;;  %v4875_v59 = vld [vmem:[#allocation2 + $0x2b0] ss:$8 sps:$4 sm:$0xff]  }
  0xa9   : > { %v4824_v3 = vld [vmem:[#allocation2 + $0x340] ss:$8 sps:$4 sm:$0xff]  }
  0xaa   : > { %737 = vmatpush2.bf16.msra.mxu0 %v4789_v4  ;;  %v4829_v4 = vld [vmem:[#allocation2 + $0x234] ss:$8 sps:$4 sm:$0xff]  }
  0xab   : > { %970 = vmatpush2.bf16.msra.mxu1 %v4790_v5  ;;  %738 = vmatprep.subr.bf16.mxu0 %v4791_v6  ;;  %v512_v5 = vpack.c.bf16 %v468_v62, %v462_v55  ;;  %v459_v6 = vsel %vm444_vm0, %v457_v60, %v458_v61  ;;  %v4848_v55 = vld [vmem:[#allocation2 + $0x300] ss:$8 sps:$4 sm:$0xff]   ;;  %v407_v60 = vld [vmem:[%s5599_s29 + $0xd8] sm:$0x1] }
  0xac   : > { %971 = vmatprep.subr.bf16.mxu1 %v4793_v7  ;;  %v342_v7 = vpack.c.bf16 %v5645_v2, %v5642_v1  ;;  %v511_v10 = vpack.c.bf16 %v465_v9, %v459_v6  ;;  %v409_v61 = vld [vmem:[%s5599_s29 + $0xe8] sm:$0xfe]  ;;  %v411_v62 = vld [vmem:[%s5599_s29 + $0xf8] sm:$0x1]  ;;  %v485_v0 = vrot.slane %v407_v60, 1 }
  0xad   : > { %v5687_v6 = vld [vmem:[%s5599_s29 + $0xe8] sm:$0xff]  ;;  %v4851_v9 = vld [vmem:[#allocation2 + $0x2f0] ss:$8 sps:$4 sm:$0xff]  }
  0xae   : > { %739 = vmatpush2.bf16.msra.mxu0 %v4795_v12  ;;  %v4830_v12 = vld [vmem:[#allocation2 + $0x330] ss:$8 sps:$4 sm:$0xff]  }
  0xaf   : > { %972 = vmatpush2.bf16.msra.mxu1 %v4796_v13  ;;  %740 = vmatprep.subr.bf16.mxu0 %v4797_v18  ;;  %v4835_v13 = vld [vmem:[#allocation2 + $0x224] ss:$8 sps:$4 sm:$0xff]   ;;  %v4833_v18 = vld [vmem:[#allocation2 + $0x220] ss:$8 sps:$4 sm:$0xff]   ;;  %v4878_v60 = vld [vmem:[#allocation2 + $0x3b0] ss:$8 sps:$4 sm:$0xff]  }
  0xb0   : > { %973 = vmatprep.subr.bf16.mxu1 %v4799_v19  ;;  %v4836_v19 = vld [vmem:[#allocation2 + $0x320] ss:$8 sps:$4 sm:$0xff]  }
  0xb2   : > { %741 = vmatpush2.bf16.msra.mxu0 %v4801_v20  ;;  %v403_v20 = vld [vmem:[%s5599_s29 + $0xb8] sm:$0x1] }
  0xb3   : > { %974 = vmatpush2.bf16.msra.mxu1 %v4802_v21  ;;  %1346 = vmatprep.subr.bf16.mxu0 %v4805_v26  ;;  %v472_v21 = vrot.slane %v397_v15, 1  ;;  %v4841_v26 = vld [vmem:[#allocation2 + $0x214] ss:$8 sps:$4 sm:$0xff]  }
  0xb4   : > { %1653 = vmatprep.subr.bf16.mxu1 %v4808_v27  ;;  %v4844_v27 = vld [vmem:[#allocation2 + $0x314] ss:$8 sps:$4 sm:$0xff]  }
  0xb5   : > { %743 = vmatmul.mubr.bf16.vlgmr.msra.gmra.mxu0 %v509_v28  ;;  %v479_v28 = vrot.slane %v403_v20, 1  ;;  %v5701_v20 = vld [vmem:[%s5599_s29 + $0xe0] sm:$0xff] }
  0xb6   : > { %976 = vmatmul.mubr.bf16.vlgmr.msra.gmra.mxu1 %v340_v29  ;;  %1347 = vmatpush1.bf16.msra.mxu0 %v4803_v30  ;;  %v5659_v29 = vld [vmem:[%s5599_s29 + $0xa8] sm:$0xff]  ;;  %v396_v30 = vld [vmem:[%s5599_s29 + $0x80] sm:$0xfe] }
  0xb7   : > { %1654 = vmatpush1.bf16.msra.mxu1 %v4806_v31  ;;  %1348 = vmatprep.subr.bf16.mxu0 %v4811_v32  ;;  %v398_v31 = vld [vmem:[%s5599_s29 + $0x90] sm:$0x1]  ;;  %v474_v32 = vsel %vm444_vm0, %v472_v21, %v473_v22  ;;  %v4859_v22 = vld [vmem:[#allocation2 + $0x2e4] ss:$8 sps:$4 sm:$0xff]  }
  0xb8   : > { %1655 = vmatprep.subr.bf16.mxu1 %v4814_v33  ;;  %752 = vmatprep.mubr.bf16.mxu0 %v512_v5  ;;  %v345_v33 = vpack.c.bf16 %v5659_v29, %v5656_v24  ;;  %v491_v5 = vrot.slane %v411_v62, 1  ;;  %v4854_v21 = vld [vmem:[#allocation2 + $0x3f0] ss:$8 sps:$4 sm:$0xff]   ;;  %v4886_v62 = vld [vmem:[#allocation2 + $0x3a4] ss:$8 sps:$4 sm:$0xff]  }
  0xb9   : > { %985 = vmatprep.mubr.bf16.mxu1 %v343_v56  ;;  %v4853_v56 = vld [vmem:[#allocation2 + $0x2f4] ss:$8 sps:$4 sm:$0xff]  }
  0xba   : > { %1349 = vmatpush1.bf16.msra.mxu0 %v4809_v34  ;;  %v400_v34 = vld [vmem:[%s5599_s29 + $0xa0] sm:$0xfe] }
  0xbb   : > { %1656 = vmatpush1.bf16.msra.mxu1 %v4812_v35  ;;  %1350 = vmatprep.subr.bf16.mxu0 %v4817_v36  ;;  %v402_v35 = vld [vmem:[%s5599_s29 + $0xb0] sm:$0x1]  ;;  %v469_v36 = vrot.slane %v396_v30, 1 }
  0xbc   : > { %1657 = vmatprep.subr.bf16.mxu1 %v4820_v37  ;;  %v470_v37 = vrot.slane %v398_v31, 1 }
  0xbd   : > { %753 = vmatmul.mubr.bf16.gmra.mxu0 %v511_v10  ;;  %v486_v10 = vsel %vm444_vm0, %v484_v63, %v485_v0  ;;  %v4881_v63 = vld [vmem:[#allocation2 + $0x2a0] ss:$8 sps:$4 sm:$0xff]  }
  0xbe   : > { %1351 = vmatpush1.bf16.msra.mxu0 %v4815_v38  ;;  %986 = vmatmul.mubr.bf16.gmra.mxu1 %v342_v7  ;;  %v480_v38 = vsel %vm444_vm0, %v478_v23, %v479_v28  ;;  %v471_v44 = vsel %vm444_vm0, %v469_v36, %v470_v37  ;;  %v404_v7 = vld [vmem:[%s5599_s29 + $0xc0] sm:$0xfe]  ;;  %v4868_v36 = vld [vmem:[#allocation2 + $0x3d4] ss:$8 sps:$4 sm:$0xff]   ;;  %v4863_v37 = vld [vmem:[#allocation2 + $0x2d0] ss:$8 sps:$4 sm:$0xff]  }
  0xbf   : > { %1658 = vmatpush1.bf16.msra.mxu1 %v4818_v39  ;;  %1352 = vmatprep.subr.bf16.mxu0 %v4823_v40  ;;  %v475_v39 = vrot.slane %v400_v34, 1  ;;  %v476_v40 = vrot.slane %v402_v35, 1  ;;  %v514_v43 = vpack.c.bf16 %v480_v38, %v474_v32  ;;  %v4862_v28 = vld [vmem:[#allocation2 + $0x3e4] ss:$8 sps:$4 sm:$0xff]   ;;  %v1453_v32 = vpack.c.bf16 %v5628_v49, %v5607_v57  ;;  %v4860_v34 = vld [vmem:[#allocation2 + $0x3e0] ss:$8 sps:$4 sm:$0xff]  }
  0xc0   : > { %1659 = vmatprep.subr.bf16.mxu1 %v4826_v41  ;;  %v5670_v41 = vld [vmem:[%s5599_s29 + $0x80] sm:$0xff]  ;;  %995 = vmatprep.mubr.bf16.mxu1 %v345_v33  ;;  %v4865_v35 = vld [vmem:[#allocation2 + $0x2d4] ss:$8 sps:$4 sm:$0xff]   ;;  %v4866_v38 = vld [vmem:[#allocation2 + $0x3d0] ss:$8 sps:$4 sm:$0xff]  }
  0xc1   : > { %v344_v45 = vpack.c.bf16 %v5673_v42, %v5670_v41  ;;  %v477_v47 = vsel %vm444_vm0, %v475_v39, %v476_v40  ;;  %762 = vmatprep.mubr.bf16.mxu0 %v514_v43  ;;  %v4857_v33 = vld [vmem:[#allocation2 + $0x2e0] ss:$8 sps:$4 sm:$0xff]   ;;  %v4871_v39 = vld [vmem:[#allocation2 + $0x2c4] ss:$8 sps:$4 sm:$0xff]   ;;  %v1019_v49 = vld [vmem:[%s5599_s29 + $0x18] sm:$0x3] }
  0xc2   : > { %1353 = vmatpush1.bf16.msra.mxu0 %v4821_v54  ;;  %v513_v50 = vpack.c.bf16 %v477_v47, %v471_v44  ;;  %v4845_v54 = vld [vmem:[#allocation2 + $0x200] ss:$8 sps:$4 sm:$0xff]   ;;  %v1023_v43 = vld [vmem:[%s5599_s29 + $0x38] sm:$0x3]  ;;  %v4874_v44 = vld [vmem:[#allocation2 + $0x3c4] ss:$8 sps:$4 sm:$0xff]  }
  0xc3   : > { %1660 = vmatpush1.bf16.msra.mxu1 %v4824_v3  ;;  %1354 = vmatprep.subr.bf16.mxu0 %v4829_v4  ;;  %v490_v3 = vrot.slane %v409_v61, 1  ;;  %v5684_v4 = vld [vmem:[%s5599_s29 + $0xc8] sm:$0xff] }
  0xc4   : > { %1661 = vmatprep.subr.bf16.mxu1 %v4832_v8  ;;  %v406_v8 = vld [vmem:[%s5599_s29 + $0xd0] sm:$0x1]  ;;  %v1017_v57 = vld [vmem:[%s5599_s29 + $0x8] sm:$0xfc] }
  0xc5   : > { %763 = vmatmul.mubr.bf16.gmra.mxu0 %v513_v50  ;;  %v482_v15 = vrot.slane %v406_v8, 1  ;;  %v492_v16 = vsel %vm444_vm0, %v490_v3, %v491_v5  ;;  %v1021_v40 = vld [vmem:[%s5599_s29 + $0x28] sm:$0xfc]  ;;  %v4889_v3 = vld [vmem:[#allocation2 + $0x294] ss:$8 sps:$4 sm:$0xff]  }
  0xc6   : > { %1355 = vmatpush1.bf16.msra.mxu0 %v4827_v11  ;;  %996 = vmatmul.mubr.bf16.gmra.mxu1 %v344_v45  ;;  %v347_v11 = vpack.c.bf16 %v5687_v6, %v5684_v4  ;;  %v516_v23 = vpack.c.bf16 %v492_v16, %v486_v10  ;;  %v1084_v45 = vrot.slane %v1017_v57, 2  ;;  %v1090_v47 = vrot.slane %v1021_v40, 2  ;;  %v4869_v50 = vld [vmem:[#allocation2 + $0x2c0] ss:$8 sps:$4 sm:$0xff]   ;;  %v4883_v61 = vld [vmem:[#allocation2 + $0x2a4] ss:$8 sps:$4 sm:$0xff]  }
  0xc7   : > { %1662 = vmatpush1.bf16.msra.mxu1 %v4830_v12  ;;  %1356 = vmatprep.subr.bf16.mxu0 %v4835_v13  ;;  %v408_v12 = vld [vmem:[%s5599_s29 + $0xe0] sm:$0xfe]  ;;  %v410_v13 = vld [vmem:[%s5599_s29 + $0xf0] sm:$0x1]  ;;  %v4892_v5 = vld [vmem:[#allocation2 + $0x394] ss:$8 sps:$4 sm:$0xff]   ;;  %v1452_v40 = vpack.c.bf16 %v5642_v1, %v5620_v25 }
  0xc8   : > { %1663 = vmatprep.subr.bf16.mxu1 %v4838_v14  ;;  %v481_v14 = vrot.slane %v404_v7, 1  ;;  %v487_v17 = vrot.slane %v408_v12, 1  ;;  %772 = vmatprep.mubr.bf16.mxu0 %v516_v23  ;;  %v4884_v0 = vld [vmem:[#allocation2 + $0x3a0] ss:$8 sps:$4 sm:$0xff]   ;;  %v1018_v8 = vld [vmem:[%s5599_s29 + $0x10] sm:$0x3] }
  0xc9   : > { %1005 = vmatprep.mubr.bf16.mxu1 %v347_v11  ;;  %v1016_v7 = vld [vmem:[%s5599_s29] sm:$0xfc]  ;;  %v1022_v10 = vld [vmem:[%s5599_s29 + $0x30] sm:$0x3]  ;;  %v1027_v16 = vld [vmem:[%s5599_s29 + $0x58] sm:$0x3] }
  0xca   : > { %1357 = vmatpush1.bf16.msra.mxu0 %v4833_v18  ;;  %v488_v18 = vrot.slane %v410_v13, 1  ;;  %v4887_v11 = vld [vmem:[#allocation2 + $0x290] ss:$8 sps:$4 sm:$0xff]   ;;  %v1081_v13 = vrot.slane %v1016_v7, 2  ;;  %v4895_v23 = vld [vmem:[#allocation2 + $0x284] ss:$8 sps:$4 sm:$0xff]  }
  0xcb   : > { %1664 = vmatpush1.bf16.msra.mxu1 %v4836_v19  ;;  %1358 = vmatprep.subr.bf16.mxu0 %v4841_v26  ;;  %v5698_v19 = vld [vmem:[%s5599_s29 + $0xc0] sm:$0xff]  ;;  %v483_v26 = vsel %vm444_vm0, %v481_v14, %v482_v15  ;;  %v4890_v12 = vld [vmem:[#allocation2 + $0x390] ss:$8 sps:$4 sm:$0xff]   ;;  %v1025_v14 = vld [vmem:[%s5599_s29 + $0x48] sm:$0xfc]  ;;  %v1082_v15 = vrot.slane %v1018_v8, 2 }
  0xcc   : > { %1665 = vmatprep.subr.bf16.mxu1 %v4844_v27  ;;  %v346_v27 = vpack.c.bf16 %v5701_v20, %v5698_v19  ;;  %v489_v30 = vsel %vm444_vm0, %v487_v17, %v488_v18  ;;  %v1029_v17 = vld [vmem:[%s5599_s29 + $0x68] sm:$0xfc]  ;;  %v1028_v57 = vld [vmem:[%s5599_s29 + $0x60] sm:$0xfc] }
  0xcd   : > { %v515_v31 = vpack.c.bf16 %v489_v30, %v483_v26  ;;  %v4898_v26 = vld [vmem:[#allocation2 + $0x384] ss:$8 sps:$4 sm:$0xff]   ;;  %v1096_v30 = vrot.slane %v1025_v14, 2  ;;  %v4905_v1 = vld [vmem:[#allocation2 + $0x460] ss:$8 sps:$4 sm:$0xff]  }
  0xce   : > { %1359 = vmatpush1.bf16.msra.mxu0 %v4839_v46  ;;  %1006 = vmatmul.mubr.bf16.gmra.mxu1 %v346_v27  ;;  %v1085_v46 = vrot.slane %v1019_v49, 2  ;;  %v4893_v27 = vld [vmem:[#allocation2 + $0x280] ss:$8 sps:$4 sm:$0xff]   ;;  %v1030_v49 = vld [vmem:[%s5599_s29 + $0x70] sm:$0x3] }
  0xcf   : > { %1666 = vmatpush1.bf16.msra.mxu1 %v4842_v48  ;;  %1360 = vmatprep.subr.bf16.mxu0 %v4847_v52  ;;  %v1091_v48 = vrot.slane %v1023_v43, 2  ;;  %v4899_v43 = vld [vmem:[#allocation2 + $0x470] ss:$8 sps:$4 sm:$0xff]   ;;  %v4910_v25 = vld [vmem:[#allocation2 + $0x564] ss:$8 sps:$4 sm:$0xff]  }
  0xd0   : > { %1667 = vmatprep.subr.bf16.mxu1 %v4850_v53  ;;  %773 = vmatmul.mubr.bf16.gmra.mxu0 %v515_v31  ;;  %v1086_v52 = vsel %vm1080_vm1, %v1084_v45, %v1085_v46  ;;  %v1097_v31 = vrot.slane %v1027_v16, 2  ;;  %v4911_v14 = vld [vmem:[#allocation2 + $0x450] ss:$8 sps:$4 sm:$0xff]  }
  0xd1   : > { %1685 = vmatprep.mubr.bf16.mxu1 %v1453_v32  ;;  %v1092_v53 = vsel %vm1080_vm1, %v1090_v47, %v1091_v48  ;;  %v1102_v32 = vrot.slane %v1029_v17, 2  ;;  %v4907_v48 = vld [vmem:[#allocation2 + $0x464] ss:$8 sps:$4 sm:$0xff]   ;;  %v1043_v16 = vld [vmem:[%s5599_s29 + $0xd8] sm:$0x3] }
  0xd2   : > { %1361 = vmatpush1.bf16.msra.mxu0 %v4845_v54  ;;  %v4872_v54 = vld [vmem:[#allocation2 + $0x3c0] ss:$8 sps:$4 sm:$0xff]  }
  0xd3   : > { %1668 = vmatpush1.bf16.msra.mxu1 %v4848_v55  ;;  %1362 = vmatprep.subr.bf16.mxu0 %v4853_v56  ;;  %v1146_v55 = vpack.c.bf16 %v1092_v53, %v1086_v52  ;;  %v4877_v56 = vld [vmem:[#allocation2 + $0x2b4] ss:$8 sps:$4 sm:$0xff]   ;;  %v1099_v53 = vrot.slane %v1028_v57, 2 }
  0xd4   : > { %1669 = vmatprep.subr.bf16.mxu1 %v4856_v58  ;;  %v4880_v58 = vld [vmem:[#allocation2 + $0x3b4] ss:$8 sps:$4 sm:$0xff]  }
  0xd5   : > { %1378 = vmatprep.mubr.bf16.mxu0 %v1146_v55  ;;  %v1035_v55 = vld [vmem:[%s5599_s29 + $0x98] sm:$0x3]  ;;  %v4928_v57 = vld [vmem:[#allocation2 + $0x534] ss:$8 sps:$4 sm:$0xff]  }
  0xd6   : > { %1363 = vmatpush2.bf16.msra.mxu0 %v4851_v9  ;;  %v1020_v9 = vld [vmem:[%s5599_s29 + $0x20] sm:$0xfc] }
  0xd7   : > { %1670 = vmatpush2.bf16.msra.mxu1 %v4854_v21  ;;  %1364 = vmatprep.subr.bf16.mxu0 %v4859_v22  ;;  %v1087_v18 = vrot.slane %v1020_v9, 2  ;;  %v1088_v21 = vrot.slane %v1022_v10, 2  ;;  %v1031_v22 = vld [vmem:[%s5599_s29 + $0x78] sm:$0x3]  ;;  %v4916_v10 = vld [vmem:[#allocation2 + $0x554] ss:$8 sps:$4 sm:$0xff]  }
  0xd8   : > { %1671 = vmatprep.subr.bf16.mxu1 %v4862_v28  ;;  %v4896_v28 = vld [vmem:[#allocation2 + $0x380] ss:$8 sps:$4 sm:$0xff]  }
  0xda   : > { %1365 = vmatpush2.bf16.msra.mxu0 %v4857_v33  ;;  %v1103_v33 = vrot.slane %v1031_v22, 2 }
  0xdb   : > { %1672 = vmatpush2.bf16.msra.mxu1 %v4860_v34  ;;  %1366 = vmatprep.subr.bf16.mxu0 %v4865_v35  ;;  %v1024_v34 = vld [vmem:[%s5599_s29 + $0x40] sm:$0xfc]  ;;  %v1026_v35 = vld [vmem:[%s5599_s29 + $0x50] sm:$0x3] }
  0xdc   : > { %1673 = vmatprep.subr.bf16.mxu1 %v4868_v36  ;;  %v1083_v36 = vsel %vm1080_vm1, %v1081_v13, %v1082_v15  ;;  %v1093_v45 = vrot.slane %v1024_v34, 2  ;;  %v1094_v46 = vrot.slane %v1026_v35, 2  ;;  %v1104_v52 = vsel %vm1080_vm1, %v1102_v32, %v1103_v33  ;;  %v1041_v13 = vld [vmem:[%s5599_s29 + $0xc8] sm:$0xfc]  ;;  %v4914_v15 = vld [vmem:[#allocation2 + $0x550] ss:$8 sps:$4 sm:$0xff]  }
  0xdd   : > { %v1047_v32 = vld [vmem:[%s5599_s29 + $0xf8] sm:$0x3]  ;;  %v4922_v33 = vld [vmem:[#allocation2 + $0x544] ss:$8 sps:$4 sm:$0xff]   ;;  %v4920_v34 = vld [vmem:[#allocation2 + $0x540] ss:$8 sps:$4 sm:$0xff]  }
  0xde   : > { %1367 = vmatpush2.bf16.msra.mxu0 %v4863_v37  ;;  %v1089_v37 = vsel %vm1080_vm1, %v1087_v18, %v1088_v21  ;;  %v1095_v8 = vsel %vm1080_vm1, %v1093_v45, %v1094_v46  ;;  %v1454_v18 = vpack.c.bf16 %v5670_v41, %v5645_v2  ;;  %v4919_v21 = vld [vmem:[#allocation2 + $0x444] ss:$8 sps:$4 sm:$0xff]   ;;  %v1457_v2 = vpack.c.bf16 %v5684_v4, %v5659_v29  ;;  %v4917_v41 = vld [vmem:[#allocation2 + $0x440] ss:$8 sps:$4 sm:$0xff]   ;;  %v1046_v45 = vld [vmem:[%s5599_s29 + $0xf0] sm:$0x3] }
  0xdf   : > { %1674 = vmatpush2.bf16.msra.mxu1 %v4866_v38  ;;  %1368 = vmatprep.subr.bf16.mxu0 %v4871_v39  ;;  %v4901_v38 = vld [vmem:[#allocation2 + $0x474] ss:$8 sps:$4 sm:$0xff]   ;;  %v1145_v47 = vpack.c.bf16 %v1089_v37, %v1083_v36  ;;  %v1120_v36 = vrot.slane %v1041_v13, 2  ;;  %v1121_v37 = vrot.slane %v1043_v16, 2  ;;  %v4923_v46 = vld [vmem:[#allocation2 + $0x430] ss:$8 sps:$4 sm:$0xff]  }
  0xe0   : > { %1675 = vmatprep.subr.bf16.mxu1 %v4874_v44  ;;  %v4904_v39 = vld [vmem:[#allocation2 + $0x574] ss:$8 sps:$4 sm:$0xff]   ;;  %v4902_v44 = vld [vmem:[#allocation2 + $0x570] ss:$8 sps:$4 sm:$0xff]   ;;  %v4958_v16 = vld [vmem:[#allocation2 + $0x5e4] ss:$8 sps:$4 sm:$0xff]  }
  0xe1   : > { %v4947_v13 = vld [vmem:[#allocation2 + $0x4f0] ss:$8 sps:$4 sm:$0xff]  }
  0xe2   : > { %1369 = vmatpush2.bf16.msra.mxu0 %v4869_v50  ;;  %v1098_v50 = vsel %vm1080_vm1, %v1096_v30, %v1097_v31 }
  0xe3   : > { %1676 = vmatpush2.bf16.msra.mxu1 %v4872_v54  ;;  %1370 = vmatprep.subr.bf16.mxu0 %v4877_v56  ;;  %v1033_v54 = vld [vmem:[%s5599_s29 + $0x88] sm:$0xfc]  ;;  %v1100_v56 = vrot.slane %v1030_v49, 2  ;;  %v1127_v49 = vrot.slane %v1047_v32, 2 }
  0xe4   : > { %1677 = vmatprep.subr.bf16.mxu1 %v4880_v58  ;;  %v1037_v58 = vld [vmem:[%s5599_s29 + $0xa8] sm:$0xfc] }
  0xe5   : > { %v1101_v9 = vsel %vm1080_vm1, %v1099_v53, %v1100_v56  ;;  %v1122_v53 = vsel %vm1080_vm1, %v1120_v36, %v1121_v37  ;;  %v4351_v32 = vld [vmem:[%s5599_s29 + $0x28] sm:$0xfc]  ;;  %v4961_v37 = vld [vmem:[#allocation2 + $0x4d4] ss:$8 sps:$4 sm:$0xff]  }
  0xe6   : > { %1371 = vmatpush2.bf16.msra.mxu0 %v4875_v59  ;;  %v1039_v59 = vld [vmem:[%s5599_s29 + $0xb8] sm:$0x3]  ;;  %v1147_v17 = vpack.c.bf16 %v1101_v9, %v1095_v8 }
  0xe7   : > { %1678 = vmatpush2.bf16.msra.mxu1 %v4878_v60  ;;  %1372 = vmatprep.subr.bf16.mxu0 %v4883_v61  ;;  %v4908_v60 = vld [vmem:[#allocation2 + $0x560] ss:$8 sps:$4 sm:$0xff]   ;;  %v1148_v61 = vpack.c.bf16 %v1104_v52, %v1098_v50  ;;  %v1115_v7 = vrot.slane %v1039_v59, 2  ;;  %v1456_v50 = vpack.c.bf16 %v5698_v19, %v5673_v42  ;;  %v4931_v52 = vld [vmem:[#allocation2 + $0x424] ss:$8 sps:$4 sm:$0xff]  }
  0xe8   : > { %1679 = vmatprep.subr.bf16.mxu1 %v4886_v62  ;;  %v1455_v62 = vpack.c.bf16 %v5656_v24, %v5631_v51  ;;  %v1034_v51 = vld [vmem:[%s5599_s29 + $0x90] sm:$0x3]  ;;  %v1036_v24 = vld [vmem:[%s5599_s29 + $0xa0] sm:$0xfc] }
  0xe9   : > { %v1111_v30 = vrot.slane %v1036_v24, 2  ;;  %v4932_v19 = vld [vmem:[#allocation2 + $0x520] ss:$8 sps:$4 sm:$0xff]   ;;  %v4935_v8 = vld [vmem:[#allocation2 + $0x410] ss:$8 sps:$4 sm:$0xff]  }
  0xea   : > { %1373 = vmatpush2.bf16.msra.mxu0 %v4881_v63  ;;  %v4913_v63 = vld [vmem:[#allocation2 + $0x454] ss:$8 sps:$4 sm:$0xff]   ;;  %v4938_v9 = vld [vmem:[#allocation2 + $0x510] ss:$8 sps:$4 sm:$0xff]   ;;  %v4944_v24 = vld [vmem:[#allocation2 + $0x500] ss:$8 sps:$4 sm:$0xff]  }
  0xeb   : > { %1680 = vmatpush2.bf16.msra.mxu1 %v4884_v0  ;;  %1374 = vmatprep.subr.bf16.mxu0 %v4889_v3  ;;  %v1108_v0 = vrot.slane %v1033_v54, 2  ;;  %v1109_v3 = vrot.slane %v1035_v55, 2  ;;  %v4253_v55 = vld [vmem:[%s5599_s29 + $0x108] sm:$0xff] }
  0xec   : > { %1681 = vmatprep.subr.bf16.mxu1 %v4892_v5  ;;  %v1114_v5 = vrot.slane %v1037_v58, 2  ;;  %v1459_v42 = vpack.c.bf16 %v4253_v55, %v5687_v6  ;;  %v4974_v55 = vld [vmem:[#allocation2 + $0x5b0] ss:$8 sps:$4 sm:$0xff]  }
  0xed   : > { %v1110_v22 = vsel %vm1080_vm1, %v1108_v0, %v1109_v3  ;;  %v4252_v3 = vld [vmem:[%s5599_s29 + $0x100] sm:$0xff] }
  0xee   : > { %1375 = vmatpush2.bf16.msra.mxu0 %v4887_v11  ;;  %v1032_v11 = vld [vmem:[%s5599_s29 + $0x80] sm:$0xfc]  ;;  %v1458_v6 = vpack.c.bf16 %v4252_v3, %v5701_v20  ;;  %v4952_v20 = vld [vmem:[#allocation2 + $0x5f4] ss:$8 sps:$4 sm:$0xff]  }
  0xef   : > { %1682 = vmatpush2.bf16.msra.mxu1 %v4890_v12  ;;  %1376 = vmatprep.subr.bf16.mxu0 %v4895_v23  ;;  %v1038_v12 = vld [vmem:[%s5599_s29 + $0xb0] sm:$0x3]  ;;  %v1116_v23 = vsel %vm1080_vm1, %v1114_v5, %v1115_v7  ;;  %v4940_v5 = vld [vmem:[#allocation2 + $0x514] ss:$8 sps:$4 sm:$0xff]  }
  0xf0   : > { %1683 = vmatprep.subr.bf16.mxu1 %v4898_v26  ;;  %v1045_v26 = vld [vmem:[%s5599_s29 + $0xe8] sm:$0xfc]  ;;  %v1112_v31 = vrot.slane %v1038_v12, 2  ;;  %v1150_v35 = vpack.c.bf16 %v1116_v23, %v1110_v22  ;;  %v4949_v12 = vld [vmem:[#allocation2 + $0x4f4] ss:$8 sps:$4 sm:$0xff]  }
  0xf1   : > { %v4956_v22 = vld [vmem:[#allocation2 + $0x5e0] ss:$8 sps:$4 sm:$0xff]  }
  0xf2   : > { %1377 = vmatpush2.bf16.msra.mxu0 %v4893_v27  ;;  %v1105_v27 = vrot.slane %v1032_v11, 2  ;;  %v1113_v4 = vsel %vm1080_vm1, %v1111_v30, %v1112_v31  ;;  %v4946_v11 = vld [vmem:[#allocation2 + $0x504] ss:$8 sps:$4 sm:$0xff]  }
  0xf3   : > { %1684 = vmatpush2.bf16.msra.mxu1 %v4896_v28  ;;  %2071 = vmatprep.subr.bf16.mxu0 %v4901_v38  ;;  %v1106_v28 = vrot.slane %v1034_v51, 2  ;;  %v1126_v38 = vrot.slane %v1045_v26, 2  ;;  %v4941_v51 = vld [vmem:[#allocation2 + $0x400] ss:$8 sps:$4 sm:$0xff]   ;;  %v4293_v26 = vld [vmem:[%s5599_s29 + $0x58] sm:$0x1] }
  0xf4   : > { %2489 = vmatprep.subr.bf16.mxu1 %v4904_v39  ;;  %v4925_v39 = vld [vmem:[#allocation2 + $0x434] ss:$8 sps:$4 sm:$0xff]   ;;  %v4291_v23 = vld [vmem:[%s5599_s29 + $0x48] sm:$0xfe]  ;;  %v1816_v31 = vrot.slane %v4293_v26, 1 }
  0xf5   : > { %1379 = vmatmul.mubr.bf16.vlgmr.msra.gmra.mxu0 %v1145_v47  ;;  %v1107_v29 = vsel %vm1080_vm1, %v1105_v27, %v1106_v28  ;;  %v4926_v47 = vld [vmem:[#allocation2 + $0x530] ss:$8 sps:$4 sm:$0xff]   ;;  %v1128_v54 = vsel %vm1080_vm1, %v1126_v38, %v1127_v49  ;;  %v1815_v30 = vrot.slane %v4291_v23, 1  ;;  %v4964_v38 = vld [vmem:[#allocation2 + $0x5d4] ss:$8 sps:$4 sm:$0xff]  }
  0xf6   : > { %1686 = vmatmul.mubr.bf16.vlgmr.msra.gmra.mxu1 %v1452_v40  ;;  %2072 = vmatpush1.bf16.msra.mxu0 %v4899_v43  ;;  %v1040_v40 = vld [vmem:[%s5599_s29 + $0xc0] sm:$0xfc]  ;;  %v1042_v43 = vld [vmem:[%s5599_s29 + $0xd0] sm:$0x3]  ;;  %v4363_v23 = vld [vmem:[%s5599_s29 + $0x88] sm:$0xfc] }
  0xf7   : > { %2490 = vmatpush1.bf16.msra.mxu1 %v4902_v44  ;;  %2073 = vmatprep.subr.bf16.mxu0 %v4907_v48  ;;  %v1044_v44 = vld [vmem:[%s5599_s29 + $0xe0] sm:$0xfc]  ;;  %v1149_v48 = vpack.c.bf16 %v1113_v4, %v1107_v29  ;;  %v1117_v56 = vrot.slane %v1040_v40, 2  ;;  %v1118_v58 = vrot.slane %v1042_v43, 2  ;;  %v4959_v4 = vld [vmem:[#allocation2 + $0x4d0] ss:$8 sps:$4 sm:$0xff]  }
  0xf8   : > { %2491 = vmatprep.subr.bf16.mxu1 %v4910_v25  ;;  %1388 = vmatprep.mubr.bf16.mxu0 %v1148_v61  ;;  %v1123_v59 = vrot.slane %v1044_v44, 2  ;;  %v1124_v25 = vrot.slane %v1046_v45, 2  ;;  %v1152_v61 = vpack.c.bf16 %v1128_v54, %v1122_v53  ;;  %v4962_v44 = vld [vmem:[#allocation2 + $0x5d0] ss:$8 sps:$4 sm:$0xff]   ;;  %v4967_v45 = vld [vmem:[#allocation2 + $0x4c4] ss:$8 sps:$4 sm:$0xff]  }
  0xf9   : > { %1695 = vmatprep.mubr.bf16.mxu1 %v1455_v62  ;;  %v4937_v62 = vld [vmem:[#allocation2 + $0x414] ss:$8 sps:$4 sm:$0xff]   ;;  %v4971_v54 = vld [vmem:[#allocation2 + $0x4b0] ss:$8 sps:$4 sm:$0xff]  }
  0xfa   : > { %2074 = vmatpush1.bf16.msra.mxu0 %v4905_v1  ;;  %v4934_v1 = vld [vmem:[#allocation2 + $0x524] ss:$8 sps:$4 sm:$0xff]   ;;  %v1125_v0 = vsel %vm1080_vm1, %v1123_v59, %v1124_v25  ;;  %v4976_v53 = vld [vmem:[#allocation2 + $0x5b4] ss:$8 sps:$4 sm:$0xff]   ;;  %v4292_v25 = vld [vmem:[%s5599_s29 + $0x50] sm:$0x1] }
  0xfb   : > { %2492 = vmatpush1.bf16.msra.mxu1 %v4908_v60  ;;  %2075 = vmatprep.subr.bf16.mxu0 %v4913_v63  ;;  %v4929_v60 = vld [vmem:[#allocation2 + $0x420] ss:$8 sps:$4 sm:$0xff]   ;;  %v1119_v63 = vsel %vm1080_vm1, %v1117_v56, %v1118_v58  ;;  %v4288_v58 = vld [vmem:[%s5599_s29 + $0x30] sm:$0x1]  ;;  %v4365_v26 = vld [vmem:[%s5599_s29 + $0x98] sm:$0x3] }
  0xfc   : > { %2493 = vmatprep.subr.bf16.mxu1 %v4916_v10  ;;  %v1151_v7 = vpack.c.bf16 %v1125_v0, %v1119_v63  ;;  %v4943_v10 = vld [vmem:[#allocation2 + $0x404] ss:$8 sps:$4 sm:$0xff]   ;;  %v4977_v63 = vld [vmem:[#allocation2 + $0x4a0] ss:$8 sps:$4 sm:$0xff]  }
  0xfd   : > { %1389 = vmatmul.mubr.bf16.gmra.mxu0 %v1147_v17  ;;  %v4287_v17 = vld [vmem:[%s5599_s29 + $0x28] sm:$0xfe]  ;;  %v4286_v56 = vld [vmem:[%s5599_s29 + $0x20] sm:$0xfe] }
  0xfe   : > { %1696 = vmatmul.mubr.bf16.gmra.mxu1 %v1454_v18  ;;  %2076 = vmatpush1.bf16.msra.mxu0 %v4911_v14  ;;  %v4950_v14 = vld [vmem:[#allocation2 + $0x5f0] ss:$8 sps:$4 sm:$0xff]   ;;  %v1809_v27 = vrot.slane %v4287_v17, 1  ;;  %v4290_v59 = vld [vmem:[%s5599_s29 + $0x40] sm:$0xfe]  ;;  %v1806_v3 = vrot.slane %v4286_v56, 1 }
  0xff   : > { %2494 = vmatpush1.bf16.msra.mxu1 %v4914_v15  ;;  %2077 = vmatprep.subr.bf16.mxu0 %v4919_v21  ;;  %v4955_v15 = vld [vmem:[#allocation2 + $0x4e4] ss:$8 sps:$4 sm:$0xff]   ;;  %v4289_v18 = vld [vmem:[%s5599_s29 + $0x38] sm:$0x1]  ;;  %v4953_v21 = vld [vmem:[#allocation2 + $0x4e0] ss:$8 sps:$4 sm:$0xff]  }
 0x100   : > { %2495 = vmatprep.subr.bf16.mxu1 %v4922_v33  ;;  %1398 = vmatprep.mubr.bf16.mxu0 %v1150_v35  ;;  %v1810_v28 = vrot.slane %v4289_v18, 1  ;;  %v4353_v33 = vld [vmem:[%s5599_s29 + $0x38] sm:$0x3]  ;;  %v2227_v35 = vrot.slane %v4351_v32, 2  ;;  %v4980_v0 = vld [vmem:[#allocation2 + $0x5a0] ss:$8 sps:$4 sm:$0xff]  }
 0x101   : > { %1705 = vmatprep.mubr.bf16.mxu1 %v1457_v2  ;;  %v2228_v36 = vrot.slane %v4353_v33, 2  ;;  %v4983_v17 = vld [vmem:[#allocation2 + $0x490] ss:$8 sps:$4 sm:$0xff]  }
 0x102   : > { %2078 = vmatpush1.bf16.msra.mxu0 %v4917_v41  ;;  %v5778_v2 = vsel %vm444_vm0, %v1809_v27, %v1810_v28  ;;  %v4355_v41 = vld [vmem:[%s5599_s29 + $0x48] sm:$0xfc]  ;;  %v4986_v18 = vld [vmem:[#allocation2 + $0x590] ss:$8 sps:$4 sm:$0xff]  }
 0x103   : > { %2496 = vmatpush1.bf16.msra.mxu1 %v4920_v34  ;;  %2079 = vmatprep.subr.bf16.mxu0 %v4925_v39  ;;  %6694 = vst [vmem:[#allocation14_spill] sm:$0xff] %v5778_v2  ;;  %v4357_v34 = vld [vmem:[%s5599_s29 + $0x58] sm:$0x3]  ;;  %v5783_v39 = vsel %vm444_vm0, %v1815_v30, %v1816_v31  ;;  %v2229_v43 = vsel %vm1080_vm1, %v2227_v35, %v2228_v36  ;;  %v4991_v27 = vld [vmem:[#allocation2 + $0x484] ss:$8 sps:$4 sm:$0xff]  }
 0x104   : > { %2497 = vmatprep.subr.bf16.mxu1 %v4928_v57  ;;  %6695 = vst [vmem:[#allocation15_spill] sm:$0xff] %v5783_v39  ;;  %v2233_v57 = vrot.slane %v4355_v41, 2  ;;  %v2234_v49 = vrot.slane %v4357_v34, 2  ;;  %v1871_v40 = vpack.c.bf16 %v5783_v39, %v5778_v2  ;;  %v4994_v28 = vld [vmem:[#allocation2 + $0x584] ss:$8 sps:$4 sm:$0xff]  }
 0x105   : > { %1399 = vmatmul.mubr.bf16.gmra.mxu0 %v1149_v48  ;;  %v4965_v48 = vld [vmem:[#allocation2 + $0x4c0] ss:$8 sps:$4 sm:$0xff]   ;;  %v5815_v41 = vld [vmem:[%s5599_s29 + $0x70] sm:$0x1] }
 0x106   : > { %1706 = vmatmul.mubr.bf16.gmra.mxu1 %v1456_v50  ;;  %2080 = vmatpush1.bf16.msra.mxu0 %v4923_v46  ;;  %v2235_v29 = vsel %vm1080_vm1, %v2233_v57, %v2234_v49  ;;  %v4968_v50 = vld [vmem:[#allocation2 + $0x5c0] ss:$8 sps:$4 sm:$0xff]  }
 0x107   : > { %2498 = vmatpush1.bf16.msra.mxu1 %v4926_v47  ;;  %2081 = vmatprep.subr.bf16.mxu0 %v4931_v52  ;;  %v2289_v46 = vpack.c.bf16 %v2235_v29, %v2229_v43  ;;  %v4970_v47 = vld [vmem:[#allocation2 + $0x5c4] ss:$8 sps:$4 sm:$0xff]   ;;  %v4973_v52 = vld [vmem:[#allocation2 + $0x4b4] ss:$8 sps:$4 sm:$0xff]   ;;  %v2245_v43 = vrot.slane %v4363_v23, 2  ;;  %v2246_v29 = vrot.slane %v4365_v26, 2 }
 0x108   : > { %2499 = vmatprep.subr.bf16.mxu1 %v4934_v1  ;;  %1408 = vmatprep.mubr.bf16.mxu0 %v1152_v61  ;;  %v4350_v1 = vld [vmem:[%s5599_s29 + $0x20] sm:$0xfc] }
 0x109   : > { %1715 = vmatprep.mubr.bf16.mxu1 %v1459_v42  ;;  %v4354_v61 = vld [vmem:[%s5599_s29 + $0x40] sm:$0xfc]  ;;  %v4356_v42 = vld [vmem:[%s5599_s29 + $0x50] sm:$0x3] }
 0x10a   : > { %2082 = vmatpush1.bf16.msra.mxu0 %v4929_v60  ;;  %v4352_v60 = vld [vmem:[%s5599_s29 + $0x30] sm:$0x3]  ;;  %v5001_v23 = vld [vmem:[#allocation2 + $0x660] ss:$8 sps:$4 sm:$0xff]  }
 0x10b   : > { %2500 = vmatpush1.bf16.msra.mxu1 %v4932_v19  ;;  %2083 = vmatprep.subr.bf16.mxu0 %v4937_v62  ;;  %v4979_v19 = vld [vmem:[#allocation2 + $0x4a4] ss:$8 sps:$4 sm:$0xff]   ;;  %v5004_v26 = vld [vmem:[#allocation2 + $0x760] ss:$8 sps:$4 sm:$0xff]  }
 0x10c   : > { %2501 = vmatprep.subr.bf16.mxu1 %v4940_v5  ;;  %v4982_v62 = vld [vmem:[#allocation2 + $0x5a4] ss:$8 sps:$4 sm:$0xff]   ;;  %v1807_v5 = vrot.slane %v4288_v58, 1 }
 0x10d   : > { %1409 = vmatmul.mubr.bf16.gmra.mxu0 %v1151_v7  ;;  %v1812_v7 = vrot.slane %v4290_v59, 1  ;;  %v1819_v59 = vrot.slane %v5815_v41, 1 }
 0x10e   : > { %1716 = vmatmul.mubr.bf16.gmra.mxu1 %v1458_v6  ;;  %2084 = vmatpush1.bf16.msra.mxu0 %v4935_v8  ;;  %v1813_v8 = vrot.slane %v4292_v25, 1  ;;  %v4988_v6 = vld [vmem:[#allocation2 + $0x594] ss:$8 sps:$4 sm:$0xff]   ;;  %v4307_v25 = vld [vmem:[%s5599_s29 + $0xc8] sm:$0xfe] }
 0x10f   : > { %2502 = vmatpush1.bf16.msra.mxu1 %v4938_v9  ;;  %2085 = vmatprep.subr.bf16.mxu0 %v4943_v10  ;;  %v4985_v9 = vld [vmem:[#allocation2 + $0x494] ss:$8 sps:$4 sm:$0xff]   ;;  %v2224_v10 = vrot.slane %v4350_v1, 2  ;;  %v4309_v1 = vld [vmem:[%s5599_s29 + $0xd8] sm:$0x1] }
 0x110   : > { %2503 = vmatprep.subr.bf16.mxu1 %v4946_v11  ;;  %2103 = vmatprep.mubr.bf16.mxu0 %v1871_v40  ;;  %v2225_v11 = vrot.slane %v4352_v60, 2  ;;  %v5812_v30 = vsel %vm444_vm0, %v1812_v7, %v1813_v8  ;;  %v5000_v60 = vld [vmem:[#allocation2 + $0x774] ss:$8 sps:$4 sm:$0xff]  }
 0x111   : > { %2521 = vmatprep.mubr.bf16.mxu1 %v2289_v46  ;;  %6697 = vst [vmem:[#allocation17_spill] sm:$0xff] %v5812_v30  ;;  %v5834_v46 = vld [vmem:[%s5599_s29 + $0x70] sm:$0x3] }
 0x112   : > { %2086 = vmatpush1.bf16.msra.mxu0 %v4941_v51  ;;  %v2230_v51 = vrot.slane %v4354_v61, 2  ;;  %v5818_v34 = vsel %vm1080_vm1, %v2224_v10, %v2225_v11  ;;  %v2247_v10 = vsel %vm1080_vm1, %v2245_v43, %v2246_v29 }
 0x113   : > { %2504 = vmatpush1.bf16.msra.mxu1 %v4944_v24  ;;  %2087 = vmatprep.subr.bf16.mxu0 %v4949_v12  ;;  %v2231_v24 = vrot.slane %v4356_v42, 2  ;;  %v4295_v12 = vld [vmem:[%s5599_s29 + $0x68] sm:$0xfe] }
 0x114   : > { %2505 = vmatprep.subr.bf16.mxu1 %v4952_v20  ;;  %v4297_v20 = vld [vmem:[%s5599_s29 + $0x78] sm:$0x1]  ;;  %v1821_v31 = vrot.slane %v4295_v12, 1  ;;  %v5869_v12 = vld [vmem:[%s5599_s29 + $0xa0] sm:$0xfe] }
 0x115   : > { %v1822_v32 = vrot.slane %v4297_v20, 1  ;;  %v5821_v35 = vsel %vm1080_vm1, %v2230_v51, %v2231_v24  ;;  %v1839_v51 = vrot.slane %v4307_v25, 1  ;;  %v1840_v24 = vrot.slane %v4309_v1, 1  ;;  %v5872_v20 = vld [vmem:[%s5599_s29 + $0xb0] sm:$0x1] }
 0x116   : > { %2088 = vmatpush2.bf16.msra.mxu0 %v4947_v13  ;;  %v4299_v13 = vld [vmem:[%s5599_s29 + $0x88] sm:$0xfe] }
 0x117   : > { %2506 = vmatpush2.bf16.msra.mxu1 %v4950_v14  ;;  %2089 = vmatprep.subr.bf16.mxu0 %v4955_v15  ;;  %v4301_v14 = vld [vmem:[%s5599_s29 + $0x98] sm:$0x1]  ;;  %v5802_v15 = vld [vmem:[%s5599_s29 + $0x60] sm:$0xfe]  ;;  %v1827_v33 = vrot.slane %v4299_v13, 1  ;;  %v5851_v56 = vsel %vm444_vm0, %v1821_v31, %v1822_v32 }
 0x118   : > { %2507 = vmatprep.subr.bf16.mxu1 %v4958_v16  ;;  %v4359_v16 = vld [vmem:[%s5599_s29 + $0x68] sm:$0xfc]  ;;  %v1828_v36 = vrot.slane %v4301_v14, 1  ;;  %v1818_v57 = vrot.slane %v5802_v15, 1  ;;  %6698 = vst [vmem:[#allocation18_spill] sm:$0xff] %v5851_v56  ;;  %v1830_v15 = vrot.slane %v5869_v12, 1 }
 0x119   : > { %v2239_v49 = vrot.slane %v4359_v16, 2  ;;  %v5875_v13 = vld [vmem:[%s5599_s29 + $0xc0] sm:$0xfe]  ;;  %v5878_v14 = vld [vmem:[%s5599_s29 + $0xd0] sm:$0x1] }
 0x11a   : > { %2090 = vmatpush2.bf16.msra.mxu0 %v4953_v21  ;;  %v5806_v21 = vsel %vm444_vm0, %v1806_v3, %v1807_v5  ;;  %v5854_v58 = vsel %vm444_vm0, %v1827_v33, %v1828_v36  ;;  %v2237_v3 = vrot.slane %v5834_v46, 2  ;;  %v4367_v16 = vld [vmem:[%s5599_s29 + $0xa8] sm:$0xfc]  ;;  %v4366_v33 = vld [vmem:[%s5599_s29 + $0xa0] sm:$0xfc]  ;;  %v5890_v41 = vsel %vm444_vm0, %v1818_v57, %v1819_v59 }
 0x11b   : > { %2508 = vmatpush2.bf16.msra.mxu1 %v4956_v22  ;;  %2091 = vmatprep.subr.bf16.mxu0 %v4961_v37  ;;  %6696 = vst [vmem:[#allocation16_spill] sm:$0xff] %v5806_v21  ;;  %v4361_v22 = vld [vmem:[%s5599_s29 + $0x78] sm:$0x3]  ;;  %v5824_v37 = vld [vmem:[%s5599_s29 + $0x80] sm:$0xfe]  ;;  %6699 = vst [vmem:[#allocation19_spill] sm:$0xff] %v5854_v58 }
 0x11c   : > { %2509 = vmatprep.subr.bf16.mxu1 %v4964_v38  ;;  %v5827_v38 = vld [vmem:[%s5599_s29 + $0x90] sm:$0x1]  ;;  %v2240_v40 = vrot.slane %v4361_v22, 2  ;;  %v1824_v61 = vrot.slane %v5824_v37, 1  ;;  %v4373_v22 = vld [vmem:[%s5599_s29 + $0xd8] sm:$0x3] }
 0x11d   : > { %v1825_v42 = vrot.slane %v5827_v38, 1  ;;  %v2251_v31 = vrot.slane %v4367_v16, 2  ;;  %6700 = vst [vmem:[#allocation20_spill] sm:$0xff] %v5890_v41  ;;  %v2258_v37 = vrot.slane %v4373_v22, 2  ;;  %v4368_v38 = vld [vmem:[%s5599_s29 + $0xb0] sm:$0x3] }
 0x11e   : > { %2092 = vmatpush2.bf16.msra.mxu0 %v4959_v4  ;;  %v4989_v4 = vld [vmem:[#allocation2 + $0x480] ss:$8 sps:$4 sm:$0xff]   ;;  %v4372_v57 = vld [vmem:[%s5599_s29 + $0xd0] sm:$0x3]  ;;  %v1836_v46 = vrot.slane %v5875_v13, 1 }
 0x11f   : > { %2510 = vmatpush2.bf16.msra.mxu1 %v4962_v44  ;;  %2093 = vmatprep.subr.bf16.mxu0 %v4967_v45  ;;  %v4992_v44 = vld [vmem:[#allocation2 + $0x580] ss:$8 sps:$4 sm:$0xff]   ;;  %v5015_v1 = vld [vmem:[#allocation2 + $0x644] ss:$8 sps:$4 sm:$0xff]   ;;  %v5021_v13 = vld [vmem:[#allocation2 + $0x634] ss:$8 sps:$4 sm:$0xff]  }
 0x120   : > { %2511 = vmatprep.subr.bf16.mxu1 %v4970_v47  ;;  %v5831_v45 = vld [vmem:[%s5599_s29 + $0x60] sm:$0xfc] }
 0x121   : > { %v5837_v47 = vld [vmem:[%s5599_s29 + $0x80] sm:$0xfc] }
 0x122   : > { %2094 = vmatpush2.bf16.msra.mxu0 %v4965_v48  ;;  %v1870_v48 = vpack.c.bf16 %v5812_v30, %v5806_v21  ;;  %v2242_v5 = vrot.slane %v5837_v47, 2  ;;  %v1837_v47 = vrot.slane %v5878_v14, 1  ;;  %v5024_v14 = vld [vmem:[#allocation2 + $0x734] ss:$8 sps:$4 sm:$0xff]  }
 0x123   : > { %2512 = vmatpush2.bf16.msra.mxu1 %v4968_v50  ;;  %2095 = vmatprep.subr.bf16.mxu0 %v4973_v52  ;;  %v4997_v50 = vld [vmem:[#allocation2 + $0x674] ss:$8 sps:$4 sm:$0xff]   ;;  %v5842_v52 = vld [vmem:[%s5599_s29 + $0x90] sm:$0x3] }
 0x124   : > { %2513 = vmatprep.subr.bf16.mxu1 %v4976_v53  ;;  %v5845_v53 = vld [vmem:[%s5599_s29 + $0xa8] sm:$0xfe]  ;;  %v2243_v7 = vrot.slane %v5842_v52, 2  ;;  %v2248_v52 = vrot.slane %v4366_v33, 2  ;;  %v4377_v33 = vld [vmem:[%s5599_s29 + $0xf8] sm:$0x3] }
 0x125   : > { %v1833_v8 = vrot.slane %v5845_v53, 1  ;;  %v2249_v53 = vrot.slane %v4368_v38, 2  ;;  %v5022_v38 = vld [vmem:[#allocation2 + $0x730] ss:$8 sps:$4 sm:$0xff]  }
 0x126   : > { %2096 = vmatpush2.bf16.msra.mxu0 %v4971_v54  ;;  %v4305_v54 = vld [vmem:[%s5599_s29 + $0xb8] sm:$0x1]  ;;  %v2244_v43 = vsel %vm1080_vm1, %v2242_v5, %v2243_v7  ;;  %v5924_v7 = vld [vmem:[%s5599_s29 + $0xe0] sm:$0xfe] }
 0x127   : > { %2514 = vmatpush2.bf16.msra.mxu1 %v4974_v55  ;;  %2097 = vmatprep.subr.bf16.mxu0 %v4979_v19  ;;  %v2288_v55 = vpack.c.bf16 %v5821_v35, %v5818_v34  ;;  %v2241_v19 = vsel %vm1080_vm1, %v2239_v49, %v2240_v40  ;;  %v1834_v11 = vrot.slane %v4305_v54, 1  ;;  %v5893_v34 = vsel %vm444_vm0, %v1824_v61, %v1825_v42  ;;  %v5009_v35 = vld [vmem:[#allocation2 + $0x654] ss:$8 sps:$4 sm:$0xff]   ;;  %v4370_v49 = vld [vmem:[%s5599_s29 + $0xc0] sm:$0xfc] }
 0x128   : > { %2515 = vmatprep.subr.bf16.mxu1 %v4982_v62  ;;  %v2236_v62 = vrot.slane %v5831_v45, 2  ;;  %6701 = vst [vmem:[#allocation21_spill] sm:$0xff] %v5893_v34  ;;  %v1831_v45 = vrot.slane %v5872_v20, 1  ;;  %v2254_v54 = vrot.slane %v4370_v49, 2  ;;  %v1872_v59 = vpack.c.bf16 %v5893_v34, %v5890_v41  ;;  %v4316_v20 = vld [vmem:[%s5599_s29 + $0x110] sm:$0x1] }
 0x129   : > { %v5900_v29 = vsel %vm444_vm0, %v1833_v8, %v1834_v11  ;;  %v5927_v8 = vld [vmem:[%s5599_s29 + $0xf0] sm:$0x1]  ;;  %v5933_v11 = vsel %vm444_vm0, %v1836_v46, %v1837_v47 }
 0x12a   : > { %2098 = vmatpush2.bf16.msra.mxu0 %v4977_v63  ;;  %v4995_v63 = vld [vmem:[#allocation2 + $0x670] ss:$8 sps:$4 sm:$0xff]   ;;  %v2238_v40 = vsel %vm1080_vm1, %v2236_v62, %v2237_v3  ;;  %6702 = vst [vmem:[#allocation22_spill] sm:$0xff] %v5900_v29  ;;  %v5921_v5 = vsel %vm444_vm0, %v1830_v15, %v1831_v45  ;;  %6705 = vst [vmem:[#allocation25_spill] sm:$0xff] %v5933_v11 }
 0x12b   : > { %2516 = vmatpush2.bf16.msra.mxu1 %v4980_v0  ;;  %2099 = vmatprep.subr.bf16.mxu0 %v4985_v9  ;;  %v4998_v0 = vld [vmem:[#allocation2 + $0x770] ss:$8 sps:$4 sm:$0xff]   ;;  %v5003_v9 = vld [vmem:[#allocation2 + $0x664] ss:$8 sps:$4 sm:$0xff]   ;;  %v2290_v25 = vpack.c.bf16 %v2244_v43, %v2238_v40  ;;  %6704 = vst [vmem:[#allocation24_spill] sm:$0xff] %v5921_v5  ;;  %v2264_v43 = vrot.slane %v4377_v33, 2 }
 0x12c   : > { %2517 = vmatprep.subr.bf16.mxu1 %v4988_v6  ;;  %v5006_v6 = vld [vmem:[#allocation2 + $0x764] ss:$8 sps:$4 sm:$0xff]   ;;  %v4313_v62 = vld [vmem:[%s5599_s29 + $0xf8] sm:$0x1]  ;;  %v4376_v47 = vld [vmem:[%s5599_s29 + $0xf0] sm:$0x3] }
 0x12d   : > { %v5055_v33 = vld [vmem:[#allocation2 + $0x6d0] ss:$8 sps:$4 sm:$0xff]  }
 0x12e   : > { %2100 = vmatpush2.bf16.msra.mxu0 %v4983_v17  ;;  %v4369_v17 = vld [vmem:[%s5599_s29 + $0xb8] sm:$0x3] }
 0x12f   : > { %2518 = vmatpush2.bf16.msra.mxu1 %v4986_v18  ;;  %2101 = vmatprep.subr.bf16.mxu0 %v4991_v27  ;;  %v4371_v18 = vld [vmem:[%s5599_s29 + $0xc8] sm:$0xfc]  ;;  %v1873_v27 = vpack.c.bf16 %v5854_v58, %v5851_v56  ;;  %v2252_v32 = vrot.slane %v4369_v17, 2  ;;  %v1846_v17 = vrot.slane %v4313_v62, 1 }
 0x130   : > { %2519 = vmatprep.subr.bf16.mxu1 %v4994_v28  ;;  %v2291_v28 = vpack.c.bf16 %v2247_v10, %v2241_v19  ;;  %v2257_v36 = vrot.slane %v4371_v18, 2  ;;  %v4311_v19 = vld [vmem:[%s5599_s29 + $0xe8] sm:$0xfe] }
 0x131   : > { %v2253_v61 = vsel %vm1080_vm1, %v2251_v31, %v2252_v32  ;;  %v5016_v10 = vld [vmem:[#allocation2 + $0x740] ss:$8 sps:$4 sm:$0xff]   ;;  %v1845_v16 = vrot.slane %v4311_v19, 1  ;;  %v1874_v32 = vpack.c.bf16 %v5933_v11, %v5921_v5 }
 0x132   : > { %2102 = vmatpush2.bf16.msra.mxu0 %v4989_v4  ;;  %v5012_v4 = vld [vmem:[#allocation2 + $0x754] ss:$8 sps:$4 sm:$0xff]   ;;  %v2259_v42 = vsel %vm1080_vm1, %v2257_v36, %v2258_v37  ;;  %v4375_v31 = vld [vmem:[%s5599_s29 + $0xe8] sm:$0xfc]  ;;  %v4381_v36 = vld [vmem:[%s5599_s29 + $0x118] sm:$0x3] }
 0x133   : > { %2520 = vmatpush2.bf16.msra.mxu1 %v4992_v44  ;;  %2796 = vmatprep.subr.bf16.mxu0 %v4997_v50  ;;  %v5905_v44 = vsel %vm444_vm0, %v1839_v51, %v1840_v24  ;;  %v5010_v50 = vld [vmem:[#allocation2 + $0x750] ss:$8 sps:$4 sm:$0xff]   ;;  %v2293_v51 = vpack.c.bf16 %v2259_v42, %v2253_v61  ;;  %v2250_v24 = vsel %vm1080_vm1, %v2248_v52, %v2249_v53  ;;  %v2263_v40 = vrot.slane %v4375_v31, 2  ;;  %v5025_v19 = vld [vmem:[#allocation2 + $0x620] ss:$8 sps:$4 sm:$0xff]  }
 0x134   : > { %3214 = vmatprep.subr.bf16.mxu1 %v5000_v60  ;;  %6703 = vst [vmem:[#allocation23_spill] sm:$0xff] %v5905_v44  ;;  %v5018_v60 = vld [vmem:[#allocation2 + $0x744] ss:$8 sps:$4 sm:$0xff]   ;;  %v1875_v3 = vpack.c.bf16 %v5905_v44, %v5900_v29  ;;  %v5019_v37 = vld [vmem:[#allocation2 + $0x630] ss:$8 sps:$4 sm:$0xff]   ;;  %v2270_v46 = vrot.slane %v4381_v36, 2 }
 0x135   : > { %2104 = vmatmul.mubr.bf16.vlgmr.msra.gmra.mxu0 %v1870_v48  ;;  %v5007_v48 = vld [vmem:[#allocation2 + $0x650] ss:$8 sps:$4 sm:$0xff]   ;;  %v2265_v52 = vsel %vm1080_vm1, %v2263_v40, %v2264_v43  ;;  %v5028_v62 = vld [vmem:[#allocation2 + $0x720] ss:$8 sps:$4 sm:$0xff]   ;;  %v5057_v31 = vld [vmem:[#allocation2 + $0x6d4] ss:$8 sps:$4 sm:$0xff]  }
 0x136   : > { %2522 = vmatmul.mubr.bf16.vlgmr.msra.gmra.mxu1 %v2288_v55  ;;  %2797 = vmatpush1.bf16.msra.mxu0 %v4995_v63  ;;  %v2255_v55 = vrot.slane %v4372_v57, 2  ;;  %v4315_v63 = vld [vmem:[%s5599_s29 + $0x108] sm:$0xfe]  ;;  %v4374_v57 = vld [vmem:[%s5599_s29 + $0xe0] sm:$0xfc] }
 0x137   : > { %3215 = vmatpush1.bf16.msra.mxu1 %v4998_v0  ;;  %2798 = vmatprep.subr.bf16.mxu0 %v5003_v9  ;;  %v4317_v0 = vld [vmem:[%s5599_s29 + $0x118] sm:$0x1]  ;;  %v5930_v9 = vld [vmem:[%s5599_s29 + $0x100] sm:$0xfe]  ;;  %v1851_v18 = vrot.slane %v4315_v63, 1 }
 0x138   : > { %3216 = vmatprep.subr.bf16.mxu1 %v5006_v6  ;;  %2113 = vmatprep.mubr.bf16.mxu0 %v1873_v27  ;;  %v5013_v6 = vld [vmem:[#allocation2 + $0x640] ss:$8 sps:$4 sm:$0xff]   ;;  %v2256_v12 = vsel %vm1080_vm1, %v2254_v54, %v2255_v55  ;;  %v1852_v22 = vrot.slane %v4317_v0, 1  ;;  %v1848_v27 = vrot.slane %v5930_v9, 1  ;;  %v4380_v53 = vld [vmem:[%s5599_s29 + $0x110] sm:$0x3] }
 0x139   : > { %2531 = vmatprep.mubr.bf16.mxu1 %v2291_v28  ;;  %v1849_v28 = vrot.slane %v4316_v20, 1  ;;  %v2292_v49 = vpack.c.bf16 %v2256_v12, %v2250_v24  ;;  %v2261_v54 = vrot.slane %v4376_v47, 2  ;;  %v5036_v9 = vld [vmem:[#allocation2 + $0x714] ss:$8 sps:$4 sm:$0xff]   ;;  %v5039_v12 = vld [vmem:[#allocation2 + $0x604] ss:$8 sps:$4 sm:$0xff]  }
 0x13a   : > { %2799 = vmatpush1.bf16.msra.mxu0 %v5001_v23  ;;  %v1842_v23 = vrot.slane %v5924_v7, 1  ;;  %v5952_v45 = vsel %vm444_vm0, %v1851_v18, %v1852_v22  ;;  %v5042_v20 = vld [vmem:[#allocation2 + $0x704] ss:$8 sps:$4 sm:$0xff]   ;;  %v5043_v18 = vld [vmem:[#allocation2 + $0x6f0] ss:$8 sps:$4 sm:$0xff]  }
 0x13b   : > { %3217 = vmatpush1.bf16.msra.mxu1 %v5004_v26  ;;  %2800 = vmatprep.subr.bf16.mxu0 %v5009_v35  ;;  %v1843_v26 = vrot.slane %v5927_v8, 1  ;;  %v4379_v35 = vld [vmem:[%s5599_s29 + $0x108] sm:$0xfc]  ;;  %6707 = vst [vmem:[#allocation27_spill] sm:$0xff] %v5952_v45  ;;  %v5965_v0 = vsel %vm444_vm0, %v1848_v27, %v1849_v28  ;;  %v5046_v22 = vld [vmem:[#allocation2 + $0x7f0] ss:$8 sps:$4 sm:$0xff]  }
 0x13c   : > { %3218 = vmatprep.subr.bf16.mxu1 %v5012_v4  ;;  %v2269_v15 = vrot.slane %v4379_v35, 2  ;;  %v5949_v4 = vsel %vm444_vm0, %v1845_v16, %v1846_v17  ;;  %6709 = vst [vmem:[#allocation29_spill] sm:$0xff] %v5965_v0  ;;  %v5045_v16 = vld [vmem:[#allocation2 + $0x6f4] ss:$8 sps:$4 sm:$0xff]   ;;  %v5049_v27 = vld [vmem:[#allocation2 + $0x6e0] ss:$8 sps:$4 sm:$0xff]  }
 0x13d   : > { %2114 = vmatmul.mubr.bf16.gmra.mxu0 %v1872_v59  ;;  %6706 = vst [vmem:[#allocation26_spill] sm:$0xff] %v5949_v4  ;;  %v5027_v59 = vld [vmem:[#allocation2 + $0x624] ss:$8 sps:$4 sm:$0xff]   ;;  %v1877_v61 = vpack.c.bf16 %v5952_v45, %v5949_v4  ;;  %v5962_v63 = vsel %vm444_vm0, %v1842_v23, %v1843_v26  ;;  %v5048_v17 = vld [vmem:[#allocation2 + $0x7f4] ss:$8 sps:$4 sm:$0xff]  }
 0x13e   : > { %2532 = vmatmul.mubr.bf16.gmra.mxu1 %v2290_v25  ;;  %2801 = vmatpush1.bf16.msra.mxu0 %v5007_v48  ;;  %v4378_v48 = vld [vmem:[%s5599_s29 + $0x100] sm:$0xfc]  ;;  %6708 = vst [vmem:[#allocation28_spill] sm:$0xff] %v5962_v63  ;;  %v5058_v35 = vld [vmem:[#allocation2 + $0x7d0] ss:$8 sps:$4 sm:$0xff]  }
 0x13f   : > { %3219 = vmatpush1.bf16.msra.mxu1 %v5010_v50  ;;  %2802 = vmatprep.subr.bf16.mxu0 %v5015_v1  ;;  %v2260_v50 = vrot.slane %v4374_v57, 2  ;;  %v2266_v55 = vrot.slane %v4378_v48, 2  ;;  %v5030_v25 = vld [vmem:[#allocation2 + $0x724] ss:$8 sps:$4 sm:$0xff]   ;;  %v2271_v1 = vsel %vm1080_vm1, %v2269_v15, %v2270_v46  ;;  %v5052_v28 = vld [vmem:[#allocation2 + $0x7e0] ss:$8 sps:$4 sm:$0xff]  }
 0x140   : > { %3220 = vmatprep.subr.bf16.mxu1 %v5018_v60  ;;  %2123 = vmatprep.mubr.bf16.mxu0 %v1875_v3  ;;  %v2267_v60 = vrot.slane %v4380_v53, 2  ;;  %v2295_v42 = vpack.c.bf16 %v2271_v1, %v2265_v52  ;;  %v5033_v3 = vld [vmem:[#allocation2 + $0x614] ss:$8 sps:$4 sm:$0xff]   ;;  %v5051_v23 = vld [vmem:[#allocation2 + $0x6e4] ss:$8 sps:$4 sm:$0xff]  }
 0x141   : > { %2541 = vmatprep.mubr.bf16.mxu1 %v2293_v51  ;;  %v2262_v7 = vsel %vm1080_vm1, %v2260_v50, %v2261_v54  ;;  %v5034_v51 = vld [vmem:[#allocation2 + $0x710] ss:$8 sps:$4 sm:$0xff]   ;;  %v5054_v26 = vld [vmem:[#allocation2 + $0x7e4] ss:$8 sps:$4 sm:$0xff]   ;;  %v5061_v53 = vld [vmem:[#allocation2 + $0x6c0] ss:$8 sps:$4 sm:$0xff]  }
 0x142   : > { %2803 = vmatpush1.bf16.msra.mxu0 %v5013_v6  ;;  %v2268_v8 = vsel %vm1080_vm1, %v2266_v55, %v2267_v60  ;;  %v1876_v6 = vpack.c.bf16 %v5965_v0, %v5962_v63  ;;  %v5063_v36 = vld [vmem:[#allocation2 + $0x6c4] ss:$8 sps:$4 sm:$0xff]   ;;  %v4465_v15 = vld [vmem:[%s5599_s29 + $0x58] sm:$0x1]  ;;  %v5064_v54 = vld [vmem:[#allocation2 + $0x7c0] ss:$8 sps:$4 sm:$0xff]  }
 0x143   : > { %3221 = vmatpush1.bf16.msra.mxu1 %v5016_v10  ;;  %2804 = vmatprep.subr.bf16.mxu0 %v5021_v13  ;;  %v5031_v10 = vld [vmem:[#allocation2 + $0x610] ss:$8 sps:$4 sm:$0xff]   ;;  %v2294_v24 = vpack.c.bf16 %v2268_v8, %v2262_v7  ;;  %v5037_v13 = vld [vmem:[#allocation2 + $0x600] ss:$8 sps:$4 sm:$0xff]   ;;  %v2953_v48 = vrot.slane %v4465_v15, 1 }
 0x144   : > { %3222 = vmatprep.subr.bf16.mxu1 %v5024_v14  ;;  %v5040_v14 = vld [vmem:[#allocation2 + $0x700] ss:$8 sps:$4 sm:$0xff]   ;;  %v4469_v46 = vld [vmem:[%s5599_s29 + $0x78] sm:$0x1]  ;;  %v5072_v1 = vld [vmem:[#allocation2 + $0x7b4] ss:$8 sps:$4 sm:$0xff]  }
 0x145   : > { %2124 = vmatmul.mubr.bf16.gmra.mxu0 %v1874_v32  ;;  %v5060_v32 = vld [vmem:[#allocation2 + $0x7d4] ss:$8 sps:$4 sm:$0xff]   ;;  %v4463_v40 = vld [vmem:[%s5599_s29 + $0x48] sm:$0xfe]  ;;  %v2959_v52 = vrot.slane %v4469_v46, 1 }
 0x146   : > { %2542 = vmatmul.mubr.bf16.gmra.mxu1 %v2292_v49  ;;  %2805 = vmatpush1.bf16.msra.mxu0 %v5019_v37  ;;  %v5066_v37 = vld [vmem:[#allocation2 + $0x7c4] ss:$8 sps:$4 sm:$0xff]   ;;  %v2952_v47 = vrot.slane %v4463_v40, 1  ;;  %v5076_v7 = vld [vmem:[#allocation2 + $0x7a0] ss:$8 sps:$4 sm:$0xff]  }
 0x147   : > { %3223 = vmatpush1.bf16.msra.mxu1 %v5022_v38  ;;  %2806 = vmatprep.subr.bf16.mxu0 %v5027_v59  ;;  %v4415_v38 = vld [vmem:[%s5599_s29 + $0x48] sm:$0xff]  ;;  %v5081_v8 = vld [vmem:[#allocation2 + $0x694] ss:$8 sps:$4 sm:$0xff]   ;;  %v4472_v40 = vld [vmem:[%s5599_s29 + $0x90] sm:$0x1] }
 0x148   : > { %3224 = vmatprep.subr.bf16.mxu1 %v5030_v25  ;;  %2133 = vmatprep.mubr.bf16.mxu0 %v1877_v61  ;;  %v4417_v49 = vld [vmem:[%s5599_s29 + $0x68] sm:$0xff]  ;;  %v2954_v55 = vsel %vm444_vm0, %v2952_v47, %v2953_v48  ;;  %v5069_v25 = vld [vmem:[#allocation2 + $0x6b4] ss:$8 sps:$4 sm:$0xff]   ;;  %v5067_v61 = vld [vmem:[#allocation2 + $0x6b0] ss:$8 sps:$4 sm:$0xff]  }
 0x149   : > { %2551 = vmatprep.mubr.bf16.mxu1 %v2295_v42  ;;  %v2596_v43 = vpack.c.bf16 %v4417_v49, %v4415_v38  ;;  %v4467_v57 = vld [vmem:[%s5599_s29 + $0x68] sm:$0xfe]  ;;  %v5070_v42 = vld [vmem:[#allocation2 + $0x7b0] ss:$8 sps:$4 sm:$0xff]   ;;  %v4470_v49 = vld [vmem:[%s5599_s29 + $0x80] sm:$0xfe] }
 0x14a   : > { %2807 = vmatpush1.bf16.msra.mxu0 %v5025_v19  ;;  %v2958_v50 = vrot.slane %v4467_v57, 1  ;;  %v5075_v19 = vld [vmem:[#allocation2 + $0x6a4] ss:$8 sps:$4 sm:$0xff]   ;;  %v5088_v15 = vld [vmem:[#allocation2 + $0x780] ss:$8 sps:$4 sm:$0xff]  }
 0x14b   : > { %3225 = vmatpush1.bf16.msra.mxu1 %v5028_v62  ;;  %2808 = vmatprep.subr.bf16.mxu0 %v5033_v3  ;;  %v5078_v62 = vld [vmem:[#allocation2 + $0x7a4] ss:$8 sps:$4 sm:$0xff]   ;;  %v5073_v3 = vld [vmem:[#allocation2 + $0x6a0] ss:$8 sps:$4 sm:$0xff]   ;;  %v5093_v47 = vld [vmem:[#allocation2 + $0x874] ss:$8 sps:$4 sm:$0xff]  }
 0x14c   : > { %3226 = vmatprep.subr.bf16.mxu1 %v5036_v9  ;;  %v2960_v59 = vsel %vm444_vm0, %v2958_v50, %v2959_v52  ;;  %v5084_v9 = vld [vmem:[#allocation2 + $0x794] ss:$8 sps:$4 sm:$0xff]   ;;  %v4476_v48 = vld [vmem:[%s5599_s29 + $0xb0] sm:$0x1]  ;;  %v4419_v50 = vld [vmem:[%s5599_s29 + $0x88] sm:$0xff] }
 0x14d   : > { %2134 = vmatmul.mubr.bf16.gmra.mxu0 %v1876_v6  ;;  %v3014_v60 = vpack.c.bf16 %v2960_v59, %v2954_v55  ;;  %v4462_v6 = vld [vmem:[%s5599_s29 + $0x40] sm:$0xfe]  ;;  %v2962_v55 = vrot.slane %v4472_v40, 1  ;;  %v4489_v40 = vld [vmem:[%s5599_s29 + $0x118] sm:$0x1] }
 0x14e   : > { %2552 = vmatmul.mubr.bf16.gmra.mxu1 %v2294_v24  ;;  %2809 = vmatpush1.bf16.msra.mxu0 %v5031_v10  ;;  %v4464_v10 = vld [vmem:[%s5599_s29 + $0x50] sm:$0x1] }
 0x14f   : > { %3227 = vmatpush1.bf16.msra.mxu1 %v5034_v51  ;;  %2810 = vmatprep.subr.bf16.mxu0 %v5039_v12  ;;  %v4466_v51 = vld [vmem:[%s5599_s29 + $0x60] sm:$0xfe]  ;;  %v4468_v24 = vld [vmem:[%s5599_s29 + $0x70] sm:$0x1] }
 0x150   : > { %3228 = vmatprep.subr.bf16.mxu1 %v5042_v20  ;;  %2828 = vmatprep.mubr.bf16.mxu0 %v2596_v43  ;;  %v5079_v12 = vld [vmem:[#allocation2 + $0x690] ss:$8 sps:$4 sm:$0xff]   ;;  %v4474_v43 = vld [vmem:[%s5599_s29 + $0xa0] sm:$0xfe] }
 0x151   : > { %3246 = vmatprep.mubr.bf16.mxu1 %v3014_v60  ;;  %v5082_v20 = vld [vmem:[#allocation2 + $0x790] ss:$8 sps:$4 sm:$0xff]   ;;  %v2967_v59 = vrot.slane %v4474_v43, 1 }
 0x152   : > { %2811 = vmatpush1.bf16.msra.mxu0 %v5037_v13  ;;  %v4471_v13 = vld [vmem:[%s5599_s29 + $0x88] sm:$0xfe] }
 0x153   : > { %3229 = vmatpush1.bf16.msra.mxu1 %v5040_v14  ;;  %2812 = vmatprep.subr.bf16.mxu0 %v5045_v16  ;;  %v4473_v14 = vld [vmem:[%s5599_s29 + $0x98] sm:$0x1]  ;;  %v4475_v16 = vld [vmem:[%s5599_s29 + $0xa8] sm:$0xfe] }
 0x154   : > { %3230 = vmatprep.subr.bf16.mxu1 %v5048_v17  ;;  %v4477_v17 = vld [vmem:[%s5599_s29 + $0xb8] sm:$0x1] }
 0x155   : > { %v2971_v38 = vrot.slane %v4477_v17, 1  ;;  %v5099_v17 = vld [vmem:[#allocation2 + $0x854] ss:$8 sps:$4 sm:$0xff]  }
 0x156   : > { %2813 = vmatpush2.bf16.msra.mxu0 %v5043_v18  ;;  %v2949_v18 = vrot.slane %v4462_v6, 1  ;;  %v5094_v6 = vld [vmem:[#allocation2 + $0x860] ss:$8 sps:$4 sm:$0xff]  }
 0x157   : > { %3231 = vmatpush2.bf16.msra.mxu1 %v5046_v22  ;;  %2814 = vmatprep.subr.bf16.mxu0 %v5051_v23  ;;  %v2950_v22 = vrot.slane %v4464_v10, 1  ;;  %v2955_v23 = vrot.slane %v4466_v51, 1  ;;  %v6004_v10 = vld [vmem:[%s5599_s29 + $0x80] sm:$0xff] }
 0x158   : > { %3232 = vmatprep.subr.bf16.mxu1 %v5054_v26  ;;  %v2956_v26 = vrot.slane %v4468_v24, 1  ;;  %v6007_v51 = vld [vmem:[%s5599_s29 + $0xa0] sm:$0xff] }
 0x159   : > { %v2951_v57 = vsel %vm444_vm0, %v2949_v18, %v2950_v22 }
 0x15a   : > { %2815 = vmatpush2.bf16.msra.mxu0 %v5049_v27  ;;  %v5087_v27 = vld [vmem:[#allocation2 + $0x684] ss:$8 sps:$4 sm:$0xff]   ;;  %v2957_v46 = vsel %vm444_vm0, %v2955_v23, %v2956_v26 }
 0x15b   : > { %3233 = vmatpush2.bf16.msra.mxu1 %v5052_v28  ;;  %2816 = vmatprep.subr.bf16.mxu0 %v5057_v31  ;;  %v5090_v28 = vld [vmem:[#allocation2 + $0x784] ss:$8 sps:$4 sm:$0xff]   ;;  %v5085_v31 = vld [vmem:[#allocation2 + $0x680] ss:$8 sps:$4 sm:$0xff]  }
 0x15c   : > { %3234 = vmatprep.subr.bf16.mxu1 %v5060_v32  ;;  %v4414_v32 = vld [vmem:[%s5599_s29 + $0x40] sm:$0xff] }
 0x15d   : > { %v4478_v26 = vld [vmem:[%s5599_s29 + $0xc0] sm:$0xfe] }
 0x15e   : > { %2817 = vmatpush2.bf16.msra.mxu0 %v5055_v33  ;;  %v4416_v33 = vld [vmem:[%s5599_s29 + $0x60] sm:$0xff] }
 0x15f   : > { %3235 = vmatpush2.bf16.msra.mxu1 %v5058_v35  ;;  %2818 = vmatprep.subr.bf16.mxu0 %v5063_v36  ;;  %v2964_v35 = vrot.slane %v4471_v13, 1  ;;  %v2965_v36 = vrot.slane %v4473_v14, 1  ;;  %v2595_v52 = vpack.c.bf16 %v4416_v33, %v4414_v32  ;;  %v4482_v32 = vld [vmem:[%s5599_s29 + $0xe0] sm:$0xfe]  ;;  %v4484_v33 = vld [vmem:[%s5599_s29 + $0xf0] sm:$0x1] }
 0x160   : > { %3236 = vmatprep.subr.bf16.mxu1 %v5066_v37  ;;  %v2970_v37 = vrot.slane %v4475_v16, 1 }
 0x161   : > { %v2966_v60 = vsel %vm444_vm0, %v2964_v35, %v2965_v36 }
 0x162   : > { %2819 = vmatpush2.bf16.msra.mxu0 %v5061_v53  ;;  %v4421_v53 = vld [vmem:[%s5599_s29 + $0xa8] sm:$0xff] }
 0x163   : > { %3237 = vmatpush2.bf16.msra.mxu1 %v5064_v54  ;;  %2820 = vmatprep.subr.bf16.mxu0 %v5069_v25  ;;  %v2961_v54 = vrot.slane %v4470_v49, 1  ;;  %v4479_v25 = vld [vmem:[%s5599_s29 + $0xc8] sm:$0xfe] }
 0x164   : > { %3238 = vmatprep.subr.bf16.mxu1 %v5072_v1  ;;  %v3013_v1 = vpack.c.bf16 %v2957_v46, %v2951_v57  ;;  %v4487_v49 = vld [vmem:[%s5599_s29 + $0x108] sm:$0xfe]  ;;  %v2973_v57 = vrot.slane %v4478_v26, 1 }
 0x165   : > { %v2963_v18 = vsel %vm444_vm0, %v2961_v54, %v2962_v55  ;;  %v2979_v54 = vrot.slane %v4482_v32, 1  ;;  %v2980_v55 = vrot.slane %v4484_v33, 1 }
 0x166   : > { %2821 = vmatpush2.bf16.msra.mxu0 %v5067_v61  ;;  %v2972_v61 = vsel %vm444_vm0, %v2970_v37, %v2971_v38  ;;  %v2597_v37 = vpack.c.bf16 %v6007_v51, %v6004_v10  ;;  %v4425_v38 = vld [vmem:[%s5599_s29 + $0xe8] sm:$0xff] }
 0x167   : > { %3239 = vmatpush2.bf16.msra.mxu1 %v5070_v42  ;;  %2822 = vmatprep.subr.bf16.mxu0 %v5075_v19  ;;  %v2968_v42 = vrot.slane %v4476_v48, 1  ;;  %v4481_v19 = vld [vmem:[%s5599_s29 + $0xd8] sm:$0x1]  ;;  %v3016_v24 = vpack.c.bf16 %v2972_v61, %v2966_v60  ;;  %v5102_v60 = vld [vmem:[#allocation2 + $0x844] ss:$8 sps:$4 sm:$0xff]  }
 0x168   : > { %3240 = vmatprep.subr.bf16.mxu1 %v5078_v62  ;;  %v4483_v62 = vld [vmem:[%s5599_s29 + $0xe8] sm:$0xfe] }
 0x169   : > { %v2982_v13 = vrot.slane %v4483_v62, 1  ;;  %v2969_v22 = vsel %vm444_vm0, %v2967_v59, %v2968_v42  ;;  %v4493_v59 = vld [vmem:[%s5599_s29 + $0x138] sm:$0x1]  ;;  %v4422_v62 = vld [vmem:[%s5599_s29 + $0xc0] sm:$0xff] }
 0x16a   : > { %2823 = vmatpush2.bf16.msra.mxu0 %v5073_v3  ;;  %v5091_v3 = vld [vmem:[#allocation2 + $0x870] ss:$8 sps:$4 sm:$0xff]   ;;  %v5100_v10 = vld [vmem:[#allocation2 + $0x840] ss:$8 sps:$4 sm:$0xff]  }
 0x16b   : > { %3241 = vmatpush2.bf16.msra.mxu1 %v5076_v7  ;;  %2824 = vmatprep.subr.bf16.mxu0 %v5081_v8  ;;  %v4485_v7 = vld [vmem:[%s5599_s29 + $0xf8] sm:$0x1]  ;;  %v5096_v8 = vld [vmem:[#allocation2 + $0x864] ss:$8 sps:$4 sm:$0xff]  }
 0x16c   : > { %3242 = vmatprep.subr.bf16.mxu1 %v5084_v9  ;;  %v2598_v9 = vpack.c.bf16 %v4421_v53, %v4419_v50  ;;  %v2983_v23 = vrot.slane %v4485_v7, 1  ;;  %v2988_v7 = vrot.slane %v4487_v49, 1  ;;  %v5103_v49 = vld [vmem:[#allocation2 + $0x830] ss:$8 sps:$4 sm:$0xff]  }
 0x16e   : > { %2825 = vmatpush2.bf16.msra.mxu0 %v5079_v12  ;;  %v2976_v12 = vrot.slane %v4479_v25, 1  ;;  %v2984_v53 = vsel %vm444_vm0, %v2982_v13, %v2983_v23  ;;  %v2981_v13 = vsel %vm444_vm0, %v2979_v54, %v2980_v55  ;;  %v4427_v23 = vld [vmem:[%s5599_s29 + $0x108] sm:$0xff]  ;;  %v4533_v54 = vld [vmem:[%s5599_s29 + $0x78] sm:$0x3] }
 0x16f   : > { %3243 = vmatpush2.bf16.msra.mxu1 %v5082_v20  ;;  %2826 = vmatprep.subr.bf16.mxu0 %v5087_v27  ;;  %v2977_v20 = vrot.slane %v4481_v19, 1  ;;  %v4480_v27 = vld [vmem:[%s5599_s29 + $0xd0] sm:$0x1] }
 0x170   : > { %3244 = vmatprep.subr.bf16.mxu1 %v5090_v28  ;;  %v2974_v46 = vrot.slane %v4480_v27, 1  ;;  %v4429_v27 = vld [vmem:[%s5599_s29 + $0x128] sm:$0xff] }
 0x172   : > { %2827 = vmatpush2.bf16.msra.mxu0 %v5085_v31  ;;  %v4423_v31 = vld [vmem:[%s5599_s29 + $0xc8] sm:$0xff] }
 0x173   : > { %3245 = vmatpush2.bf16.msra.mxu1 %v5088_v15  ;;  %3632 = vmatprep.subr.bf16.mxu0 %v5093_v47  ;;  %v3015_v15 = vpack.c.bf16 %v2969_v22, %v2963_v18  ;;  %v2600_v19 = vpack.c.bf16 %v4425_v38, %v4423_v31  ;;  %v5105_v22 = vld [vmem:[#allocation2 + $0x834] ss:$8 sps:$4 sm:$0xff]  }
 0x174   : > { %4598 = vmatprep.subr.bf16.mxu1 %v5093_v47  ;;  %v4491_v47 = vld [vmem:[%s5599_s29 + $0x128] sm:$0xfe] }
 0x175   : > { %v744_v14 = vpop.f32.mrf.mxu0  ;;  %2829 = vmatmul.mubr.bf16.vlgmr.msra.gmra.mxu0 %v2595_v52  ;;  %v2978_v52 = vsel %vm444_vm0, %v2976_v12, %v2977_v20  ;;  %v4486_v12 = vld [vmem:[%s5599_s29 + $0x100] sm:$0xfe]  ;;  %v2975_v20 = vsel %vm444_vm0, %v2973_v57, %v2974_v46  ;;  %v2602_v57 = vpack.c.bf16 %v4429_v27, %v4427_v23 }
 0x176   : > { %v977_v16 = vpop.f32.mrf.mxu1  ;;  %3247 = vmatmul.mubr.bf16.vlgmr.msra.gmra.mxu1 %v3013_v1  ;;  %3633 = vmatpush1.bf16.msra.mxu0 %v5091_v3  ;;  %v5097_v1 = vld [vmem:[#allocation2 + $0x850] ss:$8 sps:$4 sm:$0xff]   ;;  %v3018_v51 = vpack.c.bf16 %v2984_v53, %v2978_v52  ;;  %v3017_v26 = vpack.c.bf16 %v2981_v13, %v2975_v20  ;;  %v2985_v33 = vrot.slane %v4486_v12, 1  ;;  %v4426_v46 = vld [vmem:[%s5599_s29 + $0x100] sm:$0xff]  ;;  %v4531_v53 = vld [vmem:[%s5599_s29 + $0x68] sm:$0xfc] }
 0x177   : > { %v6013_v28 = vadd.f32 %v977_v16, %v744_v14  ;;  %4614 = vmatpush1.bf16.msra.mxu1 %v5091_v3  ;;  %v746_v35 = vpop.f32.mrf.mxu0  ;;  %3634 = vmatprep.subr.bf16.mxu0 %v5096_v8  ;;  %v4424_v3 = vld [vmem:[%s5599_s29 + $0xe0] sm:$0xff]  ;;  %v4488_v14 = vld [vmem:[%s5599_s29 + $0x110] sm:$0x1]  ;;  %v4529_v52 = vld [vmem:[%s5599_s29 + $0x58] sm:$0x3] }
 0x178   : > { %v979_v36 = vpop.f32.mrf.mxu1  ;;  %4599 = vmatprep.subr.bf16.mxu1 %v5096_v8  ;;  %2838 = vmatprep.mubr.bf16.mxu0 %v2598_v9  ;;  %v2989_v8 = vrot.slane %v4489_v40, 1  ;;  %v4490_v16 = vld [vmem:[%s5599_s29 + $0x120] sm:$0xfe]  ;;  %v2599_v18 = vpack.c.bf16 %v4424_v3, %v4422_v62  ;;  %v5111_v13 = vld [vmem:[#allocation2 + $0x814] ss:$8 sps:$4 sm:$0xff]  }
 0x179   : > { %v6023_v43 = vadd.f32 %v979_v36, %v746_v35  ;;  %3256 = vmatprep.mubr.bf16.mxu1 %v3016_v24  ;;  %v748_v48 = vpop.f32.mrf.mxu0  ;;  %v2995_v24 = vrot.slane %v4493_v59, 1  ;;  %v2986_v35 = vrot.slane %v4488_v14, 1  ;;  %v2991_v36 = vrot.slane %v4490_v16, 1  ;;  %v5108_v40 = vld [vmem:[#allocation2 + $0x824] ss:$8 sps:$4 sm:$0xff]  }
 0x17a   : > { %v981_v50 = vpop.f32.mrf.mxu1  ;;  %3635 = vmatpush1.bf16.msra.mxu0 %v5094_v6  ;;  %v2990_v31 = vsel %vm444_vm0, %v2988_v7, %v2989_v8  ;;  %v4545_v8 = vld [vmem:[%s5599_s29 + $0xd8] sm:$0x3] }
 0x17b   : > { %v6029_v25 = vadd.f32 %v981_v50, %v748_v48  ;;  %4615 = vmatpush1.bf16.msra.mxu1 %v5094_v6  ;;  %v750_v61 = vpop.f32.mrf.mxu0  ;;  %3636 = vmatprep.subr.bf16.mxu0 %v5099_v17  ;;  %v2994_v6 = vrot.slane %v4491_v47, 1  ;;  %v4428_v47 = vld [vmem:[%s5599_s29 + $0x120] sm:$0xff]  ;;  %v3395_v20 = vrot.slane %v4545_v8, 2 }
 0x17c   : > { %v983_v42 = vpop.f32.mrf.mxu1  ;;  %4600 = vmatprep.subr.bf16.mxu1 %v5099_v17  ;;  %v4492_v17 = vld [vmem:[%s5599_s29 + $0x130] sm:$0x1]  ;;  %v5118_v8 = vld [vmem:[#allocation2 + $0x8e0] ss:$8 sps:$4 sm:$0xff]  }
 0x17d   : > { %v6033_v9 = vadd.f32 %v983_v42, %v750_v61  ;;  %2839 = vmatmul.mubr.bf16.gmra.mxu0 %v2597_v37  ;;  %v2996_v32 = vsel %vm444_vm0, %v2994_v6, %v2995_v24  ;;  %v2992_v37 = vrot.slane %v4492_v17, 1  ;;  %v754_v55 = vpop.f32.mrf.mxu0  ;;  %v3377_v61 = vrot.slane %v4533_v54, 2  ;;  %v4543_v42 = vld [vmem:[%s5599_s29 + $0xc8] sm:$0xfc] }
 0x17e   : > { %3257 = vmatmul.mubr.bf16.gmra.mxu1 %v3015_v15  ;;  %3637 = vmatpush1.bf16.msra.mxu0 %v5097_v1  ;;  %v987_v38 = vpop.f32.mrf.mxu1  ;;  %v4527_v15 = vld [vmem:[%s5599_s29 + $0x48] sm:$0xfc]  ;;  %v3020_v48 = vpack.c.bf16 %v2996_v32, %v2990_v31  ;;  %v3394_v12 = vrot.slane %v4543_v42, 2 }
 0x17f   : > { %4616 = vmatpush1.bf16.msra.mxu1 %v5097_v1  ;;  %3638 = vmatprep.subr.bf16.mxu0 %v5102_v60  ;;  %v3370_v59 = vrot.slane %v4527_v15, 2  ;;  %v3371_v1 = vrot.slane %v4529_v52, 2  ;;  %v2993_v62 = vsel %vm444_vm0, %v2991_v36, %v2992_v37  ;;  %v6054_v3 = vadd.f32 %v987_v38, %v754_v55  ;;  %v5106_v6 = vld [vmem:[#allocation2 + $0x820] ss:$8 sps:$4 sm:$0xff]   ;;  %v756_v24 = vpop.f32.mrf.mxu0  ;;  %v5109_v36 = vld [vmem:[#allocation2 + $0x810] ss:$8 sps:$4 sm:$0xff]  }
 0x180   : > { %4601 = vmatprep.subr.bf16.mxu1 %v5102_v60  ;;  %2848 = vmatprep.mubr.bf16.mxu0 %v2600_v19  ;;  %v989_v50 = vpop.f32.mrf.mxu1  ;;  %v3376_v60 = vrot.slane %v4531_v53, 2  ;;  %v2987_v19 = vsel %vm444_vm0, %v2985_v33, %v2986_v35  ;;  %v3396_v33 = vsel %vm1080_vm1, %v3394_v12, %v3395_v20  ;;  %v5114_v38 = vld [vmem:[#allocation2 + $0x804] ss:$8 sps:$4 sm:$0xff]   ;;  %v5117_v52 = vld [vmem:[#allocation2 + $0x8f4] ss:$8 sps:$4 sm:$0xff]  }
 0x181   : > { %3266 = vmatprep.mubr.bf16.mxu1 %v3018_v51  ;;  %v4549_v51 = vld [vmem:[%s5599_s29 + $0xf8] sm:$0x3]  ;;  %v6059_v14 = vadd.f32 %v989_v50, %v756_v24  ;;  %v758_v23 = vpop.f32.mrf.mxu0  ;;  %v3372_v27 = vsel %vm1080_vm1, %v3370_v59, %v3371_v1  ;;  %v5120_v42 = vld [vmem:[#allocation2 + $0x8e4] ss:$8 sps:$4 sm:$0xff]  }
 0x182   : > { %3639 = vmatpush1.bf16.msra.mxu0 %v5100_v10  ;;  %v991_v7 = vpop.f32.mrf.mxu1  ;;  %v3401_v17 = vrot.slane %v4549_v51, 2  ;;  %v3378_v32 = vsel %vm1080_vm1, %v3376_v60, %v3377_v61  ;;  %v5115_v1 = vld [vmem:[#allocation2 + $0x8f0] ss:$8 sps:$4 sm:$0xff]  }
 0x183   : > { %4617 = vmatpush1.bf16.msra.mxu1 %v5100_v10  ;;  %3640 = vmatprep.subr.bf16.mxu0 %v5105_v22  ;;  %v4547_v10 = vld [vmem:[%s5599_s29 + $0xe8] sm:$0xfc]  ;;  %v6062_v31 = vadd.f32 %v991_v7, %v758_v23  ;;  %v760_v37 = vpop.f32.mrf.mxu0  ;;  %v3432_v15 = vpack.c.bf16 %v3378_v32, %v3372_v27  ;;  %v5121_v20 = vld [vmem:[#allocation2 + $0x8d0] ss:$8 sps:$4 sm:$0xff]   ;;  %v5129_v32 = vld [vmem:[#allocation2 + $0x8b4] ss:$8 sps:$4 sm:$0xff]  }
 0x184   : > { %4602 = vmatprep.subr.bf16.mxu1 %v5105_v22  ;;  %v3400_v16 = vrot.slane %v4547_v10, 2  ;;  %v3019_v22 = vpack.c.bf16 %v2993_v62, %v2987_v19  ;;  %v5123_v10 = vld [vmem:[#allocation2 + $0x8d4] ss:$8 sps:$4 sm:$0xff]  }
 0x185   : > { %2849 = vmatmul.mubr.bf16.gmra.mxu0 %v2599_v18  ;;  %v2601_v18 = vpack.c.bf16 %v4428_v47, %v4426_v46  ;;  %v764_v46 = vpop.f32.mrf.mxu0  ;;  %v5112_v47 = vld [vmem:[#allocation2 + $0x800] ss:$8 sps:$4 sm:$0xff]  }
 0x186   : > { %3267 = vmatmul.mubr.bf16.gmra.mxu1 %v3017_v26  ;;  %3641 = vmatpush1.bf16.msra.mxu0 %v5103_v49  ;;  %v993_v26 = vpop.f32.mrf.mxu1  ;;  %v3402_v35 = vsel %vm1080_vm1, %v3400_v16, %v3401_v17  ;;  %v5126_v16 = vld [vmem:[#allocation2 + $0x8c4] ss:$8 sps:$4 sm:$0xff]  }
 0x187   : > { %4618 = vmatpush1.bf16.msra.mxu1 %v5103_v49  ;;  %3642 = vmatprep.subr.bf16.mxu0 %v5108_v40  ;;  %v6067_v49 = vadd.f32 %v993_v26, %v760_v37  ;;  %v766_v53 = vpop.f32.mrf.mxu0  ;;  %v5124_v26 = vld [vmem:[#allocation2 + $0x8c0] ss:$8 sps:$4 sm:$0xff]  }
 0x188   : > { %4603 = vmatprep.subr.bf16.mxu1 %v5108_v40  ;;  %2858 = vmatprep.mubr.bf16.mxu0 %v2602_v57  ;;  %v997_v40 = vpop.f32.mrf.mxu1  ;;  %v3436_v57 = vpack.c.bf16 %v3402_v35, %v3396_v33  ;;  %v4526_v35 = vld [vmem:[%s5599_s29 + $0x40] sm:$0xfc] }
 0x189   : > { %3276 = vmatprep.mubr.bf16.mxu1 %v3020_v48  ;;  %v6069_v48 = vadd.f32 %v997_v40, %v764_v46  ;;  %v768_v59 = vpop.f32.mrf.mxu0  ;;  %v4530_v37 = vld [vmem:[%s5599_s29 + $0x60] sm:$0xfc]  ;;  %v5127_v40 = vld [vmem:[#allocation2 + $0x8b0] ss:$8 sps:$4 sm:$0xff]  }
 0x18a   : > { %3643 = vmatpush1.bf16.msra.mxu0 %v5106_v6  ;;  %v999_v50 = vpop.f32.mrf.mxu1 }
 0x18b   : > { %4619 = vmatpush1.bf16.msra.mxu1 %v5106_v6  ;;  %3644 = vmatprep.subr.bf16.mxu0 %v5111_v13  ;;  %v6071_v54 = vadd.f32 %v999_v50, %v766_v53  ;;  %v770_v19 = vpop.f32.mrf.mxu0  ;;  %v5130_v50 = vld [vmem:[#allocation2 + $0x8a0] ss:$8 sps:$4 sm:$0xff]  }
 0x18c   : > { %4604 = vmatprep.subr.bf16.mxu1 %v5111_v13  ;;  %v1001_v55 = vpop.f32.mrf.mxu1 }
 0x18d   : > { %2859 = vmatmul.mubr.bf16.gmra.mxu0 %v2601_v18  ;;  %v6073_v60 = vadd.f32 %v1001_v55, %v768_v59  ;;  %v4544_v55 = vld [vmem:[%s5599_s29 + $0xd0] sm:$0x3]  ;;  %v4546_v59 = vld [vmem:[%s5599_s29 + $0xe0] sm:$0xfc] }
 0x18e   : > { %3277 = vmatmul.mubr.bf16.gmra.mxu1 %v3019_v22  ;;  %3645 = vmatpush1.bf16.msra.mxu0 %v5109_v36  ;;  %v1003_v61 = vpop.f32.mrf.mxu1 }
 0x18f   : > { %4620 = vmatpush1.bf16.msra.mxu1 %v5109_v36  ;;  %3646 = vmatprep.subr.bf16.mxu0 %v5114_v38  ;;  %v6075_v62 = vadd.f32 %v1003_v61, %v770_v19  ;;  %v4528_v36 = vld [vmem:[%s5599_s29 + $0x50] sm:$0x3]  ;;  %v4537_v19 = vld [vmem:[%s5599_s29 + $0x98] sm:$0x3] }
 0x190   : > { %4605 = vmatprep.subr.bf16.mxu1 %v5114_v38  ;;  %3664 = vmatprep.mubr.bf16.mxu0 %v3432_v15  ;;  %v1007_v7 = vpop.f32.mrf.mxu1  ;;  %v774_v6 = vpop.f32.mrf.mxu0  ;;  %v4532_v38 = vld [vmem:[%s5599_s29 + $0x70] sm:$0x3]  ;;  %v5132_v15 = vld [vmem:[#allocation2 + $0x8a4] ss:$8 sps:$4 sm:$0xff]   ;;  %v3368_v46 = vrot.slane %v4528_v36, 2 }
 0x191   : > { %3684 = vmatprep.mubr.bf16.mxu1 %v3436_v57  ;;  %v6077_v24 = vadd.f32 %v1007_v7, %v774_v6  ;;  %v3367_v57 = vrot.slane %v4526_v35, 2  ;;  %v3374_v53 = vrot.slane %v4532_v38, 2  ;;  %v4548_v61 = vld [vmem:[%s5599_s29 + $0xf0] sm:$0x3]  ;;  %v4539_v7 = vld [vmem:[%s5599_s29 + $0xa8] sm:$0xfc] }
 0x192   : > { %3647 = vmatpush1.bf16.msra.mxu0 %v5112_v47  ;;  %v1009_v51 = vpop.f32.mrf.mxu1  ;;  %v776_v13 = vpop.f32.mrf.mxu0  ;;  %v4555_v6 = vld [vmem:[%s5599_s29 + $0x128] sm:$0xfc]  ;;  %v5133_v35 = vld [vmem:[#allocation2 + $0x890] ss:$8 sps:$4 sm:$0xff]  }
 0x193   : > { %4621 = vmatpush1.bf16.msra.mxu1 %v5112_v47  ;;  %3648 = vmatprep.subr.bf16.mxu0 %v5117_v52  ;;  %v6079_v17 = vadd.f32 %v1009_v51, %v776_v13  ;;  %v4542_v47 = vld [vmem:[%s5599_s29 + $0xc0] sm:$0xfc]  ;;  %v4553_v51 = vld [vmem:[%s5599_s29 + $0x118] sm:$0x3]  ;;  %v3392_v13 = vrot.slane %v4544_v55, 2  ;;  %v3412_v38 = vrot.slane %v4555_v6, 2 }
 0x194   : > { %4606 = vmatprep.subr.bf16.mxu1 %v5117_v52  ;;  %v1011_v12 = vpop.f32.mrf.mxu1  ;;  %v778_v18 = vpop.f32.mrf.mxu0  ;;  %v3373_v52 = vrot.slane %v4530_v37, 2  ;;  %v3407_v37 = vrot.slane %v4553_v51, 2  ;;  %v4554_v51 = vld [vmem:[%s5599_s29 + $0x120] sm:$0xfc]  ;;  %v4556_v6 = vld [vmem:[%s5599_s29 + $0x130] sm:$0x3] }
 0x195   : > { %v6081_v23 = vadd.f32 %v1011_v12, %v778_v18  ;;  %v4557_v12 = vld [vmem:[%s5599_s29 + $0x138] sm:$0x3]  ;;  %v3398_v18 = vrot.slane %v4548_v61, 2 }
 0x196   : > { %3649 = vmatpush2.bf16.msra.mxu0 %v5115_v1  ;;  %v1013_v22 = vpop.f32.mrf.mxu1  ;;  %v780_v27 = vpop.f32.mrf.mxu0  ;;  %v3375_v55 = vsel %vm1080_vm1, %v3373_v52, %v3374_v53  ;;  %v4538_v52 = vld [vmem:[%s5599_s29 + $0xa0] sm:$0xfc]  ;;  %v4540_v53 = vld [vmem:[%s5599_s29 + $0xb0] sm:$0x3] }
 0x197   : > { %4622 = vmatpush2.bf16.msra.mxu1 %v5115_v1  ;;  %3650 = vmatprep.subr.bf16.mxu0 %v5120_v42  ;;  %v6083_v33 = vadd.f32 %v1013_v22, %v780_v27  ;;  %v5135_v1 = vld [vmem:[#allocation2 + $0x894] ss:$8 sps:$4 sm:$0xff]   ;;  %v3388_v27 = vrot.slane %v4539_v7, 2  ;;  %v4536_v7 = vld [vmem:[%s5599_s29 + $0x90] sm:$0x3] }
 0x198   : > { %4607 = vmatprep.subr.bf16.mxu1 %v5120_v42  ;;  %v4535_v42 = vld [vmem:[%s5599_s29 + $0x88] sm:$0xfc] }
 0x199   : > { %v3382_v22 = vrot.slane %v4535_v42, 2 }
 0x19a   : > { %3651 = vmatpush2.bf16.msra.mxu0 %v5118_v8 }
 0x19b   : > { %4623 = vmatpush2.bf16.msra.mxu1 %v5118_v8  ;;  %3652 = vmatprep.subr.bf16.mxu0 %v5123_v10  ;;  %v4541_v8 = vld [vmem:[%s5599_s29 + $0xb8] sm:$0x3] }
 0x19c   : > { %4608 = vmatprep.subr.bf16.mxu1 %v5123_v10  ;;  %v4551_v10 = vld [vmem:[%s5599_s29 + $0x108] sm:$0xfc] }
 0x19d   : > { %v3406_v36 = vrot.slane %v4551_v10, 2  ;;  %v4552_v10 = vld [vmem:[%s5599_s29 + $0x110] sm:$0x3] }
 0x19e   : > { %3653 = vmatpush2.bf16.msra.mxu0 %v5121_v20 }
 0x19f   : > { %4624 = vmatpush2.bf16.msra.mxu1 %v5121_v20  ;;  %3654 = vmatprep.subr.bf16.mxu0 %v5126_v16  ;;  %v3391_v20 = vrot.slane %v4542_v47, 2  ;;  %v3369_v47 = vsel %vm1080_vm1, %v3367_v57, %v3368_v46  ;;  %v3408_v57 = vsel %vm1080_vm1, %v3406_v36, %v3407_v37  ;;  %v3409_v36 = vrot.slane %v4554_v51, 2 }
 0x1a0   : > { %4609 = vmatprep.subr.bf16.mxu1 %v5126_v16  ;;  %v3397_v16 = vrot.slane %v4546_v59, 2  ;;  %v5136_v59 = vld [vmem:[#allocation2 + $0x880] ss:$8 sps:$4 sm:$0xff]   ;;  %v3410_v37 = vrot.slane %v4556_v6, 2 }
 0x1a2   : > { %3655 = vmatpush2.bf16.msra.mxu0 %v5124_v26  ;;  %v3399_v61 = vsel %vm1080_vm1, %v3397_v16, %v3398_v18 }
 0x1a3   : > { %4625 = vmatpush2.bf16.msra.mxu1 %v5124_v26  ;;  %3656 = vmatprep.subr.bf16.mxu0 %v5129_v32  ;;  %v3383_v26 = vrot.slane %v4537_v19, 2 }
 0x1a4   : > { %4610 = vmatprep.subr.bf16.mxu1 %v5129_v32  ;;  %v3389_v32 = vrot.slane %v4541_v8, 2  ;;  %v4550_v8 = vld [vmem:[%s5599_s29 + $0x100] sm:$0xfc] }
 0x1a5   : > { %v3384_v42 = vsel %vm1080_vm1, %v3382_v22, %v3383_v26  ;;  %v3380_v22 = vrot.slane %v4536_v7, 2  ;;  %v3385_v26 = vrot.slane %v4538_v52, 2 }
 0x1a6   : > { %3657 = vmatpush2.bf16.msra.mxu0 %v5127_v40  ;;  %v3390_v19 = vsel %vm1080_vm1, %v3388_v27, %v3389_v32  ;;  %v3386_v27 = vrot.slane %v4540_v53, 2  ;;  %v3403_v32 = vrot.slane %v4550_v8, 2 }
 0x1a7   : > { %4626 = vmatpush2.bf16.msra.mxu1 %v5127_v40  ;;  %3658 = vmatprep.subr.bf16.mxu0 %v5132_v15  ;;  %v3413_v40 = vrot.slane %v4557_v12, 2  ;;  %v3431_v12 = vpack.c.bf16 %v3375_v55, %v3369_v47 }
 0x1a8   : > { %4611 = vmatprep.subr.bf16.mxu1 %v5132_v15  ;;  %v5138_v15 = vld [vmem:[#allocation2 + $0x884] ss:$8 sps:$4 sm:$0xff]   ;;  %v3387_v47 = vsel %vm1080_vm1, %v3385_v26, %v3386_v27 }
 0x1a9   : > { %v3414_v46 = vsel %vm1080_vm1, %v3412_v38, %v3413_v40 }
 0x1aa   : > { %3659 = vmatpush2.bf16.msra.mxu0 %v5130_v50  ;;  %v3438_v18 = vpack.c.bf16 %v3414_v46, %v3408_v57 }
 0x1ab   : > { %4627 = vmatpush2.bf16.msra.mxu1 %v5130_v50  ;;  %3660 = vmatprep.subr.bf16.mxu0 %v5135_v1  ;;  %v3393_v50 = vsel %vm1080_vm1, %v3391_v20, %v3392_v13  ;;  %v3434_v13 = vpack.c.bf16 %v3390_v19, %v3384_v42 }
 0x1ac   : > { %4612 = vmatprep.subr.bf16.mxu1 %v5135_v1  ;;  %v4534_v1 = vld [vmem:[%s5599_s29 + $0x80] sm:$0xfc]  ;;  %v3435_v20 = vpack.c.bf16 %v3399_v61, %v3393_v50 }
 0x1ad   : > { %v3379_v16 = vrot.slane %v4534_v1, 2 }
 0x1ae   : > { %3661 = vmatpush2.bf16.msra.mxu0 %v5133_v35 }
 0x1af   : > { %4628 = vmatpush2.bf16.msra.mxu1 %v5133_v35  ;;  %3662 = vmatprep.subr.bf16.mxu0 %v5138_v15  ;;  %v3404_v35 = vrot.slane %v4552_v10, 2 }
 0x1b0   : > { %4613 = vmatprep.subr.bf16.mxu1 %v5138_v15  ;;  %v3381_v15 = vsel %vm1080_vm1, %v3379_v16, %v3380_v22 }
 0x1b1   : > { %v3405_v50 = vsel %vm1080_vm1, %v3403_v32, %v3404_v35  ;;  %v3433_v46 = vpack.c.bf16 %v3387_v47, %v3381_v15 }
 0x1b2   : > { %3663 = vmatpush2.bf16.msra.mxu0 %v5136_v59 }
 0x1b3   : > { %4629 = vmatpush2.bf16.msra.mxu1 %v5136_v59  ;;  %v3411_v59 = vsel %vm1080_vm1, %v3409_v36, %v3410_v37 }
 0x1b4   : > { %v3437_v52 = vpack.c.bf16 %v3411_v59, %v3405_v50 }
 0x1b5   : > { %v1380_v38 = vpop.f32.mrf.mxu0  ;;  %3665 = vmatmul.mubr.bf16.vlgmr.msra.gmra.mxu0 %v3431_v12 }
 0x1b6   : > { %v1687_v40 = vpop.f32.mrf.mxu1  ;;  %3685 = vmatmul.mubr.bf16.vlgmr.msra.gmra.mxu1 %v3435_v20  ;;  %v1419_v55 = vadd.f32 %v1380_v38, %v6013_v28  ;;  %3674 = vmatprep.mubr.bf16.mxu0 %v3434_v13 }
 0x1b7   : > { %3694 = vmatprep.mubr.bf16.mxu1 %v3438_v18  ;;  %v1382_v61 = vpop.f32.mrf.mxu0 }
 0x1b8   : > { %v1689_v42 = vpop.f32.mrf.mxu1  ;;  %v6122_v19 = vadd.f32 %v1687_v40, %v1419_v55  ;;  %v1420_v1 = vadd.f32 %v1382_v61, %v6023_v43 }
 0x1b9   : > { %v1384_v7 = vpop.f32.mrf.mxu0 }
 0x1ba   : > { %v1691_v57 = vpop.f32.mrf.mxu1  ;;  %v6125_v53 = vadd.f32 %v1689_v42, %v1420_v1  ;;  %v1421_v28 = vadd.f32 %v1384_v7, %v6029_v25 }
 0x1bb   : > { %v1386_v8 = vpop.f32.mrf.mxu0 }
 0x1bc   : > { %v1693_v10 = vpop.f32.mrf.mxu1  ;;  %v6128_v51 = vadd.f32 %v1691_v57, %v1421_v28  ;;  %v1422_v6 = vadd.f32 %v1386_v8, %v6033_v9 }
 0x1bd   : > { %v1390_v12 = vpop.f32.mrf.mxu0  ;;  %3675 = vmatmul.mubr.bf16.gmra.mxu0 %v3433_v46 }
 0x1be   : > { %3695 = vmatmul.mubr.bf16.gmra.mxu1 %v3437_v52  ;;  %v1697_v20 = vpop.f32.mrf.mxu1  ;;  %v6131_v13 = vadd.f32 %v1693_v10, %v1422_v6  ;;  %v1423_v43 = vadd.f32 %v1390_v12, %v6054_v3 }
 0x1bf   : > { %v1392_v16 = vpop.f32.mrf.mxu0 }
 0x1c0   : > { %v1699_v18 = vpop.f32.mrf.mxu1  ;;  %v1424_v22 = vadd.f32 %v1392_v16, %v6059_v14  ;;  %v6135_v26 = vadd.f32 %v1697_v20, %v1423_v43 }
 0x1c1   : > { %v1394_v25 = vpop.f32.mrf.mxu0 }
 0x1c2   : > { %v1701_v27 = vpop.f32.mrf.mxu1  ;;  %v1425_v32 = vadd.f32 %v1394_v25, %v6062_v31  ;;  %v6138_v35 = vadd.f32 %v1699_v18, %v1424_v22 }
 0x1c3   : > { %v1396_v9 = vpop.f32.mrf.mxu0 }
 0x1c4   : > { %v1703_v36 = vpop.f32.mrf.mxu1  ;;  %v1426_v37 = vadd.f32 %v1396_v9, %v6067_v49  ;;  %v6141_v38 = vadd.f32 %v1701_v27, %v1425_v32 }
 0x1c5   : > { %v1400_v40 = vpop.f32.mrf.mxu0 }
 0x1c6   : > { %v1707_v3 = vpop.f32.mrf.mxu1  ;;  %v1427_v15 = vadd.f32 %v1400_v40, %v6069_v48  ;;  %v6144_v47 = vadd.f32 %v1703_v36, %v1426_v37 }
 0x1c7   : > { %v1402_v14 = vpop.f32.mrf.mxu0 }
 0x1c8   : > { %v1709_v55 = vpop.f32.mrf.mxu1  ;;  %v1428_v50 = vadd.f32 %v1402_v14, %v6071_v54  ;;  %v6147_v59 = vadd.f32 %v1707_v3, %v1427_v15 }
 0x1c9   : > { %v1404_v31 = vpop.f32.mrf.mxu0 }
 0x1ca   : > { %v1711_v61 = vpop.f32.mrf.mxu1  ;;  %v1429_v42 = vadd.f32 %v1404_v31, %v6073_v60  ;;  %v6150_v1 = vadd.f32 %v1709_v55, %v1428_v50 }
 0x1cb   : > { %v1406_v49 = vpop.f32.mrf.mxu0 }
 0x1cc   : > { %v1713_v7 = vpop.f32.mrf.mxu1  ;;  %v1430_v57 = vadd.f32 %v1406_v49, %v6075_v62  ;;  %v6153_v46 = vadd.f32 %v1711_v61, %v1429_v42 }
 0x1cd   : > { %v1410_v48 = vpop.f32.mrf.mxu0 }
 0x1ce   : > { %v1717_v52 = vpop.f32.mrf.mxu1  ;;  %v1431_v28 = vadd.f32 %v1410_v48, %v6077_v24  ;;  %v6156_v8 = vadd.f32 %v1713_v7, %v1430_v57 }
 0x1cf   : > { %v1412_v54 = vpop.f32.mrf.mxu0 }
 0x1d0   : > { %v1719_v10 = vpop.f32.mrf.mxu1  ;;  %v1432_v6 = vadd.f32 %v1412_v54, %v6079_v17  ;;  %v6159_v12 = vadd.f32 %v1717_v52, %v1431_v28 }
 0x1d1   : > { %v1414_v60 = vpop.f32.mrf.mxu0 }
 0x1d2   : > { %v1721_v20 = vpop.f32.mrf.mxu1  ;;  %v1433_v43 = vadd.f32 %v1414_v60, %v6081_v23  ;;  %v6162_v16 = vadd.f32 %v1719_v10, %v1432_v6 }
 0x1d3   : > { %v1416_v62 = vpop.f32.mrf.mxu0 }
 0x1d4   : > { %v1723_v18 = vpop.f32.mrf.mxu1  ;;  %v1434_v22 = vadd.f32 %v1416_v62, %v6083_v33  ;;  %v6165_v25 = vadd.f32 %v1721_v20, %v1433_v43 }
 0x1d6   : > { %v6167_v24 = vadd.f32 %v1723_v18, %v1434_v22 }
 0x1f5   : > { %v2105_v27 = vpop.f32.mrf.mxu0 }
 0x1f6   : > { %v6169_v32 = vpop.f32.mrf.mxu1 }
 0x1f7   : > { %v2107_v17 = vpop.f32.mrf.mxu0 }
 0x1f8   : > { %v6171_v9 = vpop.f32.mrf.mxu1 }
 0x1f9   : > { %v2109_v36 = vpop.f32.mrf.mxu0 }
 0x1fa   : > { %v6173_v37 = vpop.f32.mrf.mxu1 }
 0x1fb   : > { %v2111_v23 = vpop.f32.mrf.mxu0 }
 0x1fc   : > { %v6175_v40 = vpop.f32.mrf.mxu1 }
 0x1fd   : > { %v6177_v3 = vpop.f32.mrf.mxu0 }
 0x1fe   : > { %v6179_v15 = vpop.f32.mrf.mxu1 }
 0x1ff   : > { %v6181_v33 = vpop.f32.mrf.mxu0 }
 0x200   : > { %v6183_v14 = vpop.f32.mrf.mxu1 }
 0x201   : > { %v6185_v55 = vpop.f32.mrf.mxu0 }
 0x202   : > { %v6187_v50 = vpop.f32.mrf.mxu1 }
 0x203   : > { %v6189_v31 = vpop.f32.mrf.mxu0 }
 0x204   : > { %v6191_v61 = vpop.f32.mrf.mxu1 }
 0x205   : > { %v2125_v42 = vpop.f32.mrf.mxu0 }
 0x206   : > { %v6193_v49 = vpop.f32.mrf.mxu1 }
 0x207   : > { %v2127_v7 = vpop.f32.mrf.mxu0 }
 0x208   : > { %v6195_v57 = vpop.f32.mrf.mxu1 }
 0x209   : > { %v6197_v48 = vpop.f32.mrf.mxu0 }
 0x20a   : > { %v6199_v52 = vpop.f32.mrf.mxu1 }
 0x20b   : > { %v6201_v28 = vpop.f32.mrf.mxu0 }
 0x20c   : > { %v6203_v54 = vpop.f32.mrf.mxu1 }
 0x20d   : > { %v6205_v10 = vpop.f32.mrf.mxu0 }
 0x20e   : > { %v6207_v6 = vpop.f32.mrf.mxu1 }
 0x20f   : > { %v6209_v60 = vpop.f32.mrf.mxu0 }
 0x210   : > { %v6211_v20 = vpop.f32.mrf.mxu1 }
 0x211   : > { %6710 = vst [vmem:[#allocation30_spill] sm:$0xff] %v6211_v20  ;;  %v6213_v43 = vpop.f32.mrf.mxu0 }
 0x212   : > { %v6215_v62 = vpop.f32.mrf.mxu1 }
 0x213   : > { %6711 = vst [vmem:[#allocation31_spill] sm:$0xff] %v6215_v62  ;;  %v6217_v18 = vpop.f32.mrf.mxu0 }
 0x214   : > { %v6219_v22 = vpop.f32.mrf.mxu1 }
 0x215   : > { %6712 = vst [vmem:[#allocation32_spill] sm:$0xff] %v6219_v22 }
 0x235   : > { %v6221_v45 = vpop.f32.mrf.mxu0 }
 0x236   : > { %v6223_v0 = vpop.f32.mrf.mxu1 }
 0x237   : > { %6713 = vst [vmem:[#allocation33_spill] sm:$0xff] %v6223_v0  ;;  %v6225_v58 = vpop.f32.mrf.mxu0 }
 0x238   : > { %v6227_v34 = vpop.f32.mrf.mxu1 }
 0x239   : > { %6714 = vst [vmem:[#allocation34_spill] sm:$0xff] %v6227_v34  ;;  %v6229_v4 = vpop.f32.mrf.mxu0 }
 0x23a   : > { %v6231_v63 = vpop.f32.mrf.mxu1 }
 0x23b   : > { %6715 = vst [vmem:[#allocation35_spill] sm:$0xff] %v6231_v63  ;;  %v6233_v44 = vpop.f32.mrf.mxu0 }
 0x23c   : > { %6716 = vst [vmem:[#allocation36_spill] sm:$0xff] %v6233_v44  ;;  %v6235_v11 = vpop.f32.mrf.mxu1 }
 0x23d   : > { %6717 = vst [vmem:[#allocation37_spill] sm:$0xff] %v6235_v11  ;;  %v6237_v56 = vpop.f32.mrf.mxu0 }
 0x23e   : > { %6718 = vst [vmem:[#allocation38_spill] sm:$0xff] %v6237_v56  ;;  %v6239_v41 = vpop.f32.mrf.mxu1  ;;  %v2145_v56 = vadd.f32 %v2107_v17, %v6125_v53  ;;  %v2153_v53 = vadd.f32 %v2127_v7, %v6150_v1  ;;  %v2151_v1 = vadd.f32 %v6189_v31, %v6144_v47 }
 0x23f   : > { %6719 = vst [vmem:[#allocation39_spill] sm:$0xff] %v6239_v41  ;;  %v6241_v39 = vpop.f32.mrf.mxu0  ;;  %v3722_v41 = vlaneseq }
 0x240   : > { %6720 = vst [vmem:[#allocation40_spill] sm:$0xff] %v6241_v39  ;;  %v6243_v30 = vpop.f32.mrf.mxu1 }
 0x241   : > { %6721 = vst [vmem:[#allocation41_spill] sm:$0xff] %v6243_v30  ;;  %v6245_v29 = vpop.f32.mrf.mxu0  ;;  %v3723_v30 = vshrl.u32 %v3722_v41, 7  ;;  %v2147_v41 = vadd.f32 %v2111_v23, %v6131_v13 }
 0x242   : > { %6722 = vst [vmem:[#allocation42_spill] sm:$0xff] %v6245_v29  ;;  %v6247_v5 = vpop.f32.mrf.mxu1 }
 0x243   : > { %6723 = vst [vmem:[#allocation43_spill] sm:$0xff] %v6247_v5  ;;  %v6249_v2 = vpop.f32.mrf.mxu0  ;;  %v3728_v39 = vsub.s32 1, %v3723_v30 }
 0x244   : > { %6724 = vst [vmem:[#allocation44_spill] sm:$0xff] %v6249_v2  ;;  %v6251_v21 = vpop.f32.mrf.mxu1  ;;  %v3724_v2 = vsub.s32 0, %v3723_v30  ;;  %v2149_v30 = vadd.f32 %v6181_v33, %v6138_v35  ;;  %v2150_v35 = vadd.f32 %v6185_v55, %v6141_v38  ;;  %v2159_v55 = vadd.f32 %v6217_v18, %v6167_v24  ;;  %v6735_v24 = vld [vmem:[#allocation30_spill] sm:$0xff] }
 0x245   : > { %6725 = vst [vmem:[#allocation45_spill] sm:$0xff] %v6251_v21  ;;  %v2850_v63 = vpop.f32.mrf.mxu0  ;;  %v2144_v21 = vadd.f32 %v2105_v27, %v6122_v19  ;;  %v323_v19 = vld [vmem:[%s279_s23] sm:$0x3]  ;;  %v2148_v27 = vadd.f32 %v6177_v3, %v6135_v26  ;;  %v2565_v26 = vadd.f32 %v6175_v40, %v2147_v41  ;;  %v2571_v40 = vadd.f32 %v6195_v57, %v2153_v53 }
 0x246   : > { %v6253_v34 = vpop.f32.mrf.mxu1  ;;  %v6302_v23 = vrot.slane %v323_v19, %v3724_v2  ;;  %v2567_v38 = vadd.f32 %v6183_v14, %v2149_v30  ;;  %v6316_v33 = vrot.slane %v323_v19, %v3728_v39  ;;  %v2569_v14 = vadd.f32 %v6191_v61, %v2151_v1 }
 0x247   : > { %6726 = vst [vmem:[#allocation46_spill] sm:$0xff] %v6253_v34  ;;  %v2852_v11 = vpop.f32.mrf.mxu0  ;;  %v6734_v7 = vld [vmem:[#allocation40_spill] sm:$0xff] }
 0x248   : > { %v6255_v22 = vpop.f32.mrf.mxu1  ;;  %v2874_v61 = vadd.f32 %v6734_v7, %v2567_v38 }
 0x249   : > { %6727 = vst [vmem:[#allocation47_spill] sm:$0xff] %v6255_v22  ;;  %v6257_v0 = vpop.f32.mrf.mxu0  ;;  %v321_v22 = vld [vmem:[#allocation5] sm:$0x3]  ;;  %v6741_v18 = vld [vmem:[#allocation42_spill] sm:$0xff] }
 0x24a   : > { %6728 = vst [vmem:[#allocation48_spill] sm:$0xff] %v6257_v0  ;;  %v6259_v62 = vpop.f32.mrf.mxu1  ;;  %v2146_v0 = vadd.f32 %v2109_v36, %v6128_v51  ;;  %v6276_v44 = vrot.slane %v321_v22, %v3724_v2 }
 0x24b   : > { %6729 = vst [vmem:[#allocation49_spill] sm:$0xff] %v6259_v62  ;;  %v6261_v29 = vpop.f32.mrf.mxu0  ;;  %v322_v62 = vld [vmem:[%s5588_s15] sm:$0x3]  ;;  %s5299_s15 = sshll.u32 %s5375_s6, 4  ;;  %s5300_s15 = int_to_ptr.vmem [resolvable:$false] %s5299_s15 }
 0x24c   : > { %6730 = vst [vmem:[#allocation50_spill] sm:$0xff] %v6261_v29  ;;  %v6263_v5 = vpop.f32.mrf.mxu1  ;;  %v2562_v29 = vadd.f32 %v6169_v32, %v2144_v21  ;;  %v6289_v21 = vrot.slane %v321_v22, %v3728_v39  ;;  %v2564_v32 = vadd.f32 %v6173_v37, %v2146_v0  ;;  %v6293_v17 = vrot.slane %v322_v62, %v3724_v2  ;;  %s5301_s24 = scalar_lea.vmem %s5300_s15, 4096  ;;  %p5302_p5 = scmp.lt.s32.totalorder %s6601_s11, %s5300_s15 }
 0x24d   : > { %6731 = vst [vmem:[#allocation51_spill] sm:$0xff] %v6263_v5  ;;  %v6266_v20 = vpop.f32.mrf.mxu0  ;;  %v2152_v5 = vadd.f32 %v2125_v42, %v6147_v59  ;;  %v2563_v59 = vadd.f32 %v6171_v9, %v2145_v56  ;;  %v6295_v36 = vrot.slane %v322_v62, %v3728_v39  ;;  %v2154_v56 = vadd.f32 %v6197_v48, %v6153_v46  ;;  %v6740_v62 = vld [vmem:[#allocation34_spill] sm:$0xff]  ;;  %p5303_p9 = scmp.lt.s32.totalorder %s5301_s24, %s5295_s26 }
 0x24e   : > { %v6268_v34 = vpop.f32.mrf.mxu1  ;;  %v2155_v0 = vadd.f32 %v6201_v28, %v6156_v8  ;;  %v2156_v9 = vadd.f32 %v6205_v10, %v6159_v12  ;;  %v2566_v37 = vadd.f32 %v6179_v15, %v2148_v27  ;;  %v2158_v46 = vadd.f32 %v6213_v43, %v6165_v25 }
 0x24f   : > { %v6285_v51 = vpop.f32.mrf.mxu0  ;;  %v2570_v3 = vadd.f32 %v6193_v49, %v2152_v5  ;;  %v2157_v5 = vadd.f32 %v6209_v60, %v6162_v16  ;;  %v2869_v8 = vadd.f32 %v6221_v45, %v2562_v29  ;;  %v2568_v15 = vadd.f32 %v6187_v50, %v2150_v35  ;;  %v6732_v29 = vld [vmem:[#allocation36_spill] sm:$0xff]  ;;  %p5304_p10 = por %p5303_p9, %p5302_p5 }
 0x250   : > { %v6287_v13 = vpop.f32.mrf.mxu1  ;;  %v2870_v31 = vadd.f32 %v6225_v58, %v2563_v59  ;;  %v2572_v39 = vadd.f32 %v6199_v52, %v2154_v56  ;;  %v2573_v42 = vadd.f32 %v6203_v54, %v2155_v0  ;;  %v2574_v16 = vadd.f32 %v6207_v6, %v2156_v9  ;;  %v6736_v58 = vld [vmem:[#allocation31_spill] sm:$0xff]  ;;  %v6737_v52 = vld [vmem:[#allocation33_spill] sm:$0xff]  ;;  %v6738_v54 = vld [vmem:[#allocation46_spill] sm:$0xff] }
 0x251   : > { %v2864_v47 = vpop.f32.mrf.mxu0  ;;  %v2877_v12 = vadd.f32 %v2850_v63, %v2570_v3  ;;  %v2878_v49 = vadd.f32 %v2852_v11, %v2571_v40  ;;  %v2871_v25 = vadd.f32 %v6229_v4, %v2564_v32  ;;  %v2872_v45 = vadd.f32 %v6732_v29, %v2565_v26  ;;  %v6733_v63 = vld [vmem:[#allocation38_spill] sm:$0xff]  ;;  %v6739_v6 = vld [vmem:[#allocation32_spill] sm:$0xff]  ;;  %v6743_v53 = vld [vmem:[#allocation47_spill] sm:$0xff]  ;;  %p5305_p3 = pnand %p5304_p10, %p5298_p0 }
 0x252   : > { %v6314_v2 = vpop.f32.mrf.mxu1  ;;  %v2873_v50 = vadd.f32 %v6733_v63, %v2566_v37  ;;  %v2575_v28 = vadd.f32 %v6735_v24, %v2157_v5  ;;  %v2576_v10 = vadd.f32 %v6736_v58, %v2158_v46  ;;  %v3287_v60 = vadd.f32 %v6737_v52, %v2869_v8  ;;  %v6742_v41 = vld [vmem:[#allocation48_spill] sm:$0xff]  ;;  %v6745_v3 = vld [vmem:[#allocation35_spill] sm:$0xff]  ;;  %v6746_v0 = vld [vmem:[#allocation37_spill] sm:$0xff] }
 0x253   : > { %v2866_v57 = vpop.f32.mrf.mxu0  ;;  %v3295_v43 = vadd.f32 %v6738_v54, %v2877_v12  ;;  %v2577_v11 = vadd.f32 %v6739_v6, %v2159_v55  ;;  %v3288_v4 = vadd.f32 %v6740_v62, %v2870_v31  ;;  %v2875_v22 = vadd.f32 %v6741_v18, %v2568_v15  ;;  %v6744_v32 = vld [vmem:[#allocation50_spill] sm:$0xff]  ;;  %v6747_v37 = vld [vmem:[#allocation39_spill] sm:$0xff]  ;;  %v6748_v40 = vld [vmem:[#allocation41_spill] sm:$0xff] }
 0x254   : > { %v3284_v48 = vpop.f32.mrf.mxu1  ;;  %v2879_v19 = vadd.f32 %v6742_v41, %v2572_v39  ;;  %v3296_v59 = vadd.f32 %v6743_v53, %v2878_v49  ;;  %v2880_v26 = vadd.f32 %v6744_v32, %v2573_v42  ;;  %v3289_v56 = vadd.f32 %v6745_v3, %v2871_v25  ;;  %v6749_v12 = vld [vmem:[#allocation44_spill] sm:$0xff]  ;;  %v6750_v42 = vld [vmem:[#allocation43_spill] sm:$0xff]  ;;  %v6751_v29 = vld [vmem:[#allocation49_spill] sm:$0xff] }
 0x255   : > { %v3290_v9 = vadd.f32 %v6746_v0, %v2872_v45  ;;  %v3291_v38 = vadd.f32 %v6747_v37, %v2873_v50  ;;  %v3292_v5 = vadd.f32 %v6748_v40, %v2874_v61  ;;  %v2876_v15 = vadd.f32 %v6749_v12, %v2569_v14  ;;  %v6752_v61 = vld [vmem:[#allocation51_spill] sm:$0xff]  ;;  %v6753_v62 = vld [vmem:[#allocation45_spill] sm:$0xff] }
 0x256   : > { %v3293_v49 = vadd.f32 %v6750_v42, %v2875_v22  ;;  %v3297_v63 = vadd.f32 %v6751_v29, %v2879_v19  ;;  %v2881_v25 = vadd.f32 %v6266_v20, %v2574_v16  ;;  %v3298_v24 = vadd.f32 %v6752_v61, %v2880_v26 }
 0x257   : > { %v2882_v14 = vadd.f32 %v6285_v51, %v2575_v28  ;;  %v2884_v54 = vadd.f32 %v2866_v57, %v2577_v11 }
 0x258   : > { %v3299_v51 = vadd.f32 %v6268_v34, %v2881_v25 }
 0x259   : > { %v3302_v32 = vadd.f32 %v3284_v48, %v2884_v54 }
 0x275   : > { %v3666_v27 = vpop.f32.mrf.mxu0 }
 0x276   : > { %v3686_v30 = vpop.f32.mrf.mxu1  ;;  %v3705_v35 = vadd.f32 %v3666_v27, %v3287_v60  ;;  %v2883_v60 = vadd.f32 %v2864_v47, %v2576_v10 }
 0x277   : > { %v3713_v1 = vadd.f32 %v3686_v30, %v3295_v43  ;;  %v3668_v46 = vpop.f32.mrf.mxu0 }
 0x278   : > { %v3688_v8 = vpop.f32.mrf.mxu1  ;;  %v6351_v55 = vadd.f32 %v6276_v44, %v3705_v35  ;;  %v3706_v31 = vadd.f32 %v3668_v46, %v3288_v4  ;;  %v3294_v4 = vadd.f32 %v6753_v62, %v2876_v15  ;;  %v3301_v34 = vadd.f32 %v6314_v2, %v2883_v60 }
 0x279   : > { %v3714_v39 = vadd.f32 %v3688_v8, %v3296_v59  ;;  %v6357_v45 = vadd.f32 %v6276_v44, %v3713_v1  ;;  %v3670_v50 = vpop.f32.mrf.mxu0  ;;  %v3300_v59 = vadd.f32 %v6287_v13, %v2882_v14 }
 0x27a   : > { %v3690_v7 = vpop.f32.mrf.mxu1  ;;  %v6362_v58 = vadd.f32 %v6289_v21, %v3706_v31  ;;  %v3707_v43 = vadd.f32 %v3670_v50, %v3289_v56  ;;  %v3748_v18 = vmax.f32 %v6351_v55, 0.0 }
 0x27b   : > { %v6365_v52 = vadd.f32 %v6289_v21, %v3714_v39  ;;  %v3715_v6 = vadd.f32 %v3690_v7, %v3297_v63  ;;  %v3672_v20 = vpop.f32.mrf.mxu0  ;;  %v3756_v28 = vmax.f32 %v6357_v45, 0.0 }
 0x27c   : > { %v3692_v16 = vpop.f32.mrf.mxu1  ;;  %v3749_v22 = vmax.f32 %v6362_v58, 0.0  ;;  %v3708_v41 = vadd.f32 %v3672_v20, %v3290_v9  ;;  %v6374_v10 = vadd.f32 %v6276_v44, %v3707_v43  ;;  %v3775_v13 = vmul.f32 %v6293_v17, %v3748_v18 }
 0x27d   : > { %v3757_v19 = vmax.f32 %v6365_v52, 0.0  ;;  %v3716_v27 = vadd.f32 %v3692_v16, %v3298_v24  ;;  %v3676_v47 = vpop.f32.mrf.mxu0  ;;  %v6377_v11 = vadd.f32 %v6276_v44, %v3715_v6  ;;  %v3783_v2 = vmul.f32 %v6293_v17, %v3756_v28 }
 0x27e   : > { %v3696_v57 = vpop.f32.mrf.mxu1  ;;  %v6380_v30 = vadd.f32 %v6289_v21, %v3708_v41  ;;  %v3709_v53 = vadd.f32 %v3676_v47, %v3291_v38  ;;  %v3776_v1 = vmul.f32 %v6295_v36, %v3749_v22  ;;  %v3750_v46 = vmax.f32 %v6374_v10, 0.0 }
 0x27f   : > { %v3678_v26 = vpop.f32.mrf.mxu0  ;;  %v6388_v3 = vadd.f32 %v6289_v21, %v3716_v27  ;;  %v3784_v48 = vmul.f32 %v6295_v36, %v3757_v19  ;;  %v3717_v9 = vadd.f32 %v3696_v57, %v3299_v51  ;;  %v3802_v61 = vadd.f32 %v6302_v23, %v3775_v13 }
 0x280   : > { %v3698_v35 = vpop.f32.mrf.mxu1  ;;  %v6391_v56 = vadd.f32 %v6276_v44, %v3709_v53  ;;  %v3710_v0 = vadd.f32 %v3678_v26, %v3292_v5  ;;  %v3758_v5 = vmax.f32 %v6377_v11, 0.0  ;;  %v3751_v8 = vmax.f32 %v6380_v30, 0.0  ;;  %v6760_v30 = vld [vmem:[#allocation20_spill] sm:$0xff] }
 0x281   : > { %v3718_v37 = vadd.f32 %v3698_v35, %v3300_v59  ;;  %v3680_v38 = vpop.f32.mrf.mxu0  ;;  %v6413_v63 = vadd.f32 %v6316_v33, %v3776_v1  ;;  %v3759_v25 = vmax.f32 %v6388_v3, 0.0  ;;  %v6419_v24 = vadd.f32 %v6276_v44, %v3717_v9 }
 0x282   : > { %v3700_v40 = vpop.f32.mrf.mxu1  ;;  %v6406_v12 = vadd.f32 %v6289_v21, %v3710_v0  ;;  %v3752_v15 = vmax.f32 %v6391_v56, 0.0  ;;  %v3711_v39 = vadd.f32 %v3680_v38, %v3293_v49  ;;  %v3785_v20 = vmul.f32 %v6293_v17, %v3758_v5 }
 0x283   : > { %v6410_v31 = vadd.f32 %v6289_v21, %v3718_v37  ;;  %v3682_v42 = vpop.f32.mrf.mxu0  ;;  %v3719_v60 = vadd.f32 %v3700_v40, %v3301_v34  ;;  %v3818_v6 = vmax.f32 %v3802_v61, %v6413_v63  ;;  %v3777_v16 = vmul.f32 %v6293_v17, %v3750_v46 }
 0x284   : > { %v3702_v29 = vpop.f32.mrf.mxu1  ;;  %v3753_v50 = vmax.f32 %v6406_v12, 0.0  ;;  %v3712_v7 = vadd.f32 %v3682_v42, %v3294_v4  ;;  %v6422_v14 = vadd.f32 %v6276_v44, %v3711_v39  ;;  %v3778_v62 = vmul.f32 %v6295_v36, %v3751_v8 }
 0x285   : > { %v3720_v49 = vadd.f32 %v3702_v29, %v3302_v32  ;;  %v3779_v4 = vmul.f32 %v6293_v17, %v3752_v15  ;;  %v3761_v41 = vmax.f32 %v6410_v31, 0.0  ;;  %3819 = vmax.xlane.f32.xlu0 %v3818_v6  ;;  %v3786_v57 = vmul.f32 %v6295_v36, %v3759_v25 }
 0x286   : > { %v3780_v54 = vmul.f32 %v6295_v36, %v3753_v50  ;;  %v6428_v43 = vadd.f32 %v6289_v21, %v3712_v7  ;;  %v3754_v51 = vmax.f32 %v6422_v14, 0.0  ;;  %v3760_v53 = vmax.f32 %v6419_v24, 0.0 }
 0x287   : > { %v6447_v47 = vadd.f32 %v6289_v21, %v3720_v49  ;;  %v6454_v59 = vadd.f32 %v6276_v44, %v3719_v60  ;;  %v3810_v34 = vadd.f32 %v6302_v23, %v3783_v2  ;;  %v3811_v32 = vadd.f32 %v6316_v33, %v3784_v48 }
 0x288   : > { %v3755_v27 = vmax.f32 %v6428_v43, 0.0  ;;  %v3812_v21 = vadd.f32 %v6302_v23, %v3785_v20  ;;  %v3813_v35 = vadd.f32 %v6316_v33, %v3786_v57  ;;  %v3807_v1 = vadd.f32 %v6316_v33, %v3780_v54 }
 0x289   : > { %v3788_v0 = vmul.f32 %v6295_v36, %v3761_v41  ;;  %v3830_v44 = vmax.f32 %v3810_v34, %v3811_v32  ;;  %v3805_v13 = vadd.f32 %v6316_v33, %v3778_v62  ;;  %v3781_v2 = vmul.f32 %v6293_v17, %v3754_v51 }
 0x28a   : > { %v3782_v26 = vmul.f32 %v6295_v36, %v3755_v27  ;;  %v6676_v48 = vmax.f32 %v6447_v47, 0.0  ;;  %v3833_v9 = vmax.f32 %v3812_v21, %v3813_v35  ;;  %v3806_v37 = vadd.f32 %v6302_v23, %v3779_v4 }
 0x28b   : > { %v3787_v38 = vmul.f32 %v6293_v17, %v3760_v53  ;;  %3831 = vmax.xlane.f32.xlu0 %v3830_v44  ;;  %v3804_v40 = vadd.f32 %v6302_v23, %v3777_v16  ;;  %v6677_v39 = vmax.f32 %v6454_v59, 0.0  ;;  %v3815_v60 = vadd.f32 %v6316_v33, %v3788_v0 }
 0x28c   : > { %3834 = vmax.xlane.f32.xlu1 %v3833_v9  ;;  %v3824_v42 = vmax.f32 %v3806_v37, %v3807_v1  ;;  %v6479_v29 = vadd.f32 %v6316_v33, %v3782_v26  ;;  %v3790_v49 = vmul.f32 %v6295_v36, %v6676_v48  ;;  %v3808_v54 = vadd.f32 %v6302_v23, %v3781_v2 }
 0x28d   : > { %v3821_v7 = vmax.f32 %v3804_v40, %v3805_v13  ;;  %v3814_v6 = vadd.f32 %v6302_v23, %v3787_v38  ;;  %v3789_v20 = vmul.f32 %v6293_v17, %v6677_v39  ;;  %v6768_v14 = vmax.f32 %v6454_v59, 0.0 }
 0x28e   : > { %v3827_v16 = vmax.f32 %v3808_v54, %v6479_v29  ;;  %v6492_v4 = vadd.f32 %v6316_v33, %v3790_v49 }
 0x28f   : > { %3822 = vmax.xlane.f32.xlu0 %v3821_v7  ;;  %v3836_v62 = vmax.f32 %v3814_v6, %v3815_v60  ;;  %v3816_v36 = vadd.f32 %v6302_v23, %v3789_v20 }
 0x290   : > { %3825 = vmax.xlane.f32.xlu1 %v3824_v42 }
 0x291   : > { %v3839_v57 = vmax.f32 %v3816_v36, %v6492_v4 }
 0x293   : > { %3837 = vmax.xlane.f32.xlu0 %v3836_v62 }
 0x294   : > { %3828 = vmax.xlane.f32.xlu1 %v3827_v16 }
 0x298   : > { %3840 = vmax.xlane.f32.xlu1 %v3839_v57 }
 0x30e   : > { %v3820_v26 = vpop.xlane.xlu0 %3819 }
 0x30f   : > { %v3842_v0 = vsub.f32 %v3802_v61, %v3820_v26  ;;  %v3843_v44 = vsub.f32 %v6413_v63, %v3820_v26 }
 0x311   : > { %v3858_v2 = vmul.f32 1.442695, %v3842_v0  ;;  %v3860_v17 = vmul.f32 1.442695, %v3843_v44 }
 0x313   : > { %5139 = vpow2.f32 %v3858_v2 }
 0x314   : > { %v3832_v9 = vpop.xlane.xlu0 %3831  ;;  %5141 = vpow2.f32 %v3860_v17 }
 0x315   : > { %v3835_v38 = vpop.xlane.xlu1 %3834  ;;  %v3850_v42 = vsub.f32 %v3810_v34, %v3832_v9  ;;  %v3851_v33 = vsub.f32 %v3811_v32, %v3832_v9 }
 0x316   : > { %v3852_v7 = vsub.f32 %v3812_v21, %v3835_v38  ;;  %v3853_v20 = vsub.f32 %v3813_v35, %v3835_v38 }
 0x317   : > { %v3874_v49 = vmul.f32 1.442695, %v3850_v42  ;;  %v3876_v62 = vmul.f32 1.442695, %v3851_v33 }
 0x318   : > { %v3878_v16 = vmul.f32 1.442695, %v3852_v7  ;;  %v3823_v23 = vpop.xlane.xlu0 %3822  ;;  %v3880_v32 = vmul.f32 1.442695, %v3853_v20 }
 0x319   : > { %v3826_v48 = vpop.xlane.xlu1 %3825  ;;  %v3844_v57 = vsub.f32 %v3804_v40, %v3823_v23  ;;  %v3845_v39 = vsub.f32 %v3805_v13, %v3823_v23  ;;  %5143 = vpow2.f32 %v3874_v49 }
 0x31a   : > { %v3846_v61 = vsub.f32 %v3806_v37, %v3826_v48  ;;  %v3847_v63 = vsub.f32 %v3807_v1, %v3826_v48  ;;  %5145 = vpow2.f32 %v3878_v16 }
 0x31b   : > { %v3862_v26 = vmul.f32 1.442695, %v3844_v57  ;;  %5147 = vpow2.f32 %v3876_v62  ;;  %v3864_v2 = vmul.f32 1.442695, %v3845_v39 }
 0x31c   : > { %v3866_v0 = vmul.f32 1.442695, %v3846_v61  ;;  %v3868_v44 = vmul.f32 1.442695, %v3847_v63  ;;  %v3838_v34 = vpop.xlane.xlu0 %3837 }
 0x31d   : > { %5149 = vpow2.f32 %v3862_v26  ;;  %v3829_v21 = vpop.xlane.xlu1 %3828  ;;  %v3854_v17 = vsub.f32 %v3814_v6, %v3838_v34  ;;  %v3855_v9 = vsub.f32 %v3815_v60, %v3838_v34 }
 0x31e   : > { %5151 = vpow2.f32 %v3866_v0  ;;  %v3848_v35 = vsub.f32 %v3808_v54, %v3829_v21  ;;  %v3849_v40 = vsub.f32 %v6479_v29, %v3829_v21 }
 0x31f   : > { %5153 = vpow2.f32 %v3868_v44  ;;  %v3882_v13 = vmul.f32 1.442695, %v3854_v17  ;;  %v3884_v1 = vmul.f32 1.442695, %v3855_v9 }
 0x320   : > { %5155 = vpow2.f32 %v3864_v2  ;;  %v5140_v48 = vpop.eup %5139  ;;  %v3870_v37 = vmul.f32 1.442695, %v3848_v35  ;;  %v3872_v39 = vmul.f32 1.442695, %v3849_v40 }
 0x321   : > { %5157 = vpow2.f32 %v3880_v32  ;;  %v3841_v38 = vpop.xlane.xlu1 %3840  ;;  %v5142_v42 = vpop.eup %5141 }
 0x322   : > { %5159 = vpow2.f32 %v3882_v13  ;;  %v3856_v33 = vsub.f32 %v3816_v36, %v3841_v38  ;;  %v3857_v7 = vsub.f32 %v6492_v4, %v3841_v38  ;;  %v3890_v6 = vadd.f32 %v5142_v42, %v5140_v48 }
 0x323   : > { %5161 = vpow2.f32 %v3884_v1 }
 0x324   : > { %5163 = vpow2.f32 %v3870_v37  ;;  %v3886_v60 = vmul.f32 1.442695, %v3856_v33  ;;  %3891 = vadd.xlane.f32.xlu0 %v3890_v6  ;;  %v3888_v29 = vmul.f32 1.442695, %v3857_v7 }
 0x325   : > { %5165 = vpow2.f32 %v3872_v39 }
 0x326   : > { %v5144_v54 = vpop.eup %5143  ;;  %5167 = vpow2.f32 %v3886_v60 }
 0x327   : > { %v6499_v49 = vpop.eup %5145  ;;  %5169 = vpow2.f32 %v3888_v29 }
 0x328   : > { %v5148_v16 = vpop.eup %5147 }
 0x329   : > { %v3902_v23 = vadd.f32 %v5148_v16, %v5144_v54 }
 0x32a   : > { %v5150_v62 = vpop.eup %5149 }
 0x32b   : > { %v5152_v20 = vpop.eup %5151  ;;  %3903 = vadd.xlane.f32.xlu0 %v3902_v23  ;;  %v6754_v23 = vld [vmem:[#allocation16_spill] sm:$0xff] }
 0x32c   : > { %v5154_v57 = vpop.eup %5153 }
 0x32d   : > { %v5156_v36 = vpop.eup %5155  ;;  %v3896_v4 = vadd.f32 %v5154_v57, %v5152_v20 }
 0x32e   : > { %v6501_v61 = vpop.eup %5157  ;;  %v3893_v63 = vadd.f32 %v5156_v36, %v5150_v62 }
 0x32f   : > { %v6503_v26 = vpop.eup %5159  ;;  %3897 = vadd.xlane.f32.xlu0 %v3896_v4  ;;  %v3905_v2 = vadd.f32 %v6501_v61, %v6499_v49 }
 0x330   : > { %3894 = vadd.xlane.f32.xlu1 %v3893_v63  ;;  %v6505_v0 = vpop.eup %5161  ;;  %v6755_v63 = vld [vmem:[#allocation14_spill] sm:$0xff] }
 0x331   : > { %v6507_v44 = vpop.eup %5163  ;;  %v3908_v34 = vadd.f32 %v6505_v0, %v6503_v26 }
 0x332   : > { %v6513_v32 = vpop.eup %5165 }
 0x333   : > { %3909 = vadd.xlane.f32.xlu0 %v3908_v34  ;;  %v6515_v21 = vpop.eup %5167  ;;  %v3899_v17 = vadd.f32 %v6513_v32, %v6507_v44 }
 0x334   : > { %3906 = vadd.xlane.f32.xlu1 %v3905_v2  ;;  %v6519_v9 = vpop.eup %5169 }
 0x335   : > { %v3911_v35 = vadd.f32 %v6519_v9, %v6515_v21 }
 0x338   : > { %3900 = vadd.xlane.f32.xlu1 %v3899_v17 }
 0x33c   : > { %3912 = vadd.xlane.f32.xlu1 %v3911_v35 }
 0x3ad   : > { %v3892_v40 = vpop.xlane.xlu0 %3891 }
 0x3ae   : > { %5171 = vrcp.f32 %v3892_v40  ;;  %v6756_v40 = vld [vmem:[#allocation24_spill] sm:$0xff] }
 0x3b4   : > { %v3904_v13 = vpop.xlane.xlu0 %3903 }
 0x3b5   : > { %5173 = vrcp.f32 %v3904_v13 }
 0x3b8   : > { %v3898_v37 = vpop.xlane.xlu0 %3897 }
 0x3b9   : > { %v3895_v1 = vpop.xlane.xlu1 %3894 }
 0x3ba   : > { %5175 = vrcp.f32 %v3895_v1  ;;  %v6757_v1 = vld [vmem:[#allocation22_spill] sm:$0xff] }
 0x3bb   : > { %5177 = vrcp.f32 %v3898_v37  ;;  %v5172_v38 = vpop.eup %5171 }
 0x3bc   : > { %v3922_v39 = vmul.f32 %v5172_v38, %v5140_v48  ;;  %v3923_v33 = vmul.f32 %v5172_v38, %v5142_v42  ;;  %v3910_v6 = vpop.xlane.xlu0 %3909 }
 0x3bd   : > { %v3907_v7 = vpop.xlane.xlu1 %3906 }
 0x3be   : > { %5179 = vrcp.f32 %v3907_v7  ;;  %v3938_v60 = vmul.f32 %v3922_v39, %v3748_v18  ;;  %v3939_v29 = vmul.f32 %v3923_v33, %v3749_v22 }
 0x3bf   : > { %5181 = vrcp.f32 %v3910_v6  ;;  %v6761_v6 = vld [vmem:[#allocation18_spill] sm:$0xff] }
 0x3c0   : > { %v3954_v4 = vadd.f32 %v3938_v60, %v6754_v23  ;;  %v3955_v2 = vadd.f32 %v3939_v29, %v6755_v63  ;;  %v6763_v23 = vld [vmem:[#allocation23_spill] sm:$0xff]  ;;  %v6765_v63 = vld [vmem:[#allocation26_spill] sm:$0xff] }
 0x3c1   : > { %v3901_v34 = vpop.xlane.xlu1 %3900 }
 0x3c2   : > { %5183 = vrcp.f32 %v3901_v34  ;;  %v5174_v17 = vpop.eup %5173  ;;  %3970 = vst [vmem:[%s6530_s10] sm:$0xff] %v3954_v4  ;;  %3971 = vst [vmem:[%s6530_s10 + $0x8] sm:$0xff] %v3955_v2  ;;  %v6767_v2 = vld [vmem:[#allocation19_spill] sm:$0xff] }
 0x3c3   : > { %v3930_v55 = vmul.f32 %v5174_v17, %v5144_v54  ;;  %v3931_v18 = vmul.f32 %v5174_v17, %v5148_v16 }
 0x3c5   : > { %v3913_v58 = vpop.xlane.xlu1 %3912  ;;  %v3946_v22 = vmul.f32 %v3930_v55, %v3756_v28  ;;  %v3947_v48 = vmul.f32 %v3931_v18, %v3757_v19  ;;  %v6771_v18 = vld [vmem:[#allocation27_spill] sm:$0xff] }
 0x3c6   : > { %5185 = vrcp.f32 %v3913_v58 }
 0x3c7   : > { %v5176_v42 = vpop.eup %5175  ;;  %v3962_v13 = vadd.f32 %v3946_v22, %v6756_v40  ;;  %v3963_v37 = vadd.f32 %v3947_v48, %v6757_v1 }
 0x3c8   : > { %v5178_v35 = vpop.eup %5177  ;;  %v3924_v38 = vmul.f32 %v5176_v42, %v5150_v62  ;;  %v3925_v39 = vmul.f32 %v5176_v42, %v5156_v36  ;;  %v6758_v62 = vld [vmem:[#allocation17_spill] sm:$0xff] }
 0x3c9   : > { %v3926_v33 = vmul.f32 %v5178_v35, %v5152_v20  ;;  %v3927_v7 = vmul.f32 %v5178_v35, %v5154_v57  ;;  %3978 = vst [vmem:[%s6530_s10 + $0x40] sm:$0xff] %v3962_v13  ;;  %3979 = vst [vmem:[%s6530_s10 + $0x48] sm:$0xff] %v3963_v37  ;;  %v6759_v57 = vld [vmem:[#allocation15_spill] sm:$0xff] }
 0x3ca   : > { %v3940_v45 = vmul.f32 %v3924_v38, %v3750_v46  ;;  %v3941_v52 = vmul.f32 %v3925_v39, %v3751_v8 }
 0x3cb   : > { %v5180_v28 = vpop.eup %5179  ;;  %v3942_v19 = vmul.f32 %v3926_v33, %v3752_v15  ;;  %v3943_v54 = vmul.f32 %v3927_v7, %v3753_v50 }
 0x3cc   : > { %v5182_v16 = vpop.eup %5181  ;;  %v3956_v20 = vadd.f32 %v3940_v45, %v6758_v62  ;;  %v3957_v36 = vadd.f32 %v3941_v52, %v6759_v57  ;;  %v3932_v10 = vmul.f32 %v5180_v28, %v6499_v49  ;;  %v3933_v46 = vmul.f32 %v5180_v28, %v6501_v61 }
 0x3cd   : > { %v3958_v8 = vadd.f32 %v3942_v19, %v6760_v30  ;;  %v3959_v60 = vadd.f32 %v3943_v54, %v6761_v6  ;;  %v3934_v56 = vmul.f32 %v5182_v16, %v6503_v26  ;;  %v3935_v12 = vmul.f32 %v5182_v16, %v6505_v0  ;;  %v6762_v0 = vld [vmem:[#allocation25_spill] sm:$0xff] }
 0x3ce   : > { %3972 = vst [vmem:[%s6530_s10 + $0x10] sm:$0xff] %v3956_v20  ;;  %3973 = vst [vmem:[%s6530_s10 + $0x18] sm:$0xff] %v3957_v36  ;;  %v3948_v15 = vmul.f32 %v3932_v10, %v3758_v5  ;;  %v3949_v50 = vmul.f32 %v3933_v46, %v3759_v25  ;;  %v6764_v5 = vld [vmem:[#allocation28_spill] sm:$0xff] }
 0x3cf   : > { %v5184_v49 = vpop.eup %5183  ;;  %3974 = vst [vmem:[%s6530_s10 + $0x20] sm:$0xff] %v3958_v8  ;;  %3975 = vst [vmem:[%s6530_s10 + $0x28] sm:$0xff] %v3959_v60  ;;  %v3950_v61 = vmul.f32 %v3934_v56, %v3760_v53  ;;  %v3951_v26 = vmul.f32 %v3935_v12, %v3761_v41 }
 0x3d0   : > { %v3964_v29 = vadd.f32 %v3948_v15, %v6762_v0  ;;  %v3965_v4 = vadd.f32 %v3949_v50, %v6763_v23  ;;  %v3928_v11 = vmul.f32 %v5184_v49, %v6507_v44  ;;  %v3929_v3 = vmul.f32 %v5184_v49, %v6513_v32  ;;  %v6766_v44 = vld [vmem:[#allocation21_spill] sm:$0xff] }
 0x3d1   : > { %v3966_v25 = vadd.f32 %v3950_v61, %v6764_v5  ;;  %v3967_v24 = vadd.f32 %v3951_v26, %v6765_v63 }
 0x3d2   : > { %3980 = vst [vmem:[%s6530_s10 + $0x50] sm:$0xff] %v3964_v29  ;;  %3981 = vst [vmem:[%s6530_s10 + $0x58] sm:$0xff] %v3965_v4  ;;  %v3944_v31 = vmul.f32 %v3928_v11, %v3754_v51  ;;  %v3945_v41 = vmul.f32 %v3929_v3, %v3755_v27  ;;  %v6769_v51 = vmax.f32 %v6447_v47, 0.0 }
 0x3d3   : > { %v5186_v53 = vpop.eup %5185  ;;  %3982 = vst [vmem:[%s6530_s10 + $0x60] sm:$0xff] %v3966_v25  ;;  %3983 = vst [vmem:[%s6530_s10 + $0x68] sm:$0xff] %v3967_v24 }
 0x3d4   : > { %v3960_v32 = vadd.f32 %v3944_v31, %v6766_v44  ;;  %v3961_v34 = vadd.f32 %v3945_v41, %v6767_v2  ;;  %v3936_v17 = vmul.f32 %v5186_v53, %v6515_v21  ;;  %v3937_v55 = vmul.f32 %v5186_v53, %v6519_v9  ;;  %v6770_v21 = vld [vmem:[#allocation29_spill] sm:$0xff] }
 0x3d6   : > { %3976 = vst [vmem:[%s6530_s10 + $0x30] sm:$0xff] %v3960_v32  ;;  %3977 = vst [vmem:[%s6530_s10 + $0x38] sm:$0xff] %v3961_v34  ;;  %v3952_v43 = vmul.f32 %v3936_v17, %v6768_v14  ;;  %v3953_v27 = vmul.f32 %v3937_v55, %v6769_v51 }
 0x3d8   : > { %v3968_v9 = vadd.f32 %v3952_v43, %v6770_v21  ;;  %v3969_v58 = vadd.f32 %v3953_v27, %v6771_v18 }
 0x3da   : > { %3984 = vst [vmem:[%s6530_s10 + $0x70] sm:$0xff] %v3968_v9  ;;  %3985 = vst [vmem:[%s6530_s10 + $0x78] sm:$0xff] %v3969_v58 }
 0x3db   : > { %5308 = shalt.err (!%p5305_p3)
}
 0x3dc   : > { %s5309_s27 = scalar_lea.hbm %s6599_s9, 2048  ;;  %s5313_s29 = scalar_lea.hbm %s6653_s5, 4096 }
 0x3dd   : > { %p5310_p13 = scmp.ne.s32.totalorder %s6599_s9, %s5309_s27  ;;  %p5314_p6 = scmp.lt.s32.totalorder %s6599_s9, %s6653_s5 }
 0x3de   : > { %p5315_p2 = scmp.lt.s32.totalorder %s5313_s29, %s5309_s27 }
 0x3df   : > { %p5311_p1 = pnand %p5310_p13, %p6772_p12 }
 0x3e0   : > { %p5316_p11 = por %p5315_p2, %p5314_p6 }
 0x3e1   : > { %p5312_p4 = pneg %p5311_p1 }
 0x3e3   : > { %p5317_p8 = pnand %p5316_p11, %p5312_p4 }
 0x3e5   : > { %5320 = shalt.err (!%p5317_p8)
}
 0x3e6   : > { %s5376_s10 = smov 256   ;;  %s5377_s17 = smov 16  }
 0x3e7   : > { %4643 = dma.vmem_to_hbm [thread:$0]  (%p6772_p12), %s6601_s11, 2048, %s6599_s9, %s3987_s22, %s5376_s10, %s5376_s10, %s5377_s17  }
 0x3e8 PF: > { %s4015_s7 = sand.u32 1, %s5355_s18   ;;  %p6773_p7 = scmp.ne.s32.totalorder %s6680_s25, 0 }
 0x3e9   : > { %p6774_p0 = scmp.ge.s32.totalorder %s5367_s21, 2  ;;  %s4016_s8 = scalar_lea.sflag [#allocation4], %s4015_s7 }
 0x3eb   : > { %p4660_p5 = pnand %p6774_p0, %p6773_p7 }
 0x3ed   : > { %p4661_p9 = pneg %p4660_p5 }
 0x3ef   : > { %5350 = dma.done.wait (%p4661_p9), %s4016_s8, 2048  }
 0x3f0   : > { %5352 = vsyncadd (%p4661_p9), %s4016_s8, 4294965248  ;;  %p17_p10 = scmp.ge.s32.totalorder %s5462_s30, 4   ;;  %s6775_s18 = smov %s5359_s19 }
 0x3f1   : > { %s6776_s19 = smov %s5363_s20  ;;  %s6777_s20 = smov %s5482_s13 }
 0x3f2   : > { %s6778_s21 = smov %s5462_s30  ;;  %19 = sbr.rel (!%p17_p10) target bundleno = 7 (0x7), region = 116 }
 0x3f7   :  { %4021 = vsyncpa [#allocation3], 1 }
 0x3f8   :  { %4023 = vsyncpa [#allocation3 + $0x1], 1 }
 0x3f9   :  { %4024 = vsyncpa [#allocation6], 1 }
 0x3fa   :  { %4025 = vsyncpa [#allocation4], 1 }
 0x3fb   :  { %4027 = vsyncpa [#allocation4 + $0x1], 1 }

</bundles_post_ra>
